<compile_context>
chip_gen: v7x
topology: tpu7x:2x2x1
jax: 0.10.0
libtpu: 0.0.40
codegen_flags: <defaults>
</compile_context>

<pallas_src>
import functools

import jax
import jax.numpy as jnp
from jax.experimental import pallas as pl
from jax.experimental.pallas import tpu as pltpu


# ----------------------------------------------------------------------------
# In-kernel DCGRU cell math (traced helpers shared by encoder/decoder kernels).
# Layout: activations (features, B*N); weights (out_feat, in_feat); supports
# are the transposed block-diagonal matrices, so (A v)^T == v^T @ A_blk^T.
# ----------------------------------------------------------------------------
def _cheb_terms_fused(A_ref, v, *, n_adjs, K):
    """Chebyshev diffusion terms of v, stacked for one fused dot.

    v: (F, BN) f32.  Returns (num_mat*F, BN) bf16, num_mat = n_adjs*K + 1.
    Recurrence in f32; each graph product is ONE (F,BN)x(BN,BN) MXU dot.
    """
    terms = [v]
    if K >= 1:
        for a in range(n_adjs):
            Aa = A_ref[a]                                   # (BN, BN) bf16
            t0 = v
            t1 = jnp.dot(v.astype(jnp.bfloat16), Aa,
                         preferred_element_type=jnp.float32)
            terms.append(t1)
            for _ in range(2, K + 1):
                t2 = 2.0 * jnp.dot(t1.astype(jnp.bfloat16), Aa,
                                   preferred_element_type=jnp.float32) - t0
                terms.append(t2)
                t0, t1 = t1, t2
    # One (num_mat*F, BN) operand -> a single fused MXU dot downstream.
    return jnp.concatenate(terms, axis=0).astype(jnp.bfloat16)


def _dcgru_cell(x, h, A_ref, Wg_ref, bg_ref, Wc_ref, bc_ref, *, n_adjs, K, H):
    """One DCGRU cell update.  x: (C, BN) f32, h: (H, BN) f32 -> (H, BN) f32.

    Wg_ref: (2H, M*(C+H)) bf16 (r,u gates fused on the output dim),
    Wc_ref: (H,  M*(C+H)) bf16 (candidate), biases (2H,1)/(H,1) f32.
    Equivalent to the reference's diff_conv over [x,h] / [x, r*h].
    """
    # Gates: diffuse [x; h] once, one fused MXU dot, bias added once.
    zg = _cheb_terms_fused(A_ref, jnp.concatenate([x, h], axis=0),
                           n_adjs=n_adjs, K=K)
    gates = jax.nn.sigmoid(
        jnp.dot(Wg_ref[...], zg, preferred_element_type=jnp.float32)
        + bg_ref[...])
    r = gates[:H, :]                                        # sublane slice
    u = gates[H:, :]

    # Candidate: diffuse [x; r*h], one fused MXU dot.
    zc = _cheb_terms_fused(A_ref, jnp.concatenate([x, r * h], axis=0),
                           n_adjs=n_adjs, K=K)
    c = jnp.tanh(jnp.dot(Wc_ref[...], zc, preferred_element_type=jnp.float32)
                 + bc_ref[...])

    # GRU blend stays f32 (v5e VPU/EUP have no bf16 path).
    return u * h + (1.0 - u) * c


# ----------------------------------------------------------------------------
# Pallas kernels: whole encoder / whole decoder, grid over time.
# ----------------------------------------------------------------------------
def _encoder_kernel(*refs, n_layers, n_adjs, K, H):
    """grid=(P,).  refs = (x_t, A, [Wg, bg, Wc, bc]*n_layers, hs_out)."""
    x_ref, A_ref = refs[0], refs[1]
    layer_refs = [refs[2 + 4 * l: 2 + 4 * (l + 1)] for l in range(n_layers)]
    # Constant-index output block: stays VMEM-resident across all timesteps and
    # doubles as the hidden-state carry; written back to HBM once at the end.
    hs_ref = refs[2 + 4 * n_layers]                         # (n_layers, H, BN)

    @pl.when(pl.program_id(0) == 0)
    def _init():
        hs_ref[...] = jnp.zeros(hs_ref.shape, hs_ref.dtype)

    inp = x_ref[...]                                        # (C0, BN) f32
    for l, (Wg, bg, Wc, bc) in enumerate(layer_refs):
        h_new = _dcgru_cell(inp, hs_ref[l], A_ref, Wg, bg, Wc, bc,
                            n_adjs=n_adjs, K=K, H=H)
        hs_ref[l] = h_new
        inp = h_new                                         # feed next layer


def _decoder_kernel(*refs, n_layers, n_adjs, K, H):
    """grid=(Q,).  refs = (hs, A, [Wg,bg,Wc,bc]*n_layers, Wo, bo, y, h_scr, x_scr)."""
    hs_ref, A_ref = refs[0], refs[1]
    layer_refs = [refs[2 + 4 * l: 2 + 4 * (l + 1)] for l in range(n_layers)]
    base = 2 + 4 * n_layers
    Wo_ref, bo_ref = refs[base], refs[base + 1]
    y_ref = refs[base + 2]                                  # (out_dim, BN) lane-dense
    h_scr = refs[base + 3]                                  # (n_layers, H, BN) f32
    x_scr = refs[base + 4]                                  # (in_dim, BN) f32

    @pl.when(pl.program_id(0) == 0)
    def _init():
        h_scr[...] = hs_ref[...]                            # encoder final states
        x_scr[...] = jnp.zeros(x_scr.shape, x_scr.dtype)    # GO symbol = zeros

    inp = x_scr[...]                                        # (in_dim, BN)
    for l, (Wg, bg, Wc, bc) in enumerate(layer_refs):
        h_new = _dcgru_cell(inp, h_scr[l], A_ref, Wg, bg, Wc, bc,
                            n_adjs=n_adjs, K=K, H=H)
        h_scr[l] = h_new
        inp = h_new

    # Output projection already in the transposed layout -> lane-dense row.
    y = (jnp.dot(Wo_ref[...], inp.astype(jnp.bfloat16),
                 preferred_element_type=jnp.float32) + bo_ref[...])
    # TODO(synk): teacher forcing (`random.random() < ratio`, host-side RNG) is
    # not modeled; eval semantics (ratio == 0 -> feed back prediction) used.
    x_scr[...] = y
    y_ref[...] = y


# ----------------------------------------------------------------------------
# Wrappers (layout prep + pallas_call plumbing).
# ----------------------------------------------------------------------------
def _const2(t):
    return (0, 0)


def _const3(t):
    return (0, 0, 0)


def _layer_specs(params):
    """Resident (constant index map) specs/args for per-layer DCGRU weights."""
    # TODO(synk): resident operands could use pipeline_mode=pl.Buffered(1) to
    # halve their VMEM footprint (matters on v7x's 64 MiB at production sizes).
    specs, args = [], []
    for (Wg, bg, Wc, bc) in params:
        args += [Wg, bg, Wc, bc]
        specs += [pl.BlockSpec(Wg.shape, _const2),
                  pl.BlockSpec(bg.shape, _const2),
                  pl.BlockSpec(Wc.shape, _const2),
                  pl.BlockSpec(bc.shape, _const2)]
    return specs, args


def encoder_forward(x, A_blkT, enc_params, *, n_adjs, K, h_dim):
    """x: (B, P, N, C) f32 -> hs: (n_layers, H, B*N) f32 (transposed layout)."""
    B, P, N, C = x.shape
    BN = B * N
    n_layers = len(enc_params)
    # Time-major, features on sublanes, (batch*node) on lanes.
    x_seq = jnp.transpose(x, (1, 3, 0, 2)).reshape(P, C, BN)

    layer_specs, layer_args = _layer_specs(enc_params)
    in_specs = ([pl.BlockSpec((None, C, BN), lambda t: (t, 0, 0)),   # x_t
                 pl.BlockSpec(A_blkT.shape, _const3)]                # A resident
                + layer_specs)

    kernel = functools.partial(_encoder_kernel, n_layers=n_layers,
                               n_adjs=n_adjs, K=K, H=h_dim)
    hs = pl.pallas_call(
        kernel,
        out_shape=jax.ShapeDtypeStruct((n_layers, h_dim, BN), jnp.float32),
        grid=(P,),
        in_specs=in_specs,
        out_specs=pl.BlockSpec((n_layers, h_dim, BN), _const3),
        # Time recurrence is serial.  TODO(synk): for v7x add a leading
        # 'parallel' grid axis over batch blocks (2 TensorCores + VMEM tiling).
        compiler_params=pltpu.CompilerParams(dimension_semantics=("arbitrary",)),
    )(x_seq, A_blkT, *layer_args)
    return hs


def decoder_forward(hs, A_blkT, dec_params, out_proj, out_len, B, N, ycl=None, *,
                    n_adjs, K):
    """hs: (n_layers, H, B*N) -> output (B, Q, N).  One pallas_call."""
    Wo, bo = out_proj                                 # (out_dim, H) bf16, (out_dim, 1) f32
    n_layers, H, BN = hs.shape
    out_dim = Wo.shape[0]
    in_dim = out_dim                                  # prediction is fed back

    layer_specs, layer_args = _layer_specs(dec_params)
    in_specs = ([pl.BlockSpec(hs.shape, _const3),     # encoder states resident
                 pl.BlockSpec(A_blkT.shape, _const3)]
                + layer_specs
                + [pl.BlockSpec(Wo.shape, _const2),
                   pl.BlockSpec(bo.shape, _const2)])

    kernel = functools.partial(_decoder_kernel, n_layers=n_layers,
                               n_adjs=n_adjs, K=K, H=H)
    y = pl.pallas_call(
        kernel,
        out_shape=jax.ShapeDtypeStruct((out_len, out_dim, BN), jnp.float32),
        grid=(out_len,),
        in_specs=in_specs,
        out_specs=pl.BlockSpec((None, out_dim, BN), lambda q: (q, 0, 0)),
        scratch_shapes=[pltpu.VMEM((n_layers, H, BN), jnp.float32),
                        pltpu.VMEM((in_dim, BN), jnp.float32)],
        compiler_params=pltpu.CompilerParams(dimension_semantics=("arbitrary",)),
    )(hs, A_blkT, *layer_args, Wo, bo)

    # (Q, 1, B*N) -> (B, Q, N)   (out_dim == 1, as in the reference output).
    return jnp.transpose(y.reshape(out_len, B, N), (1, 0, 2))


def make_block_diag_supports_T(A, B):
    """(n_adjs, N, N) dense supports -> transposed block-diag (n_adjs, B*N, B*N) bf16.

    In the transposed layout the graph product (A v)^T is v^T @ blockdiag(A)^T,
    so the kernel is handed kron(I_B, A^T) directly.
    TODO(synk): for production B*N, switch to node-major (N,N)x(N,B*F)
    diffusion instead of materializing the (B*N)^2 block-diagonal support.
    """
    n_adjs, N, _ = A.shape
    eyeB = jnp.eye(B, dtype=A.dtype)
    blk = jnp.stack([jnp.kron(eyeB, A[a].T) for a in range(n_adjs)], axis=0)
    return blk.astype(jnp.bfloat16)


def dcrnn_forward(params, x, A, ycl=None, *, st_params, out_len):
    n_adjs = st_params["n_adjs"]
    K = st_params["max_diffusion_step"]
    h_dim = st_params["h_dim"]
    assert st_params["dec_in_dim"] == st_params["out_dim"], \
        "decoder feeds its own prediction back as the next input"
    assert st_params["out_dim"] == 1, "reference output shape (B, Q, N) needs out_dim == 1"
    B, _, N, _ = x.shape
    A_blkT = make_block_diag_supports_T(A, B)
    hs = encoder_forward(x, A_blkT, params["encoder"],
                         n_adjs=n_adjs, K=K, h_dim=h_dim)
    output = decoder_forward(hs, A_blkT, params["decoder"], params["out_proj"],
                             out_len, B, N, ycl=ycl, n_adjs=n_adjs, K=K)
    return output, None, None


# ----------------------------------------------------------------------------
# Parameters / supports.
# ----------------------------------------------------------------------------
def _init_dcgru_params(key, in_dim, h_dim, n_adjs, K):
    num_mat = n_adjs * K + 1
    kc = num_mat * (in_dim + h_dim)              # fused contraction length
    kg, kcan = jax.random.split(key)
    scale = 0.1
    # Gates (r,u) fused on the output dim; Chebyshev terms fused on the
    # contraction dim -> one MXU dot per source per step.  Transposed layout:
    # weights are (out_features, in_features).
    Wg = (scale * jax.random.normal(kg, (2 * h_dim, kc), jnp.float32)
          ).astype(jnp.bfloat16)
    Wc = (scale * jax.random.normal(kcan, (h_dim, kc), jnp.float32)
          ).astype(jnp.bfloat16)
    bg = jnp.ones((2 * h_dim, 1), jnp.float32)   # DCRNN-style gate bias init 1.0
    bc = jnp.zeros((h_dim, 1), jnp.float32)      # candidate bias init 0.0
    return (Wg, bg, Wc, bc)


def init_params(key, st_params, out_len):
    n_layers = st_params["n_layers"]
    h_dim = st_params["h_dim"]
    n_adjs = st_params["n_adjs"]
    K = st_params["max_diffusion_step"]
    keys = jax.random.split(key, 2 * n_layers + 1)
    enc, dec = [], []
    for layer in range(n_layers):
        in_dim = st_params["enc_in_dim"] if layer == 0 else h_dim
        enc.append(_init_dcgru_params(keys[layer], in_dim, h_dim, n_adjs, K))
    for layer in range(n_layers):
        in_dim = st_params["dec_in_dim"] if layer == 0 else h_dim
        dec.append(_init_dcgru_params(keys[n_layers + layer], in_dim, h_dim,
                                      n_adjs, K))
    ko, _ = jax.random.split(keys[-1])
    Wo = (0.1 * jax.random.normal(ko, (st_params["out_dim"], h_dim), jnp.float32)
          ).astype(jnp.bfloat16)
    bo = jnp.zeros((st_params["out_dim"], 1), jnp.float32)
    return {"encoder": enc, "decoder": dec, "out_proj": (Wo, bo)}


def make_supports(key, n_adjs, N):
    # Dense row-stochastic random-walk supports.
    # TODO(synk): reference passes sparse edge indices (2, |E|); dense equivalent used.
    mats = []
    for k in jax.random.split(key, n_adjs):
        W = jnp.abs(jax.random.normal(k, (N, N), jnp.float32)) + 1e-3
        mats.append(W / jnp.sum(W, axis=1, keepdims=True))
    return jnp.stack(mats, axis=0)


# ----------------------------------------------------------------------------
if __name__ == "__main__":
    key = jax.random.PRNGKey(0)
    k_param, k_adj, k_x, k_y = jax.random.split(key, 4)

    B, P, Q, N = 2, 8, 4, 16
    st_params = {
        "n_layers": 2,
        "enc_in_dim": 2,
        "dec_in_dim": 1,
        "h_dim": 32,
        "out_dim": 1,
        "n_adjs": 2,
        "max_diffusion_step": 2,
        "use_curriculum_learning": False,
        "cl_decay_steps": 2000,
    }

    params = init_params(k_param, st_params, Q)
    A = make_supports(k_adj, st_params["n_adjs"], N)                  # (2, 16, 16)
    x = jax.random.normal(k_x, (B, P, N, st_params["enc_in_dim"]), jnp.float32)
    ycl = jax.random.normal(k_y, (B, Q, N, st_params["dec_in_dim"]), jnp.float32)

    fwd = jax.jit(functools.partial(dcrnn_forward, st_params=st_params, out_len=Q))
    output, _, _ = fwd(params, x, A, ycl)
    output = jax.block_until_ready(output)

    assert output.shape == (B, Q, N), output.shape
    assert bool(jnp.all(jnp.isfinite(output)))
    print("KERNEL_OK")
</pallas_src>

<mosaic_0001>
module attributes {stable_mosaic.version = 11 : i64} {
  func.func @_encoder_kernel(%arg0: i32, %arg1: memref<1x2x32xf32, #tpu.memory_space<vmem>>, %arg2: memref<2x32x32xbf16, #tpu.memory_space<vmem>>, %arg3: memref<64x170xbf16, #tpu.memory_space<vmem>>, %arg4: memref<64x1xf32, #tpu.memory_space<vmem>>, %arg5: memref<32x170xbf16, #tpu.memory_space<vmem>>, %arg6: memref<32x1xf32, #tpu.memory_space<vmem>>, %arg7: memref<64x320xbf16, #tpu.memory_space<vmem>>, %arg8: memref<64x1xf32, #tpu.memory_space<vmem>>, %arg9: memref<32x320xbf16, #tpu.memory_space<vmem>>, %arg10: memref<32x1xf32, #tpu.memory_space<vmem>>, %arg11: memref<2x32x32xf32, #tpu.memory_space<vmem>>) attributes {dimension_semantics = [#tpu.dimension_semantics<arbitrary>], iteration_bounds = array<i64: 8>, scalar_prefetch = 0 : i64, scratch_operands = 0 : i64, tpu.core_type = #tpu.core_type<tc>, window_params = [{transform_indices = @transform_0, window_bounds = array<i64: 1, 2, 32>}, {pipeline_mode = #tpu.pipeline_mode<synchronous>, transform_indices = @transform_1, window_bounds = array<i64: 2, 32, 32>}, {pipeline_mode = #tpu.pipeline_mode<synchronous>, transform_indices = @transform_2, window_bounds = array<i64: 64, 170>}, {pipeline_mode = #tpu.pipeline_mode<synchronous>, transform_indices = @transform_3, window_bounds = array<i64: 64, 1>}, {pipeline_mode = #tpu.pipeline_mode<synchronous>, transform_indices = @transform_4, window_bounds = array<i64: 32, 170>}, {pipeline_mode = #tpu.pipeline_mode<synchronous>, transform_indices = @transform_5, window_bounds = array<i64: 32, 1>}, {pipeline_mode = #tpu.pipeline_mode<synchronous>, transform_indices = @transform_6, window_bounds = array<i64: 64, 320>}, {pipeline_mode = #tpu.pipeline_mode<synchronous>, transform_indices = @transform_7, window_bounds = array<i64: 64, 1>}, {pipeline_mode = #tpu.pipeline_mode<synchronous>, transform_indices = @transform_8, window_bounds = array<i64: 32, 320>}, {pipeline_mode = #tpu.pipeline_mode<synchronous>, transform_indices = @transform_9, window_bounds = array<i64: 32, 1>}, {pipeline_mode = #tpu.pipeline_mode<synchronous>, transform_indices = @transform_10, window_bounds = array<i64: 2, 32, 32>}]} {
    %c0_i32 = arith.constant 0 : i32
    %0 = arith.cmpi eq, %arg0, %c0_i32 : i32
    %1 = arith.extui %0 : i1 to i32
    %c0_i32_0 = arith.constant 0 : i32
    %2 = arith.cmpi ne, %1, %c0_i32_0 : i32
    scf.if %2 {
      %cst_85 = arith.constant 0.000000e+00 : f32
      %147 = vector.broadcast %cst_85 : f32 to vector<2x32x32xf32>
      %c0_86 = arith.constant 0 : index
      %c0_87 = arith.constant 0 : index
      %c0_88 = arith.constant 0 : index
      %148 = vector.load %arg11[%c0_86, %c0_87, %c0_88] : memref<2x32x32xf32, #tpu.memory_space<vmem>>, vector<2x32x32xf32>
      tpu.vector_store %arg11[%c0_86, %c0_87, %c0_88], %147 {strides = array<i32>} : memref<2x32x32xf32, #tpu.memory_space<vmem>>, vector<2x32x32xf32>,
    } else {
    }
    %c0 = arith.constant 0 : index
    %c0_1 = arith.constant 0 : index
    %c0_2 = arith.constant 0 : index
    %3 = vector.load %arg1[%c0, %c0_1, %c0_2] : memref<1x2x32xf32, #tpu.memory_space<vmem>>, vector<1x2x32xf32>
    %4 = vector.shape_cast %3 : vector<1x2x32xf32> to vector<2x32xf32>
    %c0_3 = arith.constant 0 : index
    %c0_4 = arith.constant 0 : index
    %c0_5 = arith.constant 0 : index
    %5 = vector.load %arg11[%c0_3, %c0_4, %c0_5] : memref<2x32x32xf32, #tpu.memory_space<vmem>>, vector<1x32x32xf32>
    %6 = vector.shape_cast %5 : vector<1x32x32xf32> to vector<32x32xf32>
    %7 = tpu.concatenate %4, %6 in 0 : vector<2x32xf32>, vector<32x32xf32> -> vector<34x32xf32>
    %c0_6 = arith.constant 0 : index
    %c0_7 = arith.constant 0 : index
    %c0_8 = arith.constant 0 : index
    %8 = vector.load %arg2[%c0_6, %c0_7, %c0_8] : memref<2x32x32xbf16, #tpu.memory_space<vmem>>, vector<1x32x32xbf16>
    %9 = vector.shape_cast %8 : vector<1x32x32xbf16> to vector<32x32xbf16>
    %10 = arith.truncf %7 : vector<34x32xf32> to vector<34x32xbf16>
    %cst = arith.constant dense<0.000000e+00> : vector<34x32xf32>
    %11 = tpu.matmul %10, %9, %cst {dimension_numbers = #tpu.dot_dimension_numbers<[1], [0], [0], [1], [0, 0, 1, 1], [], []>} : vector<34x32xbf16>, vector<32x32xbf16>, vector<34x32xf32> -> vector<34x32xf32>
    %12 = arith.truncf %11 : vector<34x32xf32> to vector<34x32xbf16>
    %cst_9 = arith.constant dense<0.000000e+00> : vector<34x32xf32>
    %13 = tpu.matmul %12, %9, %cst_9 {dimension_numbers = #tpu.dot_dimension_numbers<[1], [0], [0], [1], [0, 0, 1, 1], [], []>} : vector<34x32xbf16>, vector<32x32xbf16>, vector<34x32xf32> -> vector<34x32xf32>
    %cst_10 = arith.constant 2.000000e+00 : f32
    %14 = vector.broadcast %cst_10 : f32 to vector<34x32xf32>
    %15 = arith.mulf %14, %13 : vector<34x32xf32>
    %16 = arith.subf %15, %7 : vector<34x32xf32>
    %c1 = arith.constant 1 : index
    %c0_11 = arith.constant 0 : index
    %c0_12 = arith.constant 0 : index
    %17 = vector.load %arg2[%c1, %c0_11, %c0_12] : memref<2x32x32xbf16, #tpu.memory_space<vmem>>, vector<1x32x32xbf16>
    %18 = vector.shape_cast %17 : vector<1x32x32xbf16> to vector<32x32xbf16>
    %19 = arith.truncf %7 : vector<34x32xf32> to vector<34x32xbf16>
    %cst_13 = arith.constant dense<0.000000e+00> : vector<34x32xf32>
    %20 = tpu.matmul %19, %18, %cst_13 {dimension_numbers = #tpu.dot_dimension_numbers<[1], [0], [0], [1], [0, 0, 1, 1], [], []>} : vector<34x32xbf16>, vector<32x32xbf16>, vector<34x32xf32> -> vector<34x32xf32>
    %21 = arith.truncf %20 : vector<34x32xf32> to vector<34x32xbf16>
    %cst_14 = arith.constant dense<0.000000e+00> : vector<34x32xf32>
    %22 = tpu.matmul %21, %18, %cst_14 {dimension_numbers = #tpu.dot_dimension_numbers<[1], [0], [0], [1], [0, 0, 1, 1], [], []>} : vector<34x32xbf16>, vector<32x32xbf16>, vector<34x32xf32> -> vector<34x32xf32>
    %cst_15 = arith.constant 2.000000e+00 : f32
    %23 = vector.broadcast %cst_15 : f32 to vector<34x32xf32>
    %24 = arith.mulf %23, %22 : vector<34x32xf32>
    %25 = arith.subf %24, %7 : vector<34x32xf32>
    %26 = tpu.concatenate %7, %11, %16, %20, %25 in 0 : vector<34x32xf32>, vector<34x32xf32>, vector<34x32xf32>, vector<34x32xf32>, vector<34x32xf32> -> vector<170x32xf32>
    %27 = arith.truncf %26 : vector<170x32xf32> to vector<170x32xbf16>
    %c0_16 = arith.constant 0 : index
    %c0_17 = arith.constant 0 : index
    %28 = vector.load %arg3[%c0_16, %c0_17] : memref<64x170xbf16, #tpu.memory_space<vmem>>, vector<64x170xbf16>
    %cst_18 = arith.constant dense<0.000000e+00> : vector<64x32xf32>
    %29 = tpu.matmul %28, %27, %cst_18 {dimension_numbers = #tpu.dot_dimension_numbers<[1], [0], [0], [1], [0, 0, 1, 1], [], []>} : vector<64x170xbf16>, vector<170x32xbf16>, vector<64x32xf32> -> vector<64x32xf32>
    %c0_19 = arith.constant 0 : index
    %c0_20 = arith.constant 0 : index
    %30 = vector.load %arg4[%c0_19, %c0_20] : memref<64x1xf32, #tpu.memory_space<vmem>>, vector<64x1xf32>
    %31 = vector.broadcast %30 : vector<64x1xf32> to vector<64x32xf32>
    %32 = arith.addf %29, %31 : vector<64x32xf32>
    %33 = arith.negf %32 : vector<64x32xf32>
    %34 = math.exp %33 : vector<64x32xf32>
    %cst_21 = arith.constant 1.000000e+00 : f32
    %35 = vector.broadcast %cst_21 : f32 to vector<64x32xf32>
    %36 = arith.addf %35, %34 : vector<64x32xf32>
    %37 = arith.divf %35, %36 : vector<64x32xf32>
    %38 = vector.extract_strided_slice %37 {offsets = [0, 0], sizes = [32, 32], strides = [1, 1]} : vector<64x32xf32> to vector<32x32xf32>
    %39 = vector.extract_strided_slice %37 {offsets = [32, 0], sizes = [32, 32], strides = [1, 1]} : vector<64x32xf32> to vector<32x32xf32>
    %40 = arith.mulf %38, %6 : vector<32x32xf32>
    %41 = tpu.concatenate %4, %40 in 0 : vector<2x32xf32>, vector<32x32xf32> -> vector<34x32xf32>
    %c0_22 = arith.constant 0 : index
    %c0_23 = arith.constant 0 : index
    %c0_24 = arith.constant 0 : index
    %42 = vector.load %arg2[%c0_22, %c0_23, %c0_24] : memref<2x32x32xbf16, #tpu.memory_space<vmem>>, vector<1x32x32xbf16>
    %43 = vector.shape_cast %42 : vector<1x32x32xbf16> to vector<32x32xbf16>
    %44 = arith.truncf %41 : vector<34x32xf32> to vector<34x32xbf16>
    %cst_25 = arith.constant dense<0.000000e+00> : vector<34x32xf32>
    %45 = tpu.matmul %44, %43, %cst_25 {dimension_numbers = #tpu.dot_dimension_numbers<[1], [0], [0], [1], [0, 0, 1, 1], [], []>} : vector<34x32xbf16>, vector<32x32xbf16>, vector<34x32xf32> -> vector<34x32xf32>
    %46 = arith.truncf %45 : vector<34x32xf32> to vector<34x32xbf16>
    %cst_26 = arith.constant dense<0.000000e+00> : vector<34x32xf32>
    %47 = tpu.matmul %46, %43, %cst_26 {dimension_numbers = #tpu.dot_dimension_numbers<[1], [0], [0], [1], [0, 0, 1, 1], [], []>} : vector<34x32xbf16>, vector<32x32xbf16>, vector<34x32xf32> -> vector<34x32xf32>
    %cst_27 = arith.constant 2.000000e+00 : f32
    %48 = vector.broadcast %cst_27 : f32 to vector<34x32xf32>
    %49 = arith.mulf %48, %47 : vector<34x32xf32>
    %50 = arith.subf %49, %41 : vector<34x32xf32>
    %c1_28 = arith.constant 1 : index
    %c0_29 = arith.constant 0 : index
    %c0_30 = arith.constant 0 : index
    %51 = vector.load %arg2[%c1_28, %c0_29, %c0_30] : memref<2x32x32xbf16, #tpu.memory_space<vmem>>, vector<1x32x32xbf16>
    %52 = vector.shape_cast %51 : vector<1x32x32xbf16> to vector<32x32xbf16>
    %53 = arith.truncf %41 : vector<34x32xf32> to vector<34x32xbf16>
    %cst_31 = arith.constant dense<0.000000e+00> : vector<34x32xf32>
    %54 = tpu.matmul %53, %52, %cst_31 {dimension_numbers = #tpu.dot_dimension_numbers<[1], [0], [0], [1], [0, 0, 1, 1], [], []>} : vector<34x32xbf16>, vector<32x32xbf16>, vector<34x32xf32> -> vector<34x32xf32>
    %55 = arith.truncf %54 : vector<34x32xf32> to vector<34x32xbf16>
    %cst_32 = arith.constant dense<0.000000e+00> : vector<34x32xf32>
    %56 = tpu.matmul %55, %52, %cst_32 {dimension_numbers = #tpu.dot_dimension_numbers<[1], [0], [0], [1], [0, 0, 1, 1], [], []>} : vector<34x32xbf16>, vector<32x32xbf16>, vector<34x32xf32> -> vector<34x32xf32>
    %cst_33 = arith.constant 2.000000e+00 : f32
    %57 = vector.broadcast %cst_33 : f32 to vector<34x32xf32>
    %58 = arith.mulf %57, %56 : vector<34x32xf32>
    %59 = arith.subf %58, %41 : vector<34x32xf32>
    %60 = tpu.concatenate %41, %45, %50, %54, %59 in 0 : vector<34x32xf32>, vector<34x32xf32>, vector<34x32xf32>, vector<34x32xf32>, vector<34x32xf32> -> vector<170x32xf32>
    %61 = arith.truncf %60 : vector<170x32xf32> to vector<170x32xbf16>
    %c0_34 = arith.constant 0 : index
    %c0_35 = arith.constant 0 : index
    %62 = vector.load %arg5[%c0_34, %c0_35] : memref<32x170xbf16, #tpu.memory_space<vmem>>, vector<32x170xbf16>
    %cst_36 = arith.constant dense<0.000000e+00> : vector<32x32xf32>
    %63 = tpu.matmul %62, %61, %cst_36 {dimension_numbers = #tpu.dot_dimension_numbers<[1], [0], [0], [1], [0, 0, 1, 1], [], []>} : vector<32x170xbf16>, vector<170x32xbf16>, vector<32x32xf32> -> vector<32x32xf32>
    %c0_37 = arith.constant 0 : index
    %c0_38 = arith.constant 0 : index
    %64 = vector.load %arg6[%c0_37, %c0_38] : memref<32x1xf32, #tpu.memory_space<vmem>>, vector<32x1xf32>
    %65 = vector.broadcast %64 : vector<32x1xf32> to vector<32x32xf32>
    %66 = arith.addf %63, %65 : vector<32x32xf32>
    %67 = math.tanh %66 : vector<32x32xf32>
    %68 = arith.mulf %39, %6 : vector<32x32xf32>
    %cst_39 = arith.constant 1.000000e+00 : f32
    %69 = vector.broadcast %cst_39 : f32 to vector<32x32xf32>
    %70 = arith.subf %69, %39 : vector<32x32xf32>
    %71 = arith.mulf %70, %67 : vector<32x32xf32>
    %72 = arith.addf %68, %71 : vector<32x32xf32>
    %c0_40 = arith.constant 0 : index
    %c0_41 = arith.constant 0 : index
    %c0_42 = arith.constant 0 : index
    %73 = vector.load %arg11[%c0_40, %c0_41, %c0_42] : memref<2x32x32xf32, #tpu.memory_space<vmem>>, vector<1x32x32xf32>
    %74 = vector.shape_cast %73 : vector<1x32x32xf32> to vector<32x32xf32>
    %75 = vector.shape_cast %72 : vector<32x32xf32> to vector<1x32x32xf32>
    tpu.vector_store %arg11[%c0_40, %c0_41, %c0_42], %75 {strides = array<i32>} : memref<2x32x32xf32, #tpu.memory_space<vmem>>, vector<1x32x32xf32>,
    %c1_43 = arith.constant 1 : index
    %c0_44 = arith.constant 0 : index
    %c0_45 = arith.constant 0 : index
    %76 = vector.load %arg11[%c1_43, %c0_44, %c0_45] : memref<2x32x32xf32, #tpu.memory_space<vmem>>, vector<1x32x32xf32>
    %77 = vector.shape_cast %76 : vector<1x32x32xf32> to vector<32x32xf32>
    %78 = tpu.concatenate %72, %77 in 0 : vector<32x32xf32>, vector<32x32xf32> -> vector<64x32xf32>
    %c0_46 = arith.constant 0 : index
    %c0_47 = arith.constant 0 : index
    %c0_48 = arith.constant 0 : index
    %79 = vector.load %arg2[%c0_46, %c0_47, %c0_48] : memref<2x32x32xbf16, #tpu.memory_space<vmem>>, vector<1x32x32xbf16>
    %80 = vector.shape_cast %79 : vector<1x32x32xbf16> to vector<32x32xbf16>
    %81 = arith.truncf %78 : vector<64x32xf32> to vector<64x32xbf16>
    %cst_49 = arith.constant dense<0.000000e+00> : vector<64x32xf32>
    %82 = tpu.matmul %81, %80, %cst_49 {dimension_numbers = #tpu.dot_dimension_numbers<[1], [0], [0], [1], [0, 0, 1, 1], [], []>} : vector<64x32xbf16>, vector<32x32xbf16>, vector<64x32xf32> -> vector<64x32xf32>
    %83 = arith.truncf %82 : vector<64x32xf32> to vector<64x32xbf16>
    %cst_50 = arith.constant dense<0.000000e+00> : vector<64x32xf32>
    %84 = tpu.matmul %83, %80, %cst_50 {dimension_numbers = #tpu.dot_dimension_numbers<[1], [0], [0], [1], [0, 0, 1, 1], [], []>} : vector<64x32xbf16>, vector<32x32xbf16>, vector<64x32xf32> -> vector<64x32xf32>
    %cst_51 = arith.constant 2.000000e+00 : f32
    %85 = vector.broadcast %cst_51 : f32 to vector<64x32xf32>
    %86 = arith.mulf %85, %84 : vector<64x32xf32>
    %87 = arith.subf %86, %78 : vector<64x32xf32>
    %c1_52 = arith.constant 1 : index
    %c0_53 = arith.constant 0 : index
    %c0_54 = arith.constant 0 : index
    %88 = vector.load %arg2[%c1_52, %c0_53, %c0_54] : memref<2x32x32xbf16, #tpu.memory_space<vmem>>, vector<1x32x32xbf16>
    %89 = vector.shape_cast %88 : vector<1x32x32xbf16> to vector<32x32xbf16>
    %90 = arith.truncf %78 : vector<64x32xf32> to vector<64x32xbf16>
    %cst_55 = arith.constant dense<0.000000e+00> : vector<64x32xf32>
    %91 = tpu.matmul %90, %89, %cst_55 {dimension_numbers = #tpu.dot_dimension_numbers<[1], [0], [0], [1], [0, 0, 1, 1], [], []>} : vector<64x32xbf16>, vector<32x32xbf16>, vector<64x32xf32> -> vector<64x32xf32>
    %92 = arith.truncf %91 : vector<64x32xf32> to vector<64x32xbf16>
    %cst_56 = arith.constant dense<0.000000e+00> : vector<64x32xf32>
    %93 = tpu.matmul %92, %89, %cst_56 {dimension_numbers = #tpu.dot_dimension_numbers<[1], [0], [0], [1], [0, 0, 1, 1], [], []>} : vector<64x32xbf16>, vector<32x32xbf16>, vector<64x32xf32> -> vector<64x32xf32>
    %cst_57 = arith.constant 2.000000e+00 : f32
    %94 = vector.broadcast %cst_57 : f32 to vector<64x32xf32>
    %95 = arith.mulf %94, %93 : vector<64x32xf32>
    %96 = arith.subf %95, %78 : vector<64x32xf32>
    %97 = tpu.concatenate %78, %82, %87, %91, %96 in 0 : vector<64x32xf32>, vector<64x32xf32>, vector<64x32xf32>, vector<64x32xf32>, vector<64x32xf32> -> vector<320x32xf32>
    %98 = arith.truncf %97 : vector<320x32xf32> to vector<320x32xbf16>
    %c0_58 = arith.constant 0 : index
    %c0_59 = arith.constant 0 : index
    %99 = vector.load %arg7[%c0_58, %c0_59] : memref<64x320xbf16, #tpu.memory_space<vmem>>, vector<64x320xbf16>
    %cst_60 = arith.constant dense<0.000000e+00> : vector<64x32xf32>
    %100 = tpu.matmul %99, %98, %cst_60 {dimension_numbers = #tpu.dot_dimension_numbers<[1], [0], [0], [1], [0, 0, 1, 1], [], []>} : vector<64x320xbf16>, vector<320x32xbf16>, vector<64x32xf32> -> vector<64x32xf32>
    %c0_61 = arith.constant 0 : index
    %c0_62 = arith.constant 0 : index
    %101 = vector.load %arg8[%c0_61, %c0_62] : memref<64x1xf32, #tpu.memory_space<vmem>>, vector<64x1xf32>
    %102 = vector.broadcast %101 : vector<64x1xf32> to vector<64x32xf32>
    %103 = arith.addf %100, %102 : vector<64x32xf32>
    %104 = arith.negf %103 : vector<64x32xf32>
    %105 = math.exp %104 : vector<64x32xf32>
    %cst_63 = arith.constant 1.000000e+00 : f32
    %106 = vector.broadcast %cst_63 : f32 to vector<64x32xf32>
    %107 = arith.addf %106, %105 : vector<64x32xf32>
    %108 = arith.divf %106, %107 : vector<64x32xf32>
    %109 = vector.extract_strided_slice %108 {offsets = [0, 0], sizes = [32, 32], strides = [1, 1]} : vector<64x32xf32> to vector<32x32xf32>
    %110 = vector.extract_strided_slice %108 {offsets = [32, 0], sizes = [32, 32], strides = [1, 1]} : vector<64x32xf32> to vector<32x32xf32>
    %111 = arith.mulf %109, %77 : vector<32x32xf32>
    %112 = tpu.concatenate %72, %111 in 0 : vector<32x32xf32>, vector<32x32xf32> -> vector<64x32xf32>
    %c0_64 = arith.constant 0 : index
    %c0_65 = arith.constant 0 : index
    %c0_66 = arith.constant 0 : index
    %113 = vector.load %arg2[%c0_64, %c0_65, %c0_66] : memref<2x32x32xbf16, #tpu.memory_space<vmem>>, vector<1x32x32xbf16>
    %114 = vector.shape_cast %113 : vector<1x32x32xbf16> to vector<32x32xbf16>
    %115 = arith.truncf %112 : vector<64x32xf32> to vector<64x32xbf16>
    %cst_67 = arith.constant dense<0.000000e+00> : vector<64x32xf32>
    %116 = tpu.matmul %115, %114, %cst_67 {dimension_numbers = #tpu.dot_dimension_numbers<[1], [0], [0], [1], [0, 0, 1, 1], [], []>} : vector<64x32xbf16>, vector<32x32xbf16>, vector<64x32xf32> -> vector<64x32xf32>
    %117 = arith.truncf %116 : vector<64x32xf32> to vector<64x32xbf16>
    %cst_68 = arith.constant dense<0.000000e+00> : vector<64x32xf32>
    %118 = tpu.matmul %117, %114, %cst_68 {dimension_numbers = #tpu.dot_dimension_numbers<[1], [0], [0], [1], [0, 0, 1, 1], [], []>} : vector<64x32xbf16>, vector<32x32xbf16>, vector<64x32xf32> -> vector<64x32xf32>
    %cst_69 = arith.constant 2.000000e+00 : f32
    %119 = vector.broadcast %cst_69 : f32 to vector<64x32xf32>
    %120 = arith.mulf %119, %118 : vector<64x32xf32>
    %121 = arith.subf %120, %112 : vector<64x32xf32>
    %c1_70 = arith.constant 1 : index
    %c0_71 = arith.constant 0 : index
    %c0_72 = arith.constant 0 : index
    %122 = vector.load %arg2[%c1_70, %c0_71, %c0_72] : memref<2x32x32xbf16, #tpu.memory_space<vmem>>, vector<1x32x32xbf16>
    %123 = vector.shape_cast %122 : vector<1x32x32xbf16> to vector<32x32xbf16>
    %124 = arith.truncf %112 : vector<64x32xf32> to vector<64x32xbf16>
    %cst_73 = arith.constant dense<0.000000e+00> : vector<64x32xf32>
    %125 = tpu.matmul %124, %123, %cst_73 {dimension_numbers = #tpu.dot_dimension_numbers<[1], [0], [0], [1], [0, 0, 1, 1], [], []>} : vector<64x32xbf16>, vector<32x32xbf16>, vector<64x32xf32> -> vector<64x32xf32>
    %126 = arith.truncf %125 : vector<64x32xf32> to vector<64x32xbf16>
    %cst_74 = arith.constant dense<0.000000e+00> : vector<64x32xf32>
    %127 = tpu.matmul %126, %123, %cst_74 {dimension_numbers = #tpu.dot_dimension_numbers<[1], [0], [0], [1], [0, 0, 1, 1], [], []>} : vector<64x32xbf16>, vector<32x32xbf16>, vector<64x32xf32> -> vector<64x32xf32>
    %cst_75 = arith.constant 2.000000e+00 : f32
    %128 = vector.broadcast %cst_75 : f32 to vector<64x32xf32>
    %129 = arith.mulf %128, %127 : vector<64x32xf32>
    %130 = arith.subf %129, %112 : vector<64x32xf32>
    %131 = tpu.concatenate %112, %116, %121, %125, %130 in 0 : vector<64x32xf32>, vector<64x32xf32>, vector<64x32xf32>, vector<64x32xf32>, vector<64x32xf32> -> vector<320x32xf32>
    %132 = arith.truncf %131 : vector<320x32xf32> to vector<320x32xbf16>
    %c0_76 = arith.constant 0 : index
    %c0_77 = arith.constant 0 : index
    %133 = vector.load %arg9[%c0_76, %c0_77] : memref<32x320xbf16, #tpu.memory_space<vmem>>, vector<32x320xbf16>
    %cst_78 = arith.constant dense<0.000000e+00> : vector<32x32xf32>
    %134 = tpu.matmul %133, %132, %cst_78 {dimension_numbers = #tpu.dot_dimension_numbers<[1], [0], [0], [1], [0, 0, 1, 1], [], []>} : vector<32x320xbf16>, vector<320x32xbf16>, vector<32x32xf32> -> vector<32x32xf32>
    %c0_79 = arith.constant 0 : index
    %c0_80 = arith.constant 0 : index
    %135 = vector.load %arg10[%c0_79, %c0_80] : memref<32x1xf32, #tpu.memory_space<vmem>>, vector<32x1xf32>
    %136 = vector.broadcast %135 : vector<32x1xf32> to vector<32x32xf32>
    %137 = arith.addf %134, %136 : vector<32x32xf32>
    %138 = math.tanh %137 : vector<32x32xf32>
    %139 = arith.mulf %110, %77 : vector<32x32xf32>
    %cst_81 = arith.constant 1.000000e+00 : f32
    %140 = vector.broadcast %cst_81 : f32 to vector<32x32xf32>
    %141 = arith.subf %140, %110 : vector<32x32xf32>
    %142 = arith.mulf %141, %138 : vector<32x32xf32>
    %143 = arith.addf %139, %142 : vector<32x32xf32>
    %c1_82 = arith.constant 1 : index
    %c0_83 = arith.constant 0 : index
    %c0_84 = arith.constant 0 : index
    %144 = vector.load %arg11[%c1_82, %c0_83, %c0_84] : memref<2x32x32xf32, #tpu.memory_space<vmem>>, vector<1x32x32xf32>
    %145 = vector.shape_cast %144 : vector<1x32x32xf32> to vector<32x32xf32>
    %146 = vector.shape_cast %143 : vector<32x32xf32> to vector<1x32x32xf32>
    tpu.vector_store %arg11[%c1_82, %c0_83, %c0_84], %146 {strides = array<i32>} : memref<2x32x32xf32, #tpu.memory_space<vmem>>, vector<1x32x32xf32>,
    return
  }
  func.func @transform_0(%arg0: i32) -> (i32, i32, i32) {
    %c0_i32 = arith.constant 0 : i32
    %c0_i32_0 = arith.constant 0 : i32
    %c0_i32_1 = arith.constant 0 : i32
    return %arg0, %c0_i32, %c0_i32_0 : i32, i32, i32
  }
  func.func @transform_1(%arg0: i32) -> (i32, i32, i32) {
    %c0_i32 = arith.constant 0 : i32
    %c0_i32_0 = arith.constant 0 : i32
    %c0_i32_1 = arith.constant 0 : i32
    %c0_i32_2 = arith.constant 0 : i32
    return %c0_i32, %c0_i32_0, %c0_i32_1 : i32, i32, i32
  }
  func.func @transform_2(%arg0: i32) -> (i32, i32) {
    %c0_i32 = arith.constant 0 : i32
    %c0_i32_0 = arith.constant 0 : i32
    %c0_i32_1 = arith.constant 0 : i32
    return %c0_i32, %c0_i32_0 : i32, i32
  }
  func.func @transform_3(%arg0: i32) -> (i32, i32) {
    %c0_i32 = arith.constant 0 : i32
    %c0_i32_0 = arith.constant 0 : i32
    %c0_i32_1 = arith.constant 0 : i32
    return %c0_i32, %c0_i32_0 : i32, i32
  }
  func.func @transform_4(%arg0: i32) -> (i32, i32) {
    %c0_i32 = arith.constant 0 : i32
    %c0_i32_0 = arith.constant 0 : i32
    %c0_i32_1 = arith.constant 0 : i32
    return %c0_i32, %c0_i32_0 : i32, i32
  }
  func.func @transform_5(%arg0: i32) -> (i32, i32) {
    %c0_i32 = arith.constant 0 : i32
    %c0_i32_0 = arith.constant 0 : i32
    %c0_i32_1 = arith.constant 0 : i32
    return %c0_i32, %c0_i32_0 : i32, i32
  }
  func.func @transform_6(%arg0: i32) -> (i32, i32) {
    %c0_i32 = arith.constant 0 : i32
    %c0_i32_0 = arith.constant 0 : i32
    %c0_i32_1 = arith.constant 0 : i32
    return %c0_i32, %c0_i32_0 : i32, i32
  }
  func.func @transform_7(%arg0: i32) -> (i32, i32) {
    %c0_i32 = arith.constant 0 : i32
    %c0_i32_0 = arith.constant 0 : i32
    %c0_i32_1 = arith.constant 0 : i32
    return %c0_i32, %c0_i32_0 : i32, i32
  }
  func.func @transform_8(%arg0: i32) -> (i32, i32) {
    %c0_i32 = arith.constant 0 : i32
    %c0_i32_0 = arith.constant 0 : i32
    %c0_i32_1 = arith.constant 0 : i32
    return %c0_i32, %c0_i32_0 : i32, i32
  }
  func.func @transform_9(%arg0: i32) -> (i32, i32) {
    %c0_i32 = arith.constant 0 : i32
    %c0_i32_0 = arith.constant 0 : i32
    %c0_i32_1 = arith.constant 0 : i32
    return %c0_i32, %c0_i32_0 : i32, i32
  }
  func.func @transform_10(%arg0: i32) -> (i32, i32, i32) {
    %c0_i32 = arith.constant 0 : i32
    %c0_i32_0 = arith.constant 0 : i32
    %c0_i32_1 = arith.constant 0 : i32
    %c0_i32_2 = arith.constant 0 : i32
    return %c0_i32, %c0_i32_0, %c0_i32_1 : i32, i32, i32
  }
}

module attributes {stable_mosaic.version = 11 : i64} {
  func.func @_decoder_kernel(%arg0: i32, %arg1: memref<2x32x32xf32, #tpu.memory_space<vmem>>, %arg2: memref<2x32x32xbf16, #tpu.memory_space<vmem>>, %arg3: memref<64x165xbf16, #tpu.memory_space<vmem>>, %arg4: memref<64x1xf32, #tpu.memory_space<vmem>>, %arg5: memref<32x165xbf16, #tpu.memory_space<vmem>>, %arg6: memref<32x1xf32, #tpu.memory_space<vmem>>, %arg7: memref<64x320xbf16, #tpu.memory_space<vmem>>, %arg8: memref<64x1xf32, #tpu.memory_space<vmem>>, %arg9: memref<32x320xbf16, #tpu.memory_space<vmem>>, %arg10: memref<32x1xf32, #tpu.memory_space<vmem>>, %arg11: memref<1x32xbf16, #tpu.memory_space<vmem>>, %arg12: memref<1x1xf32, #tpu.memory_space<vmem>>, %arg13: memref<1x1x32xf32, #tpu.memory_space<vmem>>, %arg14: memref<2x32x32xf32, #tpu.memory_space<vmem>>, %arg15: memref<1x32xf32, #tpu.memory_space<vmem>>) attributes {dimension_semantics = [#tpu.dimension_semantics<arbitrary>], iteration_bounds = array<i64: 4>, scalar_prefetch = 0 : i64, scratch_operands = 2 : i64, tpu.core_type = #tpu.core_type<tc>, window_params = [{pipeline_mode = #tpu.pipeline_mode<synchronous>, transform_indices = @transform_0, window_bounds = array<i64: 2, 32, 32>}, {pipeline_mode = #tpu.pipeline_mode<synchronous>, transform_indices = @transform_1, window_bounds = array<i64: 2, 32, 32>}, {pipeline_mode = #tpu.pipeline_mode<synchronous>, transform_indices = @transform_2, window_bounds = array<i64: 64, 165>}, {pipeline_mode = #tpu.pipeline_mode<synchronous>, transform_indices = @transform_3, window_bounds = array<i64: 64, 1>}, {pipeline_mode = #tpu.pipeline_mode<synchronous>, transform_indices = @transform_4, window_bounds = array<i64: 32, 165>}, {pipeline_mode = #tpu.pipeline_mode<synchronous>, transform_indices = @transform_5, window_bounds = array<i64: 32, 1>}, {pipeline_mode = #tpu.pipeline_mode<synchronous>, transform_indices = @transform_6, window_bounds = array<i64: 64, 320>}, {pipeline_mode = #tpu.pipeline_mode<synchronous>, transform_indices = @transform_7, window_bounds = array<i64: 64, 1>}, {pipeline_mode = #tpu.pipeline_mode<synchronous>, transform_indices = @transform_8, window_bounds = array<i64: 32, 320>}, {pipeline_mode = #tpu.pipeline_mode<synchronous>, transform_indices = @transform_9, window_bounds = array<i64: 32, 1>}, {pipeline_mode = #tpu.pipeline_mode<synchronous>, transform_indices = @transform_10, window_bounds = array<i64: 1, 32>}, {pipeline_mode = #tpu.pipeline_mode<synchronous>, transform_indices = @transform_11, window_bounds = array<i64: 1, 1>}, {transform_indices = @transform_12, window_bounds = array<i64: 1, 1, 32>}]} {
    %c0_i32 = arith.constant 0 : i32
    %0 = arith.cmpi eq, %arg0, %c0_i32 : i32
    %1 = arith.extui %0 : i1 to i32
    %c0_i32_0 = arith.constant 0 : i32
    %2 = arith.cmpi ne, %1, %c0_i32_0 : i32
    scf.if %2 {
      %c0_94 = arith.constant 0 : index
      %c0_95 = arith.constant 0 : index
      %c0_96 = arith.constant 0 : index
      %156 = vector.load %arg1[%c0_94, %c0_95, %c0_96] : memref<2x32x32xf32, #tpu.memory_space<vmem>>, vector<2x32x32xf32>
      %c0_97 = arith.constant 0 : index
      %c0_98 = arith.constant 0 : index
      %c0_99 = arith.constant 0 : index
      %157 = vector.load %arg14[%c0_97, %c0_98, %c0_99] : memref<2x32x32xf32, #tpu.memory_space<vmem>>, vector<2x32x32xf32>
      tpu.vector_store %arg14[%c0_97, %c0_98, %c0_99], %156 {strides = array<i32>} : memref<2x32x32xf32, #tpu.memory_space<vmem>>, vector<2x32x32xf32>,
      %cst_100 = arith.constant 0.000000e+00 : f32
      %158 = vector.broadcast %cst_100 : f32 to vector<1x32xf32>
      %c0_101 = arith.constant 0 : index
      %c0_102 = arith.constant 0 : index
      %159 = vector.load %arg15[%c0_101, %c0_102] : memref<1x32xf32, #tpu.memory_space<vmem>>, vector<1x32xf32>
      tpu.vector_store %arg15[%c0_101, %c0_102], %158 {strides = array<i32>} : memref<1x32xf32, #tpu.memory_space<vmem>>, vector<1x32xf32>,
    } else {
    }
    %c0 = arith.constant 0 : index
    %c0_1 = arith.constant 0 : index
    %3 = vector.load %arg15[%c0, %c0_1] : memref<1x32xf32, #tpu.memory_space<vmem>>, vector<1x32xf32>
    %c0_2 = arith.constant 0 : index
    %c0_3 = arith.constant 0 : index
    %c0_4 = arith.constant 0 : index
    %4 = vector.load %arg14[%c0_2, %c0_3, %c0_4] : memref<2x32x32xf32, #tpu.memory_space<vmem>>, vector<1x32x32xf32>
    %5 = vector.shape_cast %4 : vector<1x32x32xf32> to vector<32x32xf32>
    %6 = tpu.concatenate %3, %5 in 0 : vector<1x32xf32>, vector<32x32xf32> -> vector<33x32xf32>
    %c0_5 = arith.constant 0 : index
    %c0_6 = arith.constant 0 : index
    %c0_7 = arith.constant 0 : index
    %7 = vector.load %arg2[%c0_5, %c0_6, %c0_7] : memref<2x32x32xbf16, #tpu.memory_space<vmem>>, vector<1x32x32xbf16>
    %8 = vector.shape_cast %7 : vector<1x32x32xbf16> to vector<32x32xbf16>
    %9 = arith.truncf %6 : vector<33x32xf32> to vector<33x32xbf16>
    %cst = arith.constant dense<0.000000e+00> : vector<33x32xf32>
    %10 = tpu.matmul %9, %8, %cst {dimension_numbers = #tpu.dot_dimension_numbers<[1], [0], [0], [1], [0, 0, 1, 1], [], []>} : vector<33x32xbf16>, vector<32x32xbf16>, vector<33x32xf32> -> vector<33x32xf32>
    %11 = arith.truncf %10 : vector<33x32xf32> to vector<33x32xbf16>
    %cst_8 = arith.constant dense<0.000000e+00> : vector<33x32xf32>
    %12 = tpu.matmul %11, %8, %cst_8 {dimension_numbers = #tpu.dot_dimension_numbers<[1], [0], [0], [1], [0, 0, 1, 1], [], []>} : vector<33x32xbf16>, vector<32x32xbf16>, vector<33x32xf32> -> vector<33x32xf32>
    %cst_9 = arith.constant 2.000000e+00 : f32
    %13 = vector.broadcast %cst_9 : f32 to vector<33x32xf32>
    %14 = arith.mulf %13, %12 : vector<33x32xf32>
    %15 = arith.subf %14, %6 : vector<33x32xf32>
    %c1 = arith.constant 1 : index
    %c0_10 = arith.constant 0 : index
    %c0_11 = arith.constant 0 : index
    %16 = vector.load %arg2[%c1, %c0_10, %c0_11] : memref<2x32x32xbf16, #tpu.memory_space<vmem>>, vector<1x32x32xbf16>
    %17 = vector.shape_cast %16 : vector<1x32x32xbf16> to vector<32x32xbf16>
    %18 = arith.truncf %6 : vector<33x32xf32> to vector<33x32xbf16>
    %cst_12 = arith.constant dense<0.000000e+00> : vector<33x32xf32>
    %19 = tpu.matmul %18, %17, %cst_12 {dimension_numbers = #tpu.dot_dimension_numbers<[1], [0], [0], [1], [0, 0, 1, 1], [], []>} : vector<33x32xbf16>, vector<32x32xbf16>, vector<33x32xf32> -> vector<33x32xf32>
    %20 = arith.truncf %19 : vector<33x32xf32> to vector<33x32xbf16>
    %cst_13 = arith.constant dense<0.000000e+00> : vector<33x32xf32>
    %21 = tpu.matmul %20, %17, %cst_13 {dimension_numbers = #tpu.dot_dimension_numbers<[1], [0], [0], [1], [0, 0, 1, 1], [], []>} : vector<33x32xbf16>, vector<32x32xbf16>, vector<33x32xf32> -> vector<33x32xf32>
    %cst_14 = arith.constant 2.000000e+00 : f32
    %22 = vector.broadcast %cst_14 : f32 to vector<33x32xf32>
    %23 = arith.mulf %22, %21 : vector<33x32xf32>
    %24 = arith.subf %23, %6 : vector<33x32xf32>
    %25 = tpu.concatenate %6, %10, %15, %19, %24 in 0 : vector<33x32xf32>, vector<33x32xf32>, vector<33x32xf32>, vector<33x32xf32>, vector<33x32xf32> -> vector<165x32xf32>
    %26 = arith.truncf %25 : vector<165x32xf32> to vector<165x32xbf16>
    %c0_15 = arith.constant 0 : index
    %c0_16 = arith.constant 0 : index
    %27 = vector.load %arg3[%c0_15, %c0_16] : memref<64x165xbf16, #tpu.memory_space<vmem>>, vector<64x165xbf16>
    %cst_17 = arith.constant dense<0.000000e+00> : vector<64x32xf32>
    %28 = tpu.matmul %27, %26, %cst_17 {dimension_numbers = #tpu.dot_dimension_numbers<[1], [0], [0], [1], [0, 0, 1, 1], [], []>} : vector<64x165xbf16>, vector<165x32xbf16>, vector<64x32xf32> -> vector<64x32xf32>
    %c0_18 = arith.constant 0 : index
    %c0_19 = arith.constant 0 : index
    %29 = vector.load %arg4[%c0_18, %c0_19] : memref<64x1xf32, #tpu.memory_space<vmem>>, vector<64x1xf32>
    %30 = vector.broadcast %29 : vector<64x1xf32> to vector<64x32xf32>
    %31 = arith.addf %28, %30 : vector<64x32xf32>
    %32 = arith.negf %31 : vector<64x32xf32>
    %33 = math.exp %32 : vector<64x32xf32>
    %cst_20 = arith.constant 1.000000e+00 : f32
    %34 = vector.broadcast %cst_20 : f32 to vector<64x32xf32>
    %35 = arith.addf %34, %33 : vector<64x32xf32>
    %36 = arith.divf %34, %35 : vector<64x32xf32>
    %37 = vector.extract_strided_slice %36 {offsets = [0, 0], sizes = [32, 32], strides = [1, 1]} : vector<64x32xf32> to vector<32x32xf32>
    %38 = vector.extract_strided_slice %36 {offsets = [32, 0], sizes = [32, 32], strides = [1, 1]} : vector<64x32xf32> to vector<32x32xf32>
    %39 = arith.mulf %37, %5 : vector<32x32xf32>
    %40 = tpu.concatenate %3, %39 in 0 : vector<1x32xf32>, vector<32x32xf32> -> vector<33x32xf32>
    %c0_21 = arith.constant 0 : index
    %c0_22 = arith.constant 0 : index
    %c0_23 = arith.constant 0 : index
    %41 = vector.load %arg2[%c0_21, %c0_22, %c0_23] : memref<2x32x32xbf16, #tpu.memory_space<vmem>>, vector<1x32x32xbf16>
    %42 = vector.shape_cast %41 : vector<1x32x32xbf16> to vector<32x32xbf16>
    %43 = arith.truncf %40 : vector<33x32xf32> to vector<33x32xbf16>
    %cst_24 = arith.constant dense<0.000000e+00> : vector<33x32xf32>
    %44 = tpu.matmul %43, %42, %cst_24 {dimension_numbers = #tpu.dot_dimension_numbers<[1], [0], [0], [1], [0, 0, 1, 1], [], []>} : vector<33x32xbf16>, vector<32x32xbf16>, vector<33x32xf32> -> vector<33x32xf32>
    %45 = arith.truncf %44 : vector<33x32xf32> to vector<33x32xbf16>
    %cst_25 = arith.constant dense<0.000000e+00> : vector<33x32xf32>
    %46 = tpu.matmul %45, %42, %cst_25 {dimension_numbers = #tpu.dot_dimension_numbers<[1], [0], [0], [1], [0, 0, 1, 1], [], []>} : vector<33x32xbf16>, vector<32x32xbf16>, vector<33x32xf32> -> vector<33x32xf32>
    %cst_26 = arith.constant 2.000000e+00 : f32
    %47 = vector.broadcast %cst_26 : f32 to vector<33x32xf32>
    %48 = arith.mulf %47, %46 : vector<33x32xf32>
    %49 = arith.subf %48, %40 : vector<33x32xf32>
    %c1_27 = arith.constant 1 : index
    %c0_28 = arith.constant 0 : index
    %c0_29 = arith.constant 0 : index
    %50 = vector.load %arg2[%c1_27, %c0_28, %c0_29] : memref<2x32x32xbf16, #tpu.memory_space<vmem>>, vector<1x32x32xbf16>
    %51 = vector.shape_cast %50 : vector<1x32x32xbf16> to vector<32x32xbf16>
    %52 = arith.truncf %40 : vector<33x32xf32> to vector<33x32xbf16>
    %cst_30 = arith.constant dense<0.000000e+00> : vector<33x32xf32>
    %53 = tpu.matmul %52, %51, %cst_30 {dimension_numbers = #tpu.dot_dimension_numbers<[1], [0], [0], [1], [0, 0, 1, 1], [], []>} : vector<33x32xbf16>, vector<32x32xbf16>, vector<33x32xf32> -> vector<33x32xf32>
    %54 = arith.truncf %53 : vector<33x32xf32> to vector<33x32xbf16>
    %cst_31 = arith.constant dense<0.000000e+00> : vector<33x32xf32>
    %55 = tpu.matmul %54, %51, %cst_31 {dimension_numbers = #tpu.dot_dimension_numbers<[1], [0], [0], [1], [0, 0, 1, 1], [], []>} : vector<33x32xbf16>, vector<32x32xbf16>, vector<33x32xf32> -> vector<33x32xf32>
    %cst_32 = arith.constant 2.000000e+00 : f32
    %56 = vector.broadcast %cst_32 : f32 to vector<33x32xf32>
    %57 = arith.mulf %56, %55 : vector<33x32xf32>
    %58 = arith.subf %57, %40 : vector<33x32xf32>
    %59 = tpu.concatenate %40, %44, %49, %53, %58 in 0 : vector<33x32xf32>, vector<33x32xf32>, vector<33x32xf32>, vector<33x32xf32>, vector<33x32xf32> -> vector<165x32xf32>
    %60 = arith.truncf %59 : vector<165x32xf32> to vector<165x32xbf16>
    %c0_33 = arith.constant 0 : index
    %c0_34 = arith.constant 0 : index
    %61 = vector.load %arg5[%c0_33, %c0_34] : memref<32x165xbf16, #tpu.memory_space<vmem>>, vector<32x165xbf16>
    %cst_35 = arith.constant dense<0.000000e+00> : vector<32x32xf32>
    %62 = tpu.matmul %61, %60, %cst_35 {dimension_numbers = #tpu.dot_dimension_numbers<[1], [0], [0], [1], [0, 0, 1, 1], [], []>} : vector<32x165xbf16>, vector<165x32xbf16>, vector<32x32xf32> -> vector<32x32xf32>
    %c0_36 = arith.constant 0 : index
    %c0_37 = arith.constant 0 : index
    %63 = vector.load %arg6[%c0_36, %c0_37] : memref<32x1xf32, #tpu.memory_space<vmem>>, vector<32x1xf32>
    %64 = vector.broadcast %63 : vector<32x1xf32> to vector<32x32xf32>
    %65 = arith.addf %62, %64 : vector<32x32xf32>
    %66 = math.tanh %65 : vector<32x32xf32>
    %67 = arith.mulf %38, %5 : vector<32x32xf32>
    %cst_38 = arith.constant 1.000000e+00 : f32
    %68 = vector.broadcast %cst_38 : f32 to vector<32x32xf32>
    %69 = arith.subf %68, %38 : vector<32x32xf32>
    %70 = arith.mulf %69, %66 : vector<32x32xf32>
    %71 = arith.addf %67, %70 : vector<32x32xf32>
    %c0_39 = arith.constant 0 : index
    %c0_40 = arith.constant 0 : index
    %c0_41 = arith.constant 0 : index
    %72 = vector.load %arg14[%c0_39, %c0_40, %c0_41] : memref<2x32x32xf32, #tpu.memory_space<vmem>>, vector<1x32x32xf32>
    %73 = vector.shape_cast %72 : vector<1x32x32xf32> to vector<32x32xf32>
    %74 = vector.shape_cast %71 : vector<32x32xf32> to vector<1x32x32xf32>
    tpu.vector_store %arg14[%c0_39, %c0_40, %c0_41], %74 {strides = array<i32>} : memref<2x32x32xf32, #tpu.memory_space<vmem>>, vector<1x32x32xf32>,
    %c1_42 = arith.constant 1 : index
    %c0_43 = arith.constant 0 : index
    %c0_44 = arith.constant 0 : index
    %75 = vector.load %arg14[%c1_42, %c0_43, %c0_44] : memref<2x32x32xf32, #tpu.memory_space<vmem>>, vector<1x32x32xf32>
    %76 = vector.shape_cast %75 : vector<1x32x32xf32> to vector<32x32xf32>
    %77 = tpu.concatenate %71, %76 in 0 : vector<32x32xf32>, vector<32x32xf32> -> vector<64x32xf32>
    %c0_45 = arith.constant 0 : index
    %c0_46 = arith.constant 0 : index
    %c0_47 = arith.constant 0 : index
    %78 = vector.load %arg2[%c0_45, %c0_46, %c0_47] : memref<2x32x32xbf16, #tpu.memory_space<vmem>>, vector<1x32x32xbf16>
    %79 = vector.shape_cast %78 : vector<1x32x32xbf16> to vector<32x32xbf16>
    %80 = arith.truncf %77 : vector<64x32xf32> to vector<64x32xbf16>
    %cst_48 = arith.constant dense<0.000000e+00> : vector<64x32xf32>
    %81 = tpu.matmul %80, %79, %cst_48 {dimension_numbers = #tpu.dot_dimension_numbers<[1], [0], [0], [1], [0, 0, 1, 1], [], []>} : vector<64x32xbf16>, vector<32x32xbf16>, vector<64x32xf32> -> vector<64x32xf32>
    %82 = arith.truncf %81 : vector<64x32xf32> to vector<64x32xbf16>
    %cst_49 = arith.constant dense<0.000000e+00> : vector<64x32xf32>
    %83 = tpu.matmul %82, %79, %cst_49 {dimension_numbers = #tpu.dot_dimension_numbers<[1], [0], [0], [1], [0, 0, 1, 1], [], []>} : vector<64x32xbf16>, vector<32x32xbf16>, vector<64x32xf32> -> vector<64x32xf32>
    %cst_50 = arith.constant 2.000000e+00 : f32
    %84 = vector.broadcast %cst_50 : f32 to vector<64x32xf32>
    %85 = arith.mulf %84, %83 : vector<64x32xf32>
    %86 = arith.subf %85, %77 : vector<64x32xf32>
    %c1_51 = arith.constant 1 : index
    %c0_52 = arith.constant 0 : index
    %c0_53 = arith.constant 0 : index
    %87 = vector.load %arg2[%c1_51, %c0_52, %c0_53] : memref<2x32x32xbf16, #tpu.memory_space<vmem>>, vector<1x32x32xbf16>
    %88 = vector.shape_cast %87 : vector<1x32x32xbf16> to vector<32x32xbf16>
    %89 = arith.truncf %77 : vector<64x32xf32> to vector<64x32xbf16>
    %cst_54 = arith.constant dense<0.000000e+00> : vector<64x32xf32>
    %90 = tpu.matmul %89, %88, %cst_54 {dimension_numbers = #tpu.dot_dimension_numbers<[1], [0], [0], [1], [0, 0, 1, 1], [], []>} : vector<64x32xbf16>, vector<32x32xbf16>, vector<64x32xf32> -> vector<64x32xf32>
    %91 = arith.truncf %90 : vector<64x32xf32> to vector<64x32xbf16>
    %cst_55 = arith.constant dense<0.000000e+00> : vector<64x32xf32>
    %92 = tpu.matmul %91, %88, %cst_55 {dimension_numbers = #tpu.dot_dimension_numbers<[1], [0], [0], [1], [0, 0, 1, 1], [], []>} : vector<64x32xbf16>, vector<32x32xbf16>, vector<64x32xf32> -> vector<64x32xf32>
    %cst_56 = arith.constant 2.000000e+00 : f32
    %93 = vector.broadcast %cst_56 : f32 to vector<64x32xf32>
    %94 = arith.mulf %93, %92 : vector<64x32xf32>
    %95 = arith.subf %94, %77 : vector<64x32xf32>
    %96 = tpu.concatenate %77, %81, %86, %90, %95 in 0 : vector<64x32xf32>, vector<64x32xf32>, vector<64x32xf32>, vector<64x32xf32>, vector<64x32xf32> -> vector<320x32xf32>
    %97 = arith.truncf %96 : vector<320x32xf32> to vector<320x32xbf16>
    %c0_57 = arith.constant 0 : index
    %c0_58 = arith.constant 0 : index
    %98 = vector.load %arg7[%c0_57, %c0_58] : memref<64x320xbf16, #tpu.memory_space<vmem>>, vector<64x320xbf16>
    %cst_59 = arith.constant dense<0.000000e+00> : vector<64x32xf32>
    %99 = tpu.matmul %98, %97, %cst_59 {dimension_numbers = #tpu.dot_dimension_numbers<[1], [0], [0], [1], [0, 0, 1, 1], [], []>} : vector<64x320xbf16>, vector<320x32xbf16>, vector<64x32xf32> -> vector<64x32xf32>
    %c0_60 = arith.constant 0 : index
    %c0_61 = arith.constant 0 : index
    %100 = vector.load %arg8[%c0_60, %c0_61] : memref<64x1xf32, #tpu.memory_space<vmem>>, vector<64x1xf32>
    %101 = vector.broadcast %100 : vector<64x1xf32> to vector<64x32xf32>
    %102 = arith.addf %99, %101 : vector<64x32xf32>
    %103 = arith.negf %102 : vector<64x32xf32>
    %104 = math.exp %103 : vector<64x32xf32>
    %cst_62 = arith.constant 1.000000e+00 : f32
    %105 = vector.broadcast %cst_62 : f32 to vector<64x32xf32>
    %106 = arith.addf %105, %104 : vector<64x32xf32>
    %107 = arith.divf %105, %106 : vector<64x32xf32>
    %108 = vector.extract_strided_slice %107 {offsets = [0, 0], sizes = [32, 32], strides = [1, 1]} : vector<64x32xf32> to vector<32x32xf32>
    %109 = vector.extract_strided_slice %107 {offsets = [32, 0], sizes = [32, 32], strides = [1, 1]} : vector<64x32xf32> to vector<32x32xf32>
    %110 = arith.mulf %108, %76 : vector<32x32xf32>
    %111 = tpu.concatenate %71, %110 in 0 : vector<32x32xf32>, vector<32x32xf32> -> vector<64x32xf32>
    %c0_63 = arith.constant 0 : index
    %c0_64 = arith.constant 0 : index
    %c0_65 = arith.constant 0 : index
    %112 = vector.load %arg2[%c0_63, %c0_64, %c0_65] : memref<2x32x32xbf16, #tpu.memory_space<vmem>>, vector<1x32x32xbf16>
    %113 = vector.shape_cast %112 : vector<1x32x32xbf16> to vector<32x32xbf16>
    %114 = arith.truncf %111 : vector<64x32xf32> to vector<64x32xbf16>
    %cst_66 = arith.constant dense<0.000000e+00> : vector<64x32xf32>
    %115 = tpu.matmul %114, %113, %cst_66 {dimension_numbers = #tpu.dot_dimension_numbers<[1], [0], [0], [1], [0, 0, 1, 1], [], []>} : vector<64x32xbf16>, vector<32x32xbf16>, vector<64x32xf32> -> vector<64x32xf32>
    %116 = arith.truncf %115 : vector<64x32xf32> to vector<64x32xbf16>
    %cst_67 = arith.constant dense<0.000000e+00> : vector<64x32xf32>
    %117 = tpu.matmul %116, %113, %cst_67 {dimension_numbers = #tpu.dot_dimension_numbers<[1], [0], [0], [1], [0, 0, 1, 1], [], []>} : vector<64x32xbf16>, vector<32x32xbf16>, vector<64x32xf32> -> vector<64x32xf32>
    %cst_68 = arith.constant 2.000000e+00 : f32
    %118 = vector.broadcast %cst_68 : f32 to vector<64x32xf32>
    %119 = arith.mulf %118, %117 : vector<64x32xf32>
    %120 = arith.subf %119, %111 : vector<64x32xf32>
    %c1_69 = arith.constant 1 : index
    %c0_70 = arith.constant 0 : index
    %c0_71 = arith.constant 0 : index
    %121 = vector.load %arg2[%c1_69, %c0_70, %c0_71] : memref<2x32x32xbf16, #tpu.memory_space<vmem>>, vector<1x32x32xbf16>
    %122 = vector.shape_cast %121 : vector<1x32x32xbf16> to vector<32x32xbf16>
    %123 = arith.truncf %111 : vector<64x32xf32> to vector<64x32xbf16>
    %cst_72 = arith.constant dense<0.000000e+00> : vector<64x32xf32>
    %124 = tpu.matmul %123, %122, %cst_72 {dimension_numbers = #tpu.dot_dimension_numbers<[1], [0], [0], [1], [0, 0, 1, 1], [], []>} : vector<64x32xbf16>, vector<32x32xbf16>, vector<64x32xf32> -> vector<64x32xf32>
    %125 = arith.truncf %124 : vector<64x32xf32> to vector<64x32xbf16>
    %cst_73 = arith.constant dense<0.000000e+00> : vector<64x32xf32>
    %126 = tpu.matmul %125, %122, %cst_73 {dimension_numbers = #tpu.dot_dimension_numbers<[1], [0], [0], [1], [0, 0, 1, 1], [], []>} : vector<64x32xbf16>, vector<32x32xbf16>, vector<64x32xf32> -> vector<64x32xf32>
    %cst_74 = arith.constant 2.000000e+00 : f32
    %127 = vector.broadcast %cst_74 : f32 to vector<64x32xf32>
    %128 = arith.mulf %127, %126 : vector<64x32xf32>
    %129 = arith.subf %128, %111 : vector<64x32xf32>
    %130 = tpu.concatenate %111, %115, %120, %124, %129 in 0 : vector<64x32xf32>, vector<64x32xf32>, vector<64x32xf32>, vector<64x32xf32>, vector<64x32xf32> -> vector<320x32xf32>
    %131 = arith.truncf %130 : vector<320x32xf32> to vector<320x32xbf16>
    %c0_75 = arith.constant 0 : index
    %c0_76 = arith.constant 0 : index
    %132 = vector.load %arg9[%c0_75, %c0_76] : memref<32x320xbf16, #tpu.memory_space<vmem>>, vector<32x320xbf16>
    %cst_77 = arith.constant dense<0.000000e+00> : vector<32x32xf32>
    %133 = tpu.matmul %132, %131, %cst_77 {dimension_numbers = #tpu.dot_dimension_numbers<[1], [0], [0], [1], [0, 0, 1, 1], [], []>} : vector<32x320xbf16>, vector<320x32xbf16>, vector<32x32xf32> -> vector<32x32xf32>
    %c0_78 = arith.constant 0 : index
    %c0_79 = arith.constant 0 : index
    %134 = vector.load %arg10[%c0_78, %c0_79] : memref<32x1xf32, #tpu.memory_space<vmem>>, vector<32x1xf32>
    %135 = vector.broadcast %134 : vector<32x1xf32> to vector<32x32xf32>
    %136 = arith.addf %133, %135 : vector<32x32xf32>
    %137 = math.tanh %136 : vector<32x32xf32>
    %138 = arith.mulf %109, %76 : vector<32x32xf32>
    %cst_80 = arith.constant 1.000000e+00 : f32
    %139 = vector.broadcast %cst_80 : f32 to vector<32x32xf32>
    %140 = arith.subf %139, %109 : vector<32x32xf32>
    %141 = arith.mulf %140, %137 : vector<32x32xf32>
    %142 = arith.addf %138, %141 : vector<32x32xf32>
    %c1_81 = arith.constant 1 : index
    %c0_82 = arith.constant 0 : index
    %c0_83 = arith.constant 0 : index
    %143 = vector.load %arg14[%c1_81, %c0_82, %c0_83] : memref<2x32x32xf32, #tpu.memory_space<vmem>>, vector<1x32x32xf32>
    %144 = vector.shape_cast %143 : vector<1x32x32xf32> to vector<32x32xf32>
    %145 = vector.shape_cast %142 : vector<32x32xf32> to vector<1x32x32xf32>
    tpu.vector_store %arg14[%c1_81, %c0_82, %c0_83], %145 {strides = array<i32>} : memref<2x32x32xf32, #tpu.memory_space<vmem>>, vector<1x32x32xf32>,
    %c0_84 = arith.constant 0 : index
    %c0_85 = arith.constant 0 : index
    %146 = vector.load %arg11[%c0_84, %c0_85] : memref<1x32xbf16, #tpu.memory_space<vmem>>, vector<1x32xbf16>
    %147 = arith.truncf %142 : vector<32x32xf32> to vector<32x32xbf16>
    %cst_86 = arith.constant dense<0.000000e+00> : vector<1x32xf32>
    %148 = tpu.matmul %146, %147, %cst_86 {dimension_numbers = #tpu.dot_dimension_numbers<[1], [0], [0], [1], [0, 0, 1, 1], [], []>} : vector<1x32xbf16>, vector<32x32xbf16>, vector<1x32xf32> -> vector<1x32xf32>
    %c0_87 = arith.constant 0 : index
    %c0_88 = arith.constant 0 : index
    %149 = vector.load %arg12[%c0_87, %c0_88] : memref<1x1xf32, #tpu.memory_space<vmem>>, vector<1x1xf32>
    %150 = vector.broadcast %149 : vector<1x1xf32> to vector<1x32xf32>
    %151 = arith.addf %148, %150 : vector<1x32xf32>
    %c0_89 = arith.constant 0 : index
    %c0_90 = arith.constant 0 : index
    %152 = vector.load %arg15[%c0_89, %c0_90] : memref<1x32xf32, #tpu.memory_space<vmem>>, vector<1x32xf32>
    tpu.vector_store %arg15[%c0_89, %c0_90], %151 {strides = array<i32>} : memref<1x32xf32, #tpu.memory_space<vmem>>, vector<1x32xf32>,
    %c0_91 = arith.constant 0 : index
    %c0_92 = arith.constant 0 : index
    %c0_93 = arith.constant 0 : index
    %153 = vector.load %arg13[%c0_91, %c0_92, %c0_93] : memref<1x1x32xf32, #tpu.memory_space<vmem>>, vector<1x1x32xf32>
    %154 = vector.shape_cast %153 : vector<1x1x32xf32> to vector<1x32xf32>
    %155 = vector.shape_cast %151 : vector<1x32xf32> to vector<1x1x32xf32>
    tpu.vector_store %arg13[%c0_91, %c0_92, %c0_93], %155 {strides = array<i32>} : memref<1x1x32xf32, #tpu.memory_space<vmem>>, vector<1x1x32xf32>,
    return
  }
  func.func @transform_0(%arg0: i32) -> (i32, i32, i32) {
    %c0_i32 = arith.constant 0 : i32
    %c0_i32_0 = arith.constant 0 : i32
    %c0_i32_1 = arith.constant 0 : i32
    %c0_i32_2 = arith.constant 0 : i32
    return %c0_i32, %c0_i32_0, %c0_i32_1 : i32, i32, i32
  }
  func.func @transform_1(%arg0: i32) -> (i32, i32, i32) {
    %c0_i32 = arith.constant 0 : i32
    %c0_i32_0 = arith.constant 0 : i32
    %c0_i32_1 = arith.constant 0 : i32
    %c0_i32_2 = arith.constant 0 : i32
    return %c0_i32, %c0_i32_0, %c0_i32_1 : i32, i32, i32
  }
  func.func @transform_2(%arg0: i32) -> (i32, i32) {
    %c0_i32 = arith.constant 0 : i32
    %c0_i32_0 = arith.constant 0 : i32
    %c0_i32_1 = arith.constant 0 : i32
    return %c0_i32, %c0_i32_0 : i32, i32
  }
  func.func @transform_3(%arg0: i32) -> (i32, i32) {
    %c0_i32 = arith.constant 0 : i32
    %c0_i32_0 = arith.constant 0 : i32
    %c0_i32_1 = arith.constant 0 : i32
    return %c0_i32, %c0_i32_0 : i32, i32
  }
  func.func @transform_4(%arg0: i32) -> (i32, i32) {
    %c0_i32 = arith.constant 0 : i32
    %c0_i32_0 = arith.constant 0 : i32
    %c0_i32_1 = arith.constant 0 : i32
    return %c0_i32, %c0_i32_0 : i32, i32
  }
  func.func @transform_5(%arg0: i32) -> (i32, i32) {
    %c0_i32 = arith.constant 0 : i32
    %c0_i32_0 = arith.constant 0 : i32
    %c0_i32_1 = arith.constant 0 : i32
    return %c0_i32, %c0_i32_0 : i32, i32
  }
  func.func @transform_6(%arg0: i32) -> (i32, i32) {
    %c0_i32 = arith.constant 0 : i32
    %c0_i32_0 = arith.constant 0 : i32
    %c0_i32_1 = arith.constant 0 : i32
    return %c0_i32, %c0_i32_0 : i32, i32
  }
  func.func @transform_7(%arg0: i32) -> (i32, i32) {
    %c0_i32 = arith.constant 0 : i32
    %c0_i32_0 = arith.constant 0 : i32
    %c0_i32_1 = arith.constant 0 : i32
    return %c0_i32, %c0_i32_0 : i32, i32
  }
  func.func @transform_8(%arg0: i32) -> (i32, i32) {
    %c0_i32 = arith.constant 0 : i32
    %c0_i32_0 = arith.constant 0 : i32
    %c0_i32_1 = arith.constant 0 : i32
    return %c0_i32, %c0_i32_0 : i32, i32
  }
  func.func @transform_9(%arg0: i32) -> (i32, i32) {
    %c0_i32 = arith.constant 0 : i32
    %c0_i32_0 = arith.constant 0 : i32
    %c0_i32_1 = arith.constant 0 : i32
    return %c0_i32, %c0_i32_0 : i32, i32
  }
  func.func @transform_10(%arg0: i32) -> (i32, i32) {
    %c0_i32 = arith.constant 0 : i32
    %c0_i32_0 = arith.constant 0 : i32
    %c0_i32_1 = arith.constant 0 : i32
    return %c0_i32, %c0_i32_0 : i32, i32
  }
  func.func @transform_11(%arg0: i32) -> (i32, i32) {
    %c0_i32 = arith.constant 0 : i32
    %c0_i32_0 = arith.constant 0 : i32
    %c0_i32_1 = arith.constant 0 : i32
    return %c0_i32, %c0_i32_0 : i32, i32
  }
  func.func @transform_12(%arg0: i32) -> (i32, i32, i32) {
    %c0_i32 = arith.constant 0 : i32
    %c0_i32_0 = arith.constant 0 : i32
    %c0_i32_1 = arith.constant 0 : i32
    return %arg0, %c0_i32, %c0_i32_0 : i32, i32, i32
  }
}

</mosaic_0001>

<bundles_post_ra>
// kernel: dcrnn_forward.2
= control target key start
LH: loop header
LB: loop body
LE: loop exit
PB: predicated region body
PF: predicated region fallthrough
CT: control target
= control target key end

     0   :  { %s3533_s13 = smov 0   ;;  %s4379_s0 = inlined_call_operand.vmem [shape: f32[8,2,32], index: 0, kind: input, shape index: {}]   ;;  %s4380_s1 = inlined_call_operand.vmem [shape: bf16[2,32,32], index: 1, kind: input, shape index: {}]   ;;  %s4381_s2 = inlined_call_operand.vmem [shape: bf16[64,170], index: 2, kind: input, shape index: {}]   ;;  %s4382_s3 = inlined_call_operand.vmem [shape: f32[64,1], index: 3, kind: input, shape index: {}]   ;;  %s4383_s4 = inlined_call_operand.vmem [shape: bf16[32,170], index: 4, kind: input, shape index: {}]   ;;  %s4384_s5 = inlined_call_operand.vmem [shape: f32[32,1], index: 5, kind: input, shape index: {}]   ;;  %s4385_s6 = inlined_call_operand.vmem [shape: bf16[64,320], index: 6, kind: input, shape index: {}]   ;;  %s4386_s7 = inlined_call_operand.vmem [shape: f32[64,1], index: 7, kind: input, shape index: {}]   ;;  %s4387_s8 = inlined_call_operand.vmem [shape: bf16[32,320], index: 8, kind: input, shape index: {}]   ;;  %s4388_s9 = inlined_call_operand.vmem [shape: f32[32,1], index: 9, kind: input, shape index: {}]   ;;  %s4389_s10 = inlined_call_operand.vmem [shape: f32[2,32,32], index: 10, kind: output, shape index: {}]  }
   0x1 LB: > { %s2746_s14 = sadd.s32 4294967295, %s3472_s13   ;;  %p2749_p0 = scmp.ge.s32.totalorder %s3472_s13, 1  ;;  %s3472_s13 = sphi %s3533_s13, %s20_s13  }
   0x2   : > { %p306_p1 = scmp.lt.s32.totalorder %s3472_s13, 9 }
   0x4   : > { %p307_p2 = pnand %p2749_p0, %p306_p1 }
   0x5   : > { %p338_p3 = scmp.lt.s32.totalorder (!%p307_p2), %s2746_s14, 7  ;;  %p2751_p4 = scmp.ne.s32.totalorder (!%p307_p2), %s2746_s14, 0 }
   0x6   : > { %310 = sbr.rel (%p307_p2) target bundleno = 3337 (0xd09), region = 60 }
   0xd   : > { %s339_s15 = scalar_select %p338_p3, %s2746_s14, 7 }
   0xe   : > { %346 = sbr.rel (%p2751_p4) target bundleno = 21 (0x15), region = 64  ;;  %vm347_vm0 = vcmask (!%p2751_p4), 261120   ;;  %v3474_v0 = vmov (!%p2751_p4), 0.0  }
   0xf   : > { %s2750_s16 = sshll.u32 %s339_s15, 1  ;;  %348 = vst.msk [vmem:[%s4389_s10] sm:$0xff] (!%p2751_p4), %vm347_vm0, %v3474_v0  ;;  %349 = vst.msk [vmem:[%s4389_s10 + $0x8] sm:$0xff] (!%p2751_p4), %vm347_vm0, %v3474_v0 }
  0x10   : > { %s341_s19 = scalar_lea.vmem %s4379_s0, %s2750_s16  ;;  %350 = vst.msk [vmem:[%s4389_s10 + $0x10] sm:$0xff] (!%p2751_p4), %vm347_vm0, %v3474_v0  ;;  %351 = vst.msk [vmem:[%s4389_s10 + $0x18] sm:$0xff] (!%p2751_p4), %vm347_vm0, %v3474_v0 }
  0x11   : > { %352 = vst.msk [vmem:[%s4389_s10 + $0x20] sm:$0xff] (!%p2751_p4), %vm347_vm0, %v3474_v0  ;;  %353 = vst.msk [vmem:[%s4389_s10 + $0x28] sm:$0xff] (!%p2751_p4), %vm347_vm0, %v3474_v0 }
  0x12   : > { %354 = vst.msk [vmem:[%s4389_s10 + $0x30] sm:$0xff] (!%p2751_p4), %vm347_vm0, %v3474_v0  ;;  %355 = vst.msk [vmem:[%s4389_s10 + $0x38] sm:$0xff] (!%p2751_p4), %vm347_vm0, %v3474_v0 }
  0x15 PF: > { %v3571_v1 = vld [vmem:[%s4380_s1] sm:$0xff]   ;;  %v3475_v2 = vmov 0.0   ;;  %v3578_v3 = vld [vmem:[%s4380_s1 + $0x8] sm:$0xff]   ;;  %vm365_vm1 = vcmask 1041408   ;;  %vm3476_vm2 = vmmov 0   ;;  %v3619_v13 = vld [vmem:[%s4380_s1 + $0x10] sm:$0xff]  }
  0x16   : > { %3062 = vmatprep.subr.bf16.mxu0 %v3475_v2  ;;  %3314 = vmatprep.subr.bf16.mxu1 %v3475_v2  ;;  %v3582_v4 = vld [vmem:[%s341_s19] sm:$0x3]  ;;  %v3592_v6 = vld [vmem:[%s4389_s10 + $0x8] sm:$0xff]  ;;  %vm398_vm3 = vcmask 261120   ;;  %v3646_v20 = vld [vmem:[%s4380_s1 + $0x18] sm:$0xff]   ;;  %v3477_v21 = vmov 0  }
  0x17   : > { %3063 = vmatpush3.bf16.msra.mxu0 %v3571_v1  ;;  %3316 = vmatpush3.bf16.msra.mxu1 %v3571_v1  ;;  %v3587_v5 = vld [vmem:[%s4389_s10] sm:$0xff]  ;;  %v367_v8 = vrot.slane %v3592_v6, 6  ;;  %v3601_v9 = vld [vmem:[%s4389_s10 + $0x10] sm:$0xff]  ;;  %v3606_v10 = vld [vmem:[%s4389_s10 + $0x18] sm:$0xff]  ;;  %vm737_vm4 = vcmask 1045504   ;;  %vm856_vm5 = vcmask 343040  }
  0x18   : > { %3064 = vmatprep.subr.bf16.mxu0 %v3475_v2  ;;  %3315 = vmatprep.subr.bf16.mxu1 %v3475_v2  ;;  %v366_v7 = vrot.slane %v3587_v5, 6  ;;  %v369_v11 = vrot.slane %v3601_v9, 6  ;;  %v3614_v12 = vrot.slane %v3606_v10, 6  ;;  %vm717_vm6 = vcmask 1043456  }
  0x19   : > { %3066 = vmatprep.mubr.msk.bf16.mxu0 %vm3476_vm2, %v3475_v2  ;;  %3070 = vmatprep.mubr.msk.bf16.mxu1 %vm3476_vm2, %v3475_v2  ;;  %vm869_vm7 = vcmask 1044480   ;;  %vm1993_vm8 = vcmask 523264  }
  0x1a   : > { %v3622_v14 = vsel %vm365_vm1, %v366_v7, %v367_v8  ;;  %v3626_v15 = vsel %vm365_vm1, %v3582_v4, %v366_v7  ;;  %v3633_v17 = vsel %vm365_vm1, %v367_v8, %v369_v11  ;;  %v3637_v18 = vsel %vm365_vm1, %v369_v11, %v3614_v12  ;;  %3330 = vset.pattern.permute.xlu0 %v3477_v21 }
  0x1b   : > { %3065 = vmatpush3.bf16.msra.mxu0 %v3578_v3  ;;  %3317 = vmatpush3.bf16.msra.mxu1 %v3578_v3  ;;  %v383_v16 = vpack.c.bf16 %v3622_v14, %v3626_v15  ;;  %v384_v19 = vpack.c.bf16 %v3637_v18, %v3633_v17  ;;  %v385_v22 = vpack.c.bf16 %v3614_v12, %v3614_v12 }
  0x1c   : > { %3094 = vmatprep.subr.bf16.mxu0 %v3475_v2  ;;  %3078 = vmatprep.subr.bf16.mxu1 %v3475_v2 }
  0x1d   : > { %3331 = vset.pattern.permute.xlu1 %v3477_v21 }
  0x1e   : > { %3067 = vmatmul.mubr.msk.bf16.vlgmr.msra.gmra.mrb[0].mxu0 %vm398_vm3, %v383_v16  ;;  %3071 = vmatmul.mubr.msk.bf16.vlgmr.msra.gmra.mrb[0].mxu1 %vm398_vm3, %v384_v19 }
  0x1f   : > { %3074 = vmatprep.mubr.msk.bf16.mxu1 %vm3476_vm2, %v3475_v2  ;;  %3095 = vmatpush3.bf16.msra.mxu0 %v3619_v13 }
  0x20   : > { %3096 = vmatprep.subr.bf16.mxu0 %v3475_v2  ;;  %3098 = vmatprep.mubr.msk.bf16.mxu0 %vm3476_vm2, %v3475_v2 }
  0x21   : > { %3079 = vmatpush3.bf16.msra.mxu1 %v3571_v1 }
  0x22   : > { %3080 = vmatprep.subr.bf16.mxu1 %v3475_v2 }
  0x23   : > { %3097 = vmatpush3.bf16.msra.mxu0 %v3646_v20 }
  0x24   : > { %873 = vmatprep.subr.bf16.mxu0 %v3477_v21 }
  0x25   : > { %3081 = vmatpush3.bf16.msra.mxu1 %v3578_v3 }
  0x26   : > { %3075 = vmatmul.mubr.msk.bf16.gmra.mrb[4].mxu1 %vm398_vm3, %v385_v22  ;;  %3099 = vmatmul.mubr.msk.bf16.vlgmr.msra.gmra.mrb[4].mxu0 %vm398_vm3, %v383_v16 }
  0x27   : > { %3102 = vmatprep.mubr.msk.bf16.mxu0 %vm3476_vm2, %v3475_v2  ;;  %874 = vmatpush1.bf16.msra.mxu0 %v383_v16 }
  0x28   : > { %875 = vmatprep.subr.bf16.mxu0 %v3477_v21  ;;  %3082 = vmatprep.mubr.msk.bf16.mxu1 %vm3476_vm2, %v3475_v2 }
  0x29   : > { %3110 = vmatprep.subr.bf16.mxu1 %v3475_v2 }
  0x2b   : > { %876 = vmatpush1.bf16.msra.mxu0 %v384_v19 }
  0x2c   : > { %877 = vmatprep.subr.bf16.mxu0 %v3477_v21 }
  0x2e   : > { %3103 = vmatmul.mubr.msk.bf16.gmra.mrb[8].mxu0 %vm398_vm3, %v384_v19 }
  0x2f   : > { %3106 = vmatprep.mubr.msk.bf16.mxu0 %vm3476_vm2, %v3475_v2 }
  0x36   : > { %3107 = vmatmul.mubr.msk.bf16.gmra.mrb[12].mxu0 %vm398_vm3, %v385_v22 }
  0xf1   : > { %v442_v23 = vpop.f32.mrb[0].mxu0  ;;  %v450_v24 = vpop.f32.mrb[0].mxu1 }
  0xf2   : > { %v698_v25 = vrot.slane %v442_v23, 6  ;;  %v701_v26 = vrot.slane %v450_v24, 6  ;;  %v3068_v27 = vpop.f32.mrb[1].mxu0  ;;  %v3072_v28 = vpop.f32.mrb[1].mxu1 }
  0xf3   : > { %v445_v29 = vpop.f32.mrb[2].mxu0  ;;  %v453_v30 = vpop.f32.mrb[2].mxu1  ;;  %v3338_v27 = vld [vmem:[%s4381_s2 + $0x4] ss:$8 sps:$4 sm:$0xff]  }
  0xf4   : > { %v464_v31 = vpack.c.bf16 %v445_v29, %v442_v23  ;;  %v699_v32 = vrot.slane %v445_v29, 6  ;;  %v465_v33 = vpack.c.bf16 %v453_v30, %v450_v24  ;;  %v3069_v34 = vpop.f32.mrb[3].mxu0  ;;  %v3073_v35 = vpop.f32.mrb[3].mxu1  ;;  %v703_v36 = vrot.slane %v453_v30, 6  ;;  %2780 = vmatprep.mubr.msk.bf16.mxu0 %vm856_vm5, %v3338_v27  ;;  %v772_v28 = vld [vmem:[%s4382_s3] sm:$0xff]  ;;  %v774_v29 = vld [vmem:[%s4382_s3 + $0x10] sm:$0xff] }
  0xf5   : > { %v752_v37 = vsel %vm365_vm1, %v3614_v12, %v698_v25  ;;  %782 = vperm.xlu0 %3330, %v772_v28   ;;  %792 = vperm.xlu1 %3331, %v774_v29   ;;  %v773_v30 = vld [vmem:[%s4382_s3 + $0x8] sm:$0xff]  ;;  %v778_v34 = vld [vmem:[%s4382_s3 + $0x30] sm:$0xff]  ;;  %v779_v35 = vld [vmem:[%s4382_s3 + $0x38] sm:$0xff] }
  0xf6   : > { %v700_v38 = vsel %vm365_vm1, %v698_v25, %v699_v32  ;;  %v702_v39 = vsel %vm365_vm1, %v699_v32, %v701_v26  ;;  %3083 = vmatmul.mubr.msk.bf16.vlgmr.msra.gmra.mrb[8].mxu1 %vm398_vm3, %v464_v31  ;;  %v704_v41 = vsel %vm365_vm1, %v701_v26, %v703_v36  ;;  %v775_v31 = vld [vmem:[%s4382_s3 + $0x18] sm:$0xff]  ;;  %v776_v32 = vld [vmem:[%s4382_s3 + $0x20] sm:$0xff] }
  0xf7   : > { %v755_v40 = vpack.c.bf16 %v700_v38, %v752_v37  ;;  %3111 = vmatpush3.bf16.msra.mxu1 %v3619_v13  ;;  %3086 = vmatprep.mubr.msk.bf16.mxu1 %vm3476_vm2, %v3475_v2  ;;  %v756_v42 = vpack.c.bf16 %v704_v41, %v702_v39  ;;  %v1361_v37 = vld [vmem:[%s4384_s5 + $0x8] sm:$0xff]  ;;  %v1362_v38 = vld [vmem:[%s4384_s5 + $0x10] sm:$0xff]  ;;  %v1363_v39 = vld [vmem:[%s4384_s5 + $0x18] sm:$0xff] }
  0xf8   : > { %3112 = vmatprep.subr.bf16.mxu1 %v3475_v2  ;;  %v1886_v41 = vld [vmem:[%s4386_s7 + $0x8] sm:$0xff] }
  0xf9   : > { %v458_v43 = vpop.f32.mrb[4].mxu1  ;;  %878 = vmatpush1.bf16.msra.mxu0 %v755_v40  ;;  %v3688_v44 = vpop.f32.mrb[4].mxu0  ;;  %787 = vperm.xlu0 %3330, %v773_v30   ;;  %v1885_v40 = vld [vmem:[%s4386_s7] sm:$0xff] }
  0xfa   : > { %v705_v45 = vrot.slane %v458_v43, 6  ;;  %879 = vmatprep.subr.bf16.mxu0 %v3477_v21  ;;  %v3076_v46 = vpop.f32.mrb[5].mxu1  ;;  %v738_v47 = vrot.slane %v3688_v44, 2  ;;  %v3100_v48 = vpop.f32.mrb[5].mxu0  ;;  %v466_v58 = vpack.c.bf16 %v458_v43, %v458_v43  ;;  %797 = vperm.xlu1 %3331, %v775_v31   ;;  %v1888_v43 = vld [vmem:[%s4386_s7 + $0x18] sm:$0xff] }
  0xfb   : > { %v461_v49 = vpop.f32.mrb[6].mxu1  ;;  %3113 = vmatpush3.bf16.msra.mxu1 %v3646_v20  ;;  %v596_v50 = vpop.f32.mrb[6].mxu0  ;;  %v1890_v46 = vld [vmem:[%s4386_s7 + $0x28] sm:$0xff]  ;;  %v1891_v48 = vld [vmem:[%s4386_s7 + $0x30] sm:$0xff] }
  0xfc   : > { %v3694_v51 = vsel %vm365_vm1, %v703_v36, %v705_v45  ;;  %v3077_v52 = vpop.f32.mrb[7].mxu1  ;;  %v615_v53 = vpack.c.bf16 %v596_v50, %v3688_v44  ;;  %v739_v54 = vrot.slane %v596_v50, 2  ;;  %v3101_v55 = vpop.f32.mrb[7].mxu0  ;;  %3126 = vmatprep.subr.bf16.mxu1 %v3475_v2  ;;  %v1360_v36 = vld [vmem:[%s4384_s5] sm:$0xff]  ;;  %v1892_v49 = vld [vmem:[%s4386_s7 + $0x38] sm:$0xff] }
  0xfd   : > { %880 = vmatpush1.bf16.msra.mxu0 %v756_v42  ;;  %802 = vperm.xlu0 %3330, %v776_v32   ;;  %v1887_v42 = vld [vmem:[%s4386_s7 + $0x10] sm:$0xff]  ;;  %v1889_v45 = vld [vmem:[%s4386_s7 + $0x20] sm:$0xff]  ;;  %v2537_v52 = vld [vmem:[%s4388_s9 + $0x8] sm:$0xff] }
  0xfe   : > { %3087 = vmatmul.mubr.msk.bf16.gmra.mrb[12].mxu1 %vm398_vm3, %v465_v33  ;;  %v3702_v56 = vsel %vm737_vm4, %v738_v47, %v739_v54  ;;  %881 = vmatprep.subr.bf16.mxu0 %v3477_v21  ;;  %v777_v33 = vld [vmem:[%s4382_s3 + $0x28] sm:$0xff]  ;;  %v2536_v50 = vld [vmem:[%s4388_s9] sm:$0xff] }
  0xff   : > { %3090 = vmatprep.mubr.msk.bf16.mxu1 %vm3476_vm2, %v3475_v2  ;;  %807 = vperm.xlu1 %3331, %v777_v33  }
 0x101   : > { %v601_v57 = vpop.f32.mrb[8].mxu0  ;;  %812 = vperm.xlu0 %3330, %v778_v34  }
 0x102   : > { %v741_v59 = vrot.slane %v601_v57, 2  ;;  %v3104_v60 = vpop.f32.mrb[9].mxu0 }
 0x103   : > { %v604_v61 = vpop.f32.mrb[10].mxu0  ;;  %817 = vperm.xlu1 %3331, %v779_v35  }
 0x104   : > { %v3708_v62 = vsel %vm737_vm4, %v739_v54, %v741_v59  ;;  %v616_v63 = vpack.c.bf16 %v604_v61, %v601_v57  ;;  %v743_v0 = vrot.slane %v604_v61, 2  ;;  %v3105_v7 = vpop.f32.mrb[11].mxu0  ;;  %v2539_v54 = vld [vmem:[%s4388_s9 + $0x18] sm:$0xff] }
 0x105   : > { %1366 = vperm.xlu0 %3330, %v1360_v36  }
 0x106   : > { %3091 = vmatmul.mubr.msk.bf16.gmra.mrb[16].mxu1 %vm398_vm3, %v466_v58  ;;  %v3712_v8 = vsel %vm737_vm4, %v741_v59, %v743_v0 }
 0x107   : > { %v760_v11 = vpack.c.bf16 %v3712_v8, %v3708_v62  ;;  %3114 = vmatprep.mubr.msk.bf16.mxu1 %vm3476_vm2, %v3475_v2  ;;  %1371 = vperm.xlu1 %3331, %v1361_v37  }
 0x109   : > { %v609_v16 = vpop.f32.mrb[12].mxu0  ;;  %1376 = vperm.xlu0 %3330, %v1362_v38  }
 0x10a   : > { %v745_v19 = vrot.slane %v609_v16, 2  ;;  %v3108_v22 = vpop.f32.mrb[13].mxu0  ;;  %v617_v26 = vpack.c.bf16 %v609_v16, %v609_v16 }
 0x10b   : > { %v612_v23 = vpop.f32.mrb[14].mxu0  ;;  %1381 = vperm.xlu1 %3331, %v1363_v39  }
 0x10c   : > { %v3109_v24 = vpop.f32.mrb[15].mxu0  ;;  %v3719_v25 = vsel %vm737_vm4, %v743_v0, %v745_v19 }
 0x10d   : > { %1895 = vperm.xlu0 %3330, %v1885_v40  }
 0x10e   : > { %3115 = vmatmul.mubr.msk.bf16.vlgmr.msra.gmra.mrb[20].mxu1 %vm398_vm3, %v615_v53  ;;  %v2538_v53 = vld [vmem:[%s4388_s9 + $0x10] sm:$0xff] }
 0x10f   : > { %3118 = vmatprep.mubr.msk.bf16.mxu1 %vm3476_vm2, %v3475_v2  ;;  %3127 = vmatpush3.bf16.msra.mxu1 %v3571_v1 }
 0x110   : > { %3128 = vmatprep.subr.bf16.mxu1 %v3475_v2  ;;  %1900 = vperm.xlu1 %3331, %v1886_v41  }
 0x111   : > { %1905 = vperm.xlu0 %3330, %v1887_v42  }
 0x113   : > { %3129 = vmatpush3.bf16.msra.mxu1 %v3578_v3 }
 0x114   : > { %3142 = vmatprep.subr.bf16.mxu1 %v3475_v2  ;;  %1910 = vperm.xlu1 %3331, %v1888_v43  }
 0x115   : > { %1915 = vperm.xlu0 %3330, %v1889_v45  }
 0x116   : > { %3119 = vmatmul.mubr.msk.bf16.gmra.mrb[24].mxu1 %vm398_vm3, %v616_v63 }
 0x117   : > { %3122 = vmatprep.mubr.msk.bf16.mxu1 %vm3476_vm2, %v3475_v2 }
 0x118   : > { %1920 = vperm.xlu1 %3331, %v1890_v46  }
 0x119   : > { %1925 = vperm.xlu0 %3330, %v1891_v48  }
 0x11c   : > { %1930 = vperm.xlu1 %3331, %v1892_v49  }
 0x11d   : > { %2542 = vperm.xlu0 %3330, %v2536_v50  }
 0x11e   : > { %3123 = vmatmul.mubr.msk.bf16.gmra.mrb[28].mxu1 %vm398_vm3, %v617_v26 }
 0x11f   : > { %3130 = vmatprep.mubr.msk.bf16.mxu1 %vm3476_vm2, %v3475_v2 }
 0x120   : > { %2547 = vperm.xlu1 %3331, %v2537_v52  }
 0x121   : > { %2552 = vperm.xlu0 %3330, %v2538_v53  }
 0x124   : > { %2557 = vperm.xlu1 %3331, %v2539_v54  }
 0x1c9   : > { %v510_v55 = vpop.f32.mrb[8].mxu1 }
 0x1ca   : > { %v532_v57 = vmul.f32 2.0, %v510_v55  ;;  %v3084_v58 = vpop.f32.mrb[9].mxu1 }
 0x1cb   : > { %v513_v59 = vpop.f32.mrb[10].mxu1 }
 0x1cc   : > { %v537_v60 = vsub.f32 %v532_v57, %v3626_v15  ;;  %v533_v61 = vmul.f32 2.0, %v513_v59  ;;  %v3085_v63 = vpop.f32.mrb[11].mxu1 }
 0x1ce   : > { %v718_v0 = vrot.slane %v537_v60, 4  ;;  %v538_v7 = vsub.f32 %v533_v61, %v3622_v14 }
 0x1d0   : > { %v753_v16 = vsel %vm717_vm6, %v3694_v51, %v718_v0  ;;  %v719_v19 = vrot.slane %v538_v7, 4 }
 0x1d1   : > { %v518_v22 = vpop.f32.mrb[12].mxu1 }
 0x1d2   : > { %v720_v23 = vsel %vm717_vm6, %v718_v0, %v719_v19  ;;  %v534_v24 = vmul.f32 2.0, %v518_v22  ;;  %v3088_v26 = vpop.f32.mrb[13].mxu1  ;;  %v3336_v22 = vld [vmem:[%s4381_s2] ss:$8 sps:$4 sm:$0xff]  }
 0x1d3   : > { %v521_v27 = vpop.f32.mrb[14].mxu1  ;;  %v757_v28 = vpack.c.bf16 %v720_v23, %v753_v16  ;;  %v3339_v23 = vld [vmem:[%s4381_s2 + $0x14] ss:$8 sps:$4 sm:$0xff]  }
 0x1d4   : > { %v539_v29 = vsub.f32 %v534_v24, %v3633_v17  ;;  %v535_v30 = vmul.f32 2.0, %v521_v27  ;;  %v3089_v31 = vpop.f32.mrb[15].mxu1  ;;  %v3344_v24 = vld [vmem:[%s4381_s2 + $0x20] ss:$8 sps:$4 sm:$0xff]   ;;  %v3345_v26 = vld [vmem:[%s4381_s2 + $0x34] ss:$8 sps:$4 sm:$0xff]  }
 0x1d5   : > { %882 = vmatpush1.bf16.msra.mxu0 %v757_v28  ;;  %v3347_v27 = vld [vmem:[%s4381_s2 + $0x30] ss:$8 sps:$4 sm:$0xff]   ;;  %v783_v28 = vpop.permute.xlu0 %782 }
 0x1d6   : > { %v721_v32 = vrot.slane %v539_v29, 4  ;;  %v540_v33 = vsub.f32 %v535_v30, %v3637_v18  ;;  %883 = vmatprep.subr.bf16.mxu0 %v3477_v21 }
 0x1d8   : > { %v722_v51 = vsel %vm717_vm6, %v719_v19, %v721_v32  ;;  %v723_v34 = vrot.slane %v540_v33, 4 }
 0x1d9   : > { %v526_v35 = vpop.f32.mrb[16].mxu1 }
 0x1da   : > { %v724_v36 = vsel %vm717_vm6, %v721_v32, %v723_v34  ;;  %v536_v37 = vmul.f32 2.0, %v526_v35  ;;  %v3092_v38 = vpop.f32.mrb[17].mxu1  ;;  %v788_v32 = vpop.permute.xlu0 %787 }
 0x1db   : > { %v529_v39 = vpop.f32.mrb[18].mxu1  ;;  %v758_v40 = vpack.c.bf16 %v724_v36, %v722_v51  ;;  %v793_v36 = vpop.permute.xlu1 %792 }
 0x1dc   : > { %v541_v41 = vsub.f32 %v536_v37, %v3614_v12  ;;  %v3093_v42 = vpop.f32.mrb[19].mxu1 }
 0x1dd   : > { %884 = vmatpush1.bf16.msra.mxu0 %v758_v40 }
 0x1de   : > { %v725_v43 = vrot.slane %v541_v41, 4  ;;  %885 = vmatprep.subr.bf16.mxu0 %v3477_v21 }
 0x1df   : > { %v798_v41 = vpop.permute.xlu1 %797 }
 0x1e0   : > { %v726_v45 = vsel %vm717_vm6, %v723_v34, %v725_v43 }
 0x1e1   : > { %v661_v46 = vpop.f32.mrb[20].mxu1  ;;  %v754_v48 = vsel %vm737_vm4, %v726_v45, %v738_v47 }
 0x1e2   : > { %v683_v49 = vmul.f32 2.0, %v661_v46  ;;  %v3116_v50 = vpop.f32.mrb[21].mxu1  ;;  %v759_v52 = vpack.c.bf16 %v3702_v56, %v754_v48 }
 0x1e3   : > { %v664_v53 = vpop.f32.mrb[22].mxu1 }
 0x1e4   : > { %v688_v54 = vsub.f32 %v683_v49, %v3626_v15  ;;  %v3117_v55 = vpop.f32.mrb[23].mxu1  ;;  %886 = vmatpush1.bf16.msra.mxu0 %v759_v52  ;;  %v684_v58 = vmul.f32 2.0, %v664_v53 }
 0x1e5   : > { %887 = vmatprep.subr.bf16.mxu0 %v3477_v21 }
 0x1e6   : > { %v761_v57 = vpack.c.bf16 %v688_v54, %v3719_v25  ;;  %v689_v60 = vsub.f32 %v684_v58, %v3622_v14 }
 0x1e8   : > { %888 = vmatpush1.bf16.msra.mxu0 %v760_v11 }
 0x1e9   : > { %v669_v44 = vpop.f32.mrb[24].mxu1  ;;  %889 = vmatprep.subr.bf16.mxu0 %v3477_v21 }
 0x1ea   : > { %v685_v47 = vmul.f32 2.0, %v669_v44  ;;  %v3120_v59 = vpop.f32.mrb[25].mxu1 }
 0x1eb   : > { %v672_v56 = vpop.f32.mrb[26].mxu1 }
 0x1ec   : > { %v690_v15 = vsub.f32 %v685_v47, %v3633_v17  ;;  %v3121_v61 = vpop.f32.mrb[27].mxu1  ;;  %890 = vmatpush1.bf16.msra.mxu0 %v761_v57  ;;  %v686_v63 = vmul.f32 2.0, %v672_v56 }
 0x1ed   : > { %891 = vmatprep.subr.bf16.mxu0 %v3477_v21 }
 0x1ee   : > { %v762_v25 = vpack.c.bf16 %v690_v15, %v689_v60  ;;  %v691_v7 = vsub.f32 %v686_v63, %v3637_v18  ;;  %v3342_v18 = vld [vmem:[%s4381_s2 + $0x24] ss:$8 sps:$4 sm:$0xff]  }
 0x1f0   : > { %892 = vmatpush1.bf16.msra.mxu0 %v762_v25 }
 0x1f1   : > { %v677_v0 = vpop.f32.mrb[28].mxu1  ;;  %893 = vmatprep.subr.bf16.mxu0 %v3477_v21 }
 0x1f2   : > { %v687_v62 = vmul.f32 2.0, %v677_v0  ;;  %v3124_v8 = vpop.f32.mrb[29].mxu1 }
 0x1f3   : > { %v680_v11 = vpop.f32.mrb[30].mxu1 }
 0x1f4   : > { %v692_v16 = vsub.f32 %v687_v62, %v3614_v12  ;;  %v3125_v14 = vpop.f32.mrb[31].mxu1  ;;  %v3341_v12 = vld [vmem:[%s4381_s2 + $0x10] ss:$8 sps:$4 sm:$0xff]  }
 0x1f6   : > { %v763_v17 = vpack.c.bf16 %v692_v16, %v691_v7 }
 0x1f8   : > { %v871_v19 = vsel %vm869_vm7, %v763_v17, 0 }
 0x1f9   : > { %894 = vmatpush1.bf16.msra.mxu0 %v871_v19 }
 0x1fa   : > { %3174 = vmatprep.subr.bf16.mxu0 %v3475_v2 }
 0x1fc   : > { %906 = vmatmul.mubr.bf16.vlgmr.msra.gmra.mrb[16].mxu0 %v3336_v22 }
 0x1fd   : > { %2781 = vmatprep.mubr.msk.bf16.mxu0 %vm856_vm5, %v3339_v23  ;;  %3175 = vmatpush3.bf16.msra.mxu0 %v3619_v13 }
 0x1fe   : > { %3176 = vmatprep.subr.bf16.mxu0 %v3475_v2 }
 0x201   : > { %3177 = vmatpush3.bf16.msra.mxu0 %v3646_v20 }
 0x204   : > { %914 = vmatmul.mubr.bf16.gmra.mrb[20].mxu0 %v3341_v12 }
 0x205   : > { %2782 = vmatprep.mubr.msk.bf16.mxu0 %vm856_vm5, %v3342_v18 }
 0x20c   : > { %922 = vmatmul.mubr.bf16.gmra.mrb[24].mxu0 %v3344_v24 }
 0x20d   : > { %2783 = vmatprep.mubr.msk.bf16.mxu0 %vm856_vm5, %v3345_v26 }
 0x214   : > { %930 = vmatmul.mubr.bf16.gmra.mrb[28].mxu0 %v3347_v27 }
 0x215   : > { %3178 = vmatprep.mubr.msk.bf16.mxu0 %vm3476_vm2, %v3475_v2 }
 0x2cf   : > { %v907_v29 = vpop.f32.mrb[16].mxu0 }
 0x2d0   : > { %v908_v30 = vadd.f32 %v907_v29, %v783_v28  ;;  %v909_v31 = vpop.f32.mrb[17].mxu0 }
 0x2d1   : > { %v910_v33 = vpop.f32.mrb[18].mxu0 }
 0x2d2   : > { %v2784_v51 = vmul.f32 -1.442695, %v908_v30  ;;  %v911_v34 = vadd.f32 %v910_v33, %v788_v32  ;;  %v912_v35 = vpop.f32.mrb[19].mxu0 }
 0x2d4   : > { %3382 = vpow2.f32 %v2784_v51  ;;  %v2785_v37 = vmul.f32 -1.442695, %v911_v34 }
 0x2d6   : > { %3384 = vpow2.f32 %v2785_v37 }
 0x2d7   : > { %v915_v38 = vpop.f32.mrb[20].mxu0 }
 0x2d8   : > { %v916_v39 = vadd.f32 %v915_v38, %v793_v36  ;;  %v917_v40 = vpop.f32.mrb[21].mxu0 }
 0x2d9   : > { %v918_v42 = vpop.f32.mrb[22].mxu0 }
 0x2da   : > { %v2786_v43 = vmul.f32 -1.442695, %v916_v39  ;;  %v919_v45 = vadd.f32 %v918_v42, %v798_v41  ;;  %v920_v46 = vpop.f32.mrb[23].mxu0 }
 0x2dc   : > { %3386 = vpow2.f32 %v2786_v43  ;;  %v2787_v48 = vmul.f32 -1.442695, %v919_v45 }
 0x2de   : > { %v3383_v49 = vpop.eup %3382  ;;  %3388 = vpow2.f32 %v2787_v48 }
 0x2df   : > { %v962_v50 = vadd.f32 1.0, %v3383_v49  ;;  %v3871_v52 = vpop.f32.mrb[24].mxu0 }
 0x2e0   : > { %v3385_v53 = vpop.eup %3384  ;;  %v925_v54 = vpop.f32.mrb[25].mxu0 }
 0x2e1   : > { %3390 = vrcp.f32 %v962_v50  ;;  %v963_v55 = vadd.f32 1.0, %v3385_v53  ;;  %v3873_v57 = vpop.f32.mrb[26].mxu0 }
 0x2e2   : > { %v928_v58 = vpop.f32.mrb[27].mxu0 }
 0x2e3   : > { %3392 = vrcp.f32 %v963_v55 }
 0x2e6   : > { %v3387_v44 = vpop.eup %3386 }
 0x2e7   : > { %v964_v47 = vadd.f32 1.0, %v3387_v44  ;;  %v3875_v59 = vpop.f32.mrb[28].mxu0 }
 0x2e8   : > { %v3389_v56 = vpop.eup %3388  ;;  %v933_v60 = vpop.f32.mrb[29].mxu0 }
 0x2e9   : > { %3394 = vrcp.f32 %v964_v47  ;;  %v965_v15 = vadd.f32 1.0, %v3389_v56  ;;  %v3877_v61 = vpop.f32.mrb[30].mxu0 }
 0x2ea   : > { %v936_v25 = vpop.f32.mrb[31].mxu0 }
 0x2eb   : > { %v3391_v63 = vpop.eup %3390  ;;  %3396 = vrcp.f32 %v965_v15 }
 0x2ec   : > { %v986_v0 = vmul.f32 %v3391_v63, %v3587_v5 }
 0x2ed   : > { %v3393_v62 = vpop.eup %3392 }
 0x2ee   : > { %v994_v8 = vrot.slane %v986_v0, 6  ;;  %v987_v11 = vmul.f32 %v3393_v62, %v3592_v6 }
 0x2f0   : > { %v995_v7 = vrot.slane %v987_v11, 6  ;;  %v3886_v14 = vsel %vm365_vm1, %v3582_v4, %v994_v8 }
 0x2f2   : > { %v3882_v16 = vsel %vm365_vm1, %v994_v8, %v995_v7 }
 0x2f3   : > { %v3395_v17 = vpop.eup %3394  ;;  %v1007_v19 = vpack.c.bf16 %v3882_v16, %v3886_v14 }
 0x2f4   : > { %v988_v22 = vmul.f32 %v3395_v17, %v3601_v9 }
 0x2f5   : > { %v3397_v23 = vpop.eup %3396  ;;  %3131 = vmatmul.mubr.msk.bf16.vlgmr.msra.gmra.mrb[32].mxu1 %vm398_vm3, %v1007_v19 }
 0x2f6   : > { %v989_v5 = vmul.f32 %v3397_v23, %v3606_v10  ;;  %3134 = vmatprep.mubr.msk.bf16.mxu1 %vm3476_vm2, %v3475_v2  ;;  %v997_v6 = vrot.slane %v988_v22, 6  ;;  %3143 = vmatpush3.bf16.msra.mxu1 %v3571_v1 }
 0x2f7   : > { %3144 = vmatprep.subr.bf16.mxu1 %v3475_v2 }
 0x2f8   : > { %v3897_v4 = vrot.slane %v989_v5, 6  ;;  %v3900_v12 = vsel %vm365_vm1, %v995_v7, %v997_v6 }
 0x2fa   : > { %v3904_v9 = vsel %vm365_vm1, %v997_v6, %v3897_v4  ;;  %3145 = vmatpush3.bf16.msra.mxu1 %v3578_v3  ;;  %v1009_v1 = vpack.c.bf16 %v3897_v4, %v3897_v4 }
 0x2fb   : > { %v1008_v10 = vpack.c.bf16 %v3904_v9, %v3900_v12  ;;  %3158 = vmatprep.subr.bf16.mxu1 %v3475_v2 }
 0x2fd   : > { %3135 = vmatmul.mubr.msk.bf16.gmra.mrb[36].mxu1 %vm398_vm3, %v1008_v10 }
 0x2fe   : > { %3138 = vmatprep.mubr.msk.bf16.mxu1 %vm3476_vm2, %v3475_v2 }
 0x305   : > { %3139 = vmatmul.mubr.msk.bf16.gmra.mrb[40].mxu1 %vm398_vm3, %v1009_v1 }
 0x306   : > { %3146 = vmatprep.mubr.msk.bf16.mxu1 %vm3476_vm2, %v3475_v2 }
 0x3c8   : > { %v1053_v18 = vpop.f32.mrb[32].mxu1 }
 0x3c9   : > { %v1292_v3 = vrot.slane %v1053_v18, 6  ;;  %v3132_v24 = vpop.f32.mrb[33].mxu1 }
 0x3ca   : > { %v1056_v26 = vpop.f32.mrb[34].mxu1 }
 0x3cb   : > { %v1075_v27 = vpack.c.bf16 %v1056_v26, %v1053_v18  ;;  %v1293_v28 = vrot.slane %v1056_v26, 6  ;;  %v3133_v29 = vpop.f32.mrb[35].mxu1  ;;  %v1344_v30 = vsel %vm365_vm1, %v3897_v4, %v1292_v3 }
 0x3cd   : > { %v1294_v31 = vsel %vm365_vm1, %v1292_v3, %v1293_v28  ;;  %3147 = vmatmul.mubr.msk.bf16.vlgmr.msra.gmra.mrb[44].mxu1 %vm398_vm3, %v1075_v27 }
 0x3ce   : > { %v1347_v32 = vpack.c.bf16 %v1294_v31, %v1344_v30  ;;  %3159 = vmatpush3.bf16.msra.mxu1 %v3619_v13  ;;  %3150 = vmatprep.mubr.msk.bf16.mxu1 %vm3476_vm2, %v3475_v2 }
 0x3cf   : > { %3160 = vmatprep.subr.bf16.mxu1 %v3475_v2 }
 0x3d0   : > { %v1061_v33 = vpop.f32.mrb[36].mxu1 }
 0x3d1   : > { %v1295_v51 = vrot.slane %v1061_v33, 6  ;;  %v3136_v34 = vpop.f32.mrb[37].mxu1 }
 0x3d2   : > { %v1064_v35 = vpop.f32.mrb[38].mxu1  ;;  %3161 = vmatpush3.bf16.msra.mxu1 %v3646_v20 }
 0x3d3   : > { %v1296_v36 = vsel %vm365_vm1, %v1293_v28, %v1295_v51  ;;  %v1076_v37 = vpack.c.bf16 %v1064_v35, %v1061_v33  ;;  %v1297_v38 = vrot.slane %v1064_v35, 6  ;;  %v3137_v39 = vpop.f32.mrb[39].mxu1  ;;  %1411 = vmatprep.subr.bf16.mxu1 %v3477_v21 }
 0x3d5   : > { %v1298_v13 = vsel %vm365_vm1, %v1295_v51, %v1297_v38  ;;  %3151 = vmatmul.mubr.msk.bf16.gmra.mrb[48].mxu1 %vm398_vm3, %v1076_v37 }
 0x3d6   : > { %v1348_v40 = vpack.c.bf16 %v1298_v13, %v1296_v36  ;;  %3154 = vmatprep.mubr.msk.bf16.mxu1 %vm3476_vm2, %v3475_v2 }
 0x3d8   : > { %v1069_v41 = vpop.f32.mrb[40].mxu1 }
 0x3d9   : > { %v1299_v42 = vrot.slane %v1069_v41, 6  ;;  %v3140_v43 = vpop.f32.mrb[41].mxu1  ;;  %v1077_v20 = vpack.c.bf16 %v1069_v41, %v1069_v41 }
 0x3da   : > { %v1072_v45 = vpop.f32.mrb[42].mxu1 }
 0x3db   : > { %v1300_v46 = vsel %vm365_vm1, %v1297_v38, %v1299_v42  ;;  %v3141_v48 = vpop.f32.mrb[43].mxu1 }
 0x3dd   : > { %3155 = vmatmul.mubr.msk.bf16.gmra.mrb[52].mxu1 %vm398_vm3, %v1077_v20 }
 0x3de   : > { %3162 = vmatprep.mubr.msk.bf16.mxu1 %vm3476_vm2, %v3475_v2 }
 0x3e5   : > { %3163 = vmatmul.mubr.msk.bf16.vlgmr.msra.gmra.mrb[56].mxu1 %vm398_vm3, %v1007_v19 }
 0x3e6   : > { %1412 = vmatpush1.bf16.msra.mxu1 %v1007_v19  ;;  %3166 = vmatprep.mubr.msk.bf16.mxu1 %vm3476_vm2, %v3475_v2 }
 0x3e7   : > { %1413 = vmatprep.subr.bf16.mxu1 %v3477_v21 }
 0x3ea   : > { %1414 = vmatpush1.bf16.msra.mxu1 %v1008_v10 }
 0x3eb   : > { %1415 = vmatprep.subr.bf16.mxu1 %v3477_v21 }
 0x3ed   : > { %3167 = vmatmul.mubr.msk.bf16.gmra.mrb[60].mxu1 %vm398_vm3, %v1008_v10 }
 0x3ee   : > { %1416 = vmatpush1.bf16.msra.mxu1 %v1347_v32  ;;  %3170 = vmatprep.mubr.msk.bf16.mxu1 %vm3476_vm2, %v3475_v2 }
 0x3ef   : > { %1417 = vmatprep.subr.bf16.mxu1 %v3477_v21 }
 0x3f2   : > { %1418 = vmatpush1.bf16.msra.mxu1 %v1348_v40 }
 0x3f3   : > { %1419 = vmatprep.subr.bf16.mxu1 %v3477_v21 }
 0x3f5   : > { %3171 = vmatmul.mubr.msk.bf16.gmra.mrb[64].mxu1 %vm398_vm3, %v1009_v1 }
 0x4a0   : > { %v1121_v49 = vpop.f32.mrb[44].mxu1 }
 0x4a1   : > { %v1143_v50 = vmul.f32 2.0, %v1121_v49  ;;  %v3148_v53 = vpop.f32.mrb[45].mxu1 }
 0x4a2   : > { %v1124_v54 = vpop.f32.mrb[46].mxu1 }
 0x4a3   : > { %v1148_v55 = vsub.f32 %v1143_v50, %v3886_v14  ;;  %v1144_v58 = vmul.f32 2.0, %v1124_v54  ;;  %v3149_v44 = vpop.f32.mrb[47].mxu1 }
 0x4a5   : > { %v1311_v47 = vrot.slane %v1148_v55, 4  ;;  %v1149_v56 = vsub.f32 %v1144_v58, %v3882_v16 }
 0x4a7   : > { %v1345_v60 = vsel %vm717_vm6, %v1300_v46, %v1311_v47  ;;  %v1312_v15 = vrot.slane %v1149_v56, 4  ;;  %v3350_v56 = vld [vmem:[%s4383_s4 + $0x4] ss:$8 sps:$4 sm:$0xff]  }
 0x4a8   : > { %v1129_v25 = vpop.f32.mrb[48].mxu1  ;;  %2808 = vmatprep.mubr.msk.bf16.mxu1 %vm856_vm5, %v3350_v56 }
 0x4a9   : > { %v1313_v63 = vsel %vm717_vm6, %v1311_v47, %v1312_v15  ;;  %v1145_v0 = vmul.f32 2.0, %v1129_v25  ;;  %v3152_v62 = vpop.f32.mrb[49].mxu1 }
 0x4aa   : > { %v1132_v8 = vpop.f32.mrb[50].mxu1  ;;  %v1349_v11 = vpack.c.bf16 %v1313_v63, %v1345_v60 }
 0x4ab   : > { %v1150_v7 = vsub.f32 %v1145_v0, %v3900_v12  ;;  %v1146_v17 = vmul.f32 2.0, %v1132_v8  ;;  %v3153_v19 = vpop.f32.mrb[51].mxu1 }
 0x4ac   : > { %1420 = vmatpush1.bf16.msra.mxu1 %v1349_v11 }
 0x4ad   : > { %v1314_v22 = vrot.slane %v1150_v7, 4  ;;  %v1151_v23 = vsub.f32 %v1146_v17, %v3904_v9  ;;  %1421 = vmatprep.subr.bf16.mxu1 %v3477_v21 }
 0x4af   : > { %v1315_v5 = vsel %vm717_vm6, %v1312_v15, %v1314_v22  ;;  %v1316_v6 = vrot.slane %v1151_v23, 4 }
 0x4b0   : > { %v1137_v10 = vpop.f32.mrb[52].mxu1 }
 0x4b1   : > { %v1317_v1 = vsel %vm717_vm6, %v1314_v22, %v1316_v6  ;;  %v1147_v18 = vmul.f32 2.0, %v1137_v10  ;;  %v3156_v3 = vpop.f32.mrb[53].mxu1 }
 0x4b2   : > { %v1140_v24 = vpop.f32.mrb[54].mxu1  ;;  %v1350_v26 = vpack.c.bf16 %v1317_v1, %v1315_v5 }
 0x4b3   : > { %v1152_v27 = vsub.f32 %v1147_v18, %v3897_v4  ;;  %v3157_v28 = vpop.f32.mrb[55].mxu1 }
 0x4b4   : > { %1422 = vmatpush1.bf16.msra.mxu1 %v1350_v26 }
 0x4b5   : > { %v1318_v29 = vrot.slane %v1152_v27, 4  ;;  %1423 = vmatprep.subr.bf16.mxu1 %v3477_v21 }
 0x4b7   : > { %v1319_v30 = vsel %vm717_vm6, %v1316_v6, %v1318_v29  ;;  %v4006_v29 = vld [vmem:[%s4380_s1 + $0x8] sm:$0xff]  }
 0x4b8   : > { %v1187_v31 = vpop.f32.mrb[56].mxu1 }
 0x4b9   : > { %v1330_v32 = vrot.slane %v1187_v31, 2  ;;  %v3164_v33 = vpop.f32.mrb[57].mxu1 }
 0x4ba   : > { %v1190_v51 = vpop.f32.mrb[58].mxu1 }
 0x4bb   : > { %v1346_v34 = vsel %vm737_vm4, %v1319_v30, %v1330_v32  ;;  %v1209_v35 = vpack.c.bf16 %v1190_v51, %v1187_v31  ;;  %v1331_v36 = vrot.slane %v1190_v51, 2  ;;  %v3165_v37 = vpop.f32.mrb[59].mxu1  ;;  %v803_v30 = vpop.permute.xlu0 %802 }
 0x4bc   : > { %v924_v31 = vadd.f32 %v3871_v52, %v803_v30 }
 0x4bd   : > { %v1332_v38 = vsel %vm737_vm4, %v1330_v32, %v1331_v36  ;;  %3179 = vmatmul.mubr.msk.bf16.vlgmr.msra.gmra.mrb[32].mxu0 %vm398_vm3, %v1209_v35  ;;  %v808_v32 = vpop.permute.xlu1 %807 }
 0x4be   : > { %v1351_v39 = vpack.c.bf16 %v1332_v38, %v1346_v34  ;;  %3182 = vmatprep.mubr.msk.bf16.mxu0 %vm3476_vm2, %v3475_v2  ;;  %v927_v33 = vadd.f32 %v3873_v57, %v808_v32  ;;  %v2788_v51 = vmul.f32 -1.442695, %v924_v31  ;;  %v4052_v32 = vld [vmem:[%s4389_s10 + $0x20] sm:$0xff] }
 0x4bf   : > { %v813_v35 = vpop.permute.xlu0 %812 }
 0x4c0   : > { %v1195_v13 = vpop.f32.mrb[60].mxu1  ;;  %1424 = vmatpush1.bf16.msra.mxu1 %v1351_v39  ;;  %v2789_v34 = vmul.f32 -1.442695, %v927_v33  ;;  %3398 = vpow2.f32 %v2788_v51  ;;  %v4057_v33 = vld [vmem:[%s4389_s10 + $0x28] sm:$0xff] }
 0x4c1   : > { %v1333_v40 = vrot.slane %v1195_v13, 2  ;;  %v3168_v41 = vpop.f32.mrb[61].mxu1  ;;  %1425 = vmatprep.subr.bf16.mxu1 %v3477_v21  ;;  %v818_v37 = vpop.permute.xlu1 %817 }
 0x4c2   : > { %v1198_v42 = vpop.f32.mrb[62].mxu1  ;;  %3400 = vpow2.f32 %v2789_v34  ;;  %v935_v38 = vadd.f32 %v3877_v61, %v818_v37  ;;  %v4068_v34 = vpack.c.bf16 %v4057_v33, %v4052_v32  ;;  %v4091_v37 = vld [vmem:[%s4389_s10 + $0x38] sm:$0xff] }
 0x4c3   : > { %v1334_v43 = vsel %vm737_vm4, %v1331_v36, %v1333_v40  ;;  %v1210_v45 = vpack.c.bf16 %v1198_v42, %v1195_v13  ;;  %v1335_v20 = vrot.slane %v1198_v42, 2  ;;  %v3169_v46 = vpop.f32.mrb[63].mxu1  ;;  %v932_v36 = vadd.f32 %v3875_v59, %v813_v35 }
 0x4c4   : > { %v2791_v13 = vmul.f32 -1.442695, %v935_v38 }
 0x4c5   : > { %v1336_v48 = vsel %vm737_vm4, %v1333_v40, %v1335_v20  ;;  %3183 = vmatmul.mubr.msk.bf16.gmra.mrb[36].mxu0 %vm398_vm3, %v1210_v45  ;;  %v2790_v39 = vmul.f32 -1.442695, %v932_v36  ;;  %v4086_v36 = vld [vmem:[%s4389_s10 + $0x30] sm:$0xff] }
 0x4c6   : > { %v1352_v49 = vpack.c.bf16 %v1336_v48, %v1334_v43  ;;  %3186 = vmatprep.mubr.msk.bf16.mxu0 %vm3476_vm2, %v3475_v2  ;;  %v1367_v43 = vpop.permute.xlu0 %1366  ;;  %v1372_v48 = vpop.permute.xlu1 %1371  ;;  %v4097_v38 = vpack.c.bf16 %v4091_v37, %v4086_v36 }
 0x4c7   : > { %3402 = vpow2.f32 %v2790_v39  ;;  %v4105_v39 = vld [vmem:[%s4380_s1 + $0x10] sm:$0xff]  }
 0x4c8   : > { %v1203_v50 = vpop.f32.mrb[64].mxu1  ;;  %1426 = vmatpush1.bf16.msra.mxu1 %v1352_v49  ;;  %3404 = vpow2.f32 %v2791_v13  ;;  %v4113_v13 = vld [vmem:[%s4380_s1 + $0x18] sm:$0xff]  }
 0x4c9   : > { %v1337_v53 = vrot.slane %v1203_v50, 2  ;;  %v3172_v54 = vpop.f32.mrb[65].mxu1  ;;  %1427 = vmatprep.subr.bf16.mxu1 %v3477_v21  ;;  %v1211_v58 = vpack.c.bf16 %v1203_v50, %v1203_v50 }
 0x4ca   : > { %v1206_v55 = vpop.f32.mrb[66].mxu1  ;;  %v3399_v40 = vpop.eup %3398 }
 0x4cb   : > { %v3173_v44 = vpop.f32.mrb[67].mxu1  ;;  %v1338_v47 = vsel %vm737_vm4, %v1335_v20, %v1337_v53  ;;  %v966_v52 = vadd.f32 1.0, %v3399_v40  ;;  %v1377_v55 = vpop.permute.xlu0 %1376 }
 0x4cc   : > { %v3401_v41 = vpop.eup %3400 }
 0x4cd   : > { %3187 = vmatmul.mubr.msk.bf16.gmra.mrb[40].mxu0 %vm398_vm3, %v1211_v58  ;;  %v967_v42 = vadd.f32 1.0, %v3401_v41  ;;  %3406 = vrcp.f32 %v966_v52 }
 0x4cf   : > { %3408 = vrcp.f32 %v967_v42 }
 0x4d1   : > { %v3403_v57 = vpop.eup %3402 }
 0x4d2   : > { %v3405_v59 = vpop.eup %3404  ;;  %v968_v50 = vadd.f32 1.0, %v3403_v57 }
 0x4d3   : > { %v969_v54 = vadd.f32 1.0, %v3405_v59 }
 0x4d7   : > { %v3407_v44 = vpop.eup %3406 }
 0x590   : > { %v1255_v2 = vpop.f32.mrb[32].mxu0 }
 0x591   : > { %v1277_v60 = vmul.f32 2.0, %v1255_v2  ;;  %v3180_v15 = vpop.f32.mrb[33].mxu0  ;;  %v1382_v2 = vpop.permute.xlu1 %1381 }
 0x592   : > { %v1258_v25 = vpop.f32.mrb[34].mxu0  ;;  %v3409_v15 = vpop.eup %3408 }
 0x593   : > { %v1282_v63 = vsub.f32 %v1277_v60, %v3886_v14  ;;  %v3181_v0 = vpop.f32.mrb[35].mxu0  ;;  %v1278_v8 = vmul.f32 2.0, %v1258_v25 }
 0x594   : > { %v1468_v0 = vsub.f32 1.0, %v3407_v44 }
 0x595   : > { %v1353_v62 = vpack.c.bf16 %v1282_v63, %v1338_v47  ;;  %v1283_v22 = vsub.f32 %v1278_v8, %v3882_v16  ;;  %v3462_v8 = vld [vmem:[%s4389_s10] sm:$0xff] }
 0x597   : > { %1428 = vmatpush1.bf16.msra.mxu1 %v1353_v62 }
 0x598   : > { %v1263_v11 = vpop.f32.mrb[36].mxu0  ;;  %1429 = vmatprep.subr.bf16.mxu1 %v3477_v21 }
 0x599   : > { %v1279_v7 = vmul.f32 2.0, %v1263_v11  ;;  %v3184_v17 = vpop.f32.mrb[37].mxu0  ;;  %v1464_v11 = vmul.f32 %v3462_v8, %v3407_v44 }
 0x59a   : > { %v1266_v19 = vpop.f32.mrb[38].mxu0  ;;  %v1469_v17 = vsub.f32 1.0, %v3409_v15 }
 0x59b   : > { %v1284_v23 = vsub.f32 %v1279_v7, %v3900_v12  ;;  %v3185_v5 = vpop.f32.mrb[39].mxu0  ;;  %v1280_v10 = vmul.f32 2.0, %v1266_v19  ;;  %v3348_v12 = vld [vmem:[%s4383_s4] ss:$8 sps:$4 sm:$0xff]  }
 0x59d   : > { %v1354_v6 = vpack.c.bf16 %v1284_v23, %v1283_v22  ;;  %v1285_v24 = vsub.f32 %v1280_v10, %v3904_v9  ;;  %v3999_v9 = vld [vmem:[%s4380_s1] sm:$0xff]   ;;  %v3463_v22 = vld [vmem:[%s4389_s10 + $0x8] sm:$0xff] }
 0x59e   : > { %3190 = vmatprep.subr.bf16.mxu0 %v3999_v9  ;;  %v1465_v23 = vmul.f32 %v3463_v22, %v3409_v15 }
 0x59f   : > { %1430 = vmatpush1.bf16.msra.mxu1 %v1354_v6  ;;  %3191 = vmatpush3.bf16.msra.mxu0 %v3999_v9 }
 0x5a0   : > { %v1271_v1 = vpop.f32.mrb[40].mxu0  ;;  %1431 = vmatprep.subr.bf16.mxu1 %v3477_v21  ;;  %v3351_v21 = vld [vmem:[%s4383_s4 + $0x14] ss:$8 sps:$4 sm:$0xff]   ;;  %3192 = vmatprep.subr.bf16.mxu0 %v4006_v29 }
 0x5a1   : > { %v1281_v14 = vmul.f32 2.0, %v1271_v1  ;;  %v3188_v18 = vpop.f32.mrb[41].mxu0 }
 0x5a2   : > { %v1274_v3 = vpop.f32.mrb[42].mxu0 }
 0x5a3   : > { %v1286_v26 = vsub.f32 %v1281_v14, %v3897_v4  ;;  %v3189_v27 = vpop.f32.mrb[43].mxu0  ;;  %v3353_v4 = vld [vmem:[%s4383_s4 + $0x10] ss:$8 sps:$4 sm:$0xff]   ;;  %3193 = vmatpush3.bf16.msra.mxu0 %v4006_v29 }
 0x5a4   : > { %3202 = vmatprep.subr.bf16.mxu0 %v3999_v9 }
 0x5a5   : > { %v1355_v28 = vpack.c.bf16 %v1286_v26, %v1285_v24  ;;  %v3464_v26 = vld [vmem:[%s4389_s10 + $0x10] sm:$0xff] }
 0x5a7   : > { %v1409_v16 = vsel %vm869_vm7, %v1355_v28, 0 }
 0x5a8   : > { %1432 = vmatpush1.bf16.msra.mxu1 %v1409_v16 }
 0x5a9   : > { %3226 = vmatprep.subr.bf16.mxu1 %v4105_v39 }
 0x5ab   : > { %1444 = vmatmul.mubr.bf16.vlgmr.msra.gmra.mrb[68].mxu1 %v3348_v12 }
 0x5ac   : > { %2809 = vmatprep.mubr.msk.bf16.mxu1 %vm856_vm5, %v3351_v21  ;;  %v3465_v21 = vld [vmem:[%s4389_s10 + $0x18] sm:$0xff]  ;;  %3227 = vmatpush3.bf16.msra.mxu1 %v4105_v39 }
 0x5ad   : > { %3228 = vmatprep.subr.bf16.mxu1 %v4113_v13 }
 0x5b0   : > { %3229 = vmatpush3.bf16.msra.mxu1 %v4113_v13 }
 0x5b3   : > { %1452 = vmatmul.mubr.bf16.gmra.mrb[72].mxu1 %v3353_v4 }
 0x67e   : > { %v1445_v45 = vpop.f32.mrb[68].mxu1 }
 0x67f   : > { %v1446_v20 = vadd.f32 %v1445_v45, %v1367_v43  ;;  %v1447_v46 = vpop.f32.mrb[69].mxu1 }
 0x680   : > { %v1448_v49 = vpop.f32.mrb[70].mxu1 }
 0x681   : > { %3410 = vtanh.f32 %v1446_v20  ;;  %v1449_v61 = vadd.f32 %v1448_v49, %v1372_v48  ;;  %v1450_v53 = vpop.f32.mrb[71].mxu1 }
 0x683   : > { %3412 = vtanh.f32 %v1449_v61 }
 0x684   : > { %3414 = vrcp.f32 %v968_v50  ;;  %v3360_v50 = vld [vmem:[%s4385_s6 + $0x4] ss:$12 sps:$4 sm:$0xff]  }
 0x685   : > { %3416 = vrcp.f32 %v969_v54 }
 0x686   : > { %v1453_v58 = vpop.f32.mrb[72].mxu1 }
 0x687   : > { %v1454_v47 = vadd.f32 %v1453_v58, %v1377_v55  ;;  %v1455_v56 = vpop.f32.mrb[73].mxu1 }
 0x688   : > { %v1456_v60 = vpop.f32.mrb[74].mxu1 }
 0x689   : > { %3418 = vtanh.f32 %v1454_v47  ;;  %v1457_v25 = vadd.f32 %v1456_v60, %v1382_v2  ;;  %v1458_v63 = vpop.f32.mrb[75].mxu1 }
 0x68b   : > { %v3411_v62 = vpop.eup %3410  ;;  %3420 = vtanh.f32 %v1457_v25 }
 0x68c   : > { %v1472_v7 = vmul.f32 %v3411_v62, %v1468_v0 }
 0x68d   : > { %v3413_v19 = vpop.eup %3412 }
 0x68e   : > { %v4021_v5 = vadd.f32 %v1472_v7, %v1464_v11  ;;  %v1473_v6 = vmul.f32 %v3413_v19, %v1469_v17  ;;  %v3415_v10 = vpop.eup %3414 }
 0x68f   : > { %v3417_v14 = vpop.eup %3416  ;;  %v1470_v18 = vsub.f32 1.0, %v3415_v10  ;;  %v1466_v27 = vmul.f32 %v3464_v26, %v3415_v10 }
 0x690   : > { %1480 = vst.msk [vmem:[%s4389_s10] sm:$0xff] %vm398_vm3, %v4021_v5  ;;  %v4028_v1 = vadd.f32 %v1473_v6, %v1465_v23  ;;  %v1471_v16 = vsub.f32 1.0, %v3417_v14  ;;  %v1467_v4 = vmul.f32 %v3465_v21, %v3417_v14 }
 0x692   : > { %1481 = vst.msk [vmem:[%s4389_s10 + $0x8] sm:$0xff] %vm398_vm3, %v4028_v1  ;;  %v4037_v3 = vpack.c.bf16 %v4028_v1, %v4021_v5 }
 0x693   : > { %v3419_v24 = vpop.eup %3418 }
 0x694   : > { %v1474_v28 = vmul.f32 %v3419_v24, %v1470_v18  ;;  %3194 = vmatprep.mubr.msk.bf16.mxu0 %vm398_vm3, %v4037_v3 }
 0x695   : > { %v3421_v12 = vpop.eup %3420 }
 0x696   : > { %v4047_v30 = vadd.f32 %v1474_v28, %v1466_v27  ;;  %v1475_v31 = vmul.f32 %v3421_v12, %v1471_v16 }
 0x698   : > { %1482 = vst.msk [vmem:[%s4389_s10 + $0x10] sm:$0xff] %vm398_vm3, %v4047_v30  ;;  %v4064_v51 = vadd.f32 %v1475_v31, %v1467_v4 }
 0x69a   : > { %1483 = vst.msk [vmem:[%s4389_s10 + $0x18] sm:$0xff] %vm398_vm3, %v4064_v51  ;;  %v4077_v35 = vpack.c.bf16 %v4064_v51, %v4047_v30 }
 0x69c   : > { %3195 = vmatmul.mubr.msk.bf16.vlgmr.msra.gmra.mrb[44].mxu0 %vm398_vm3, %v4077_v35 }
 0x69d   : > { %3198 = vmatprep.mubr.msk.bf16.mxu0 %vm398_vm3, %v4068_v34  ;;  %3203 = vmatpush3.bf16.msra.mxu0 %v3999_v9 }
 0x69e   : > { %3204 = vmatprep.subr.bf16.mxu0 %v4006_v29 }
 0x6a1   : > { %3205 = vmatpush3.bf16.msra.mxu0 %v4006_v29 }
 0x6a2   : > { %3214 = vmatprep.subr.bf16.mxu0 %v4105_v39 }
 0x6a4   : > { %3199 = vmatmul.mubr.msk.bf16.gmra.mrb[48].mxu0 %vm398_vm3, %v4097_v38 }
 0x76f   : > { %v3196_v40 = vpop.f32.mrb[44].mxu0 }
 0x770   : > { %v1555_v41 = vpop.f32.mrb[45].mxu0 }
 0x771   : > { %v3197_v52 = vpop.f32.mrb[46].mxu0 }
 0x772   : > { %v4117_v42 = vpack.c.bf16 %v3197_v52, %v3196_v40  ;;  %v1558_v57 = vpop.f32.mrb[47].mxu0 }
 0x773   : > { %v4119_v43 = vpack.c.bf16 %v1558_v57, %v1555_v41 }
 0x775   : > { %3206 = vmatprep.mubr.msk.bf16.mxu0 %vm398_vm3, %v4119_v43 }
 0x776   : > { %3207 = vmatmul.mubr.msk.bf16.vlgmr.msra.gmra.mrb[52].mxu0 %vm398_vm3, %v4117_v42 }
 0x777   : > { %v3200_v45 = vpop.f32.mrb[48].mxu0  ;;  %3215 = vmatpush3.bf16.msra.mxu0 %v4105_v39 }
 0x778   : > { %v1571_v20 = vpop.f32.mrb[49].mxu0  ;;  %3216 = vmatprep.subr.bf16.mxu0 %v4113_v13 }
 0x779   : > { %v3201_v46 = vpop.f32.mrb[50].mxu0 }
 0x77a   : > { %v4127_v59 = vpack.c.bf16 %v3201_v46, %v3200_v45  ;;  %v1574_v48 = vpop.f32.mrb[51].mxu0  ;;  %v3367_v46 = vld [vmem:[%s4385_s6 + $0x4c] ss:$12 sps:$4 sm:$0xff]  }
 0x77b   : > { %v4129_v49 = vpack.c.bf16 %v1574_v48, %v1571_v20  ;;  %3217 = vmatpush3.bf16.msra.mxu0 %v4113_v13  ;;  %v3366_v20 = vld [vmem:[%s4385_s6 + $0x30] ss:$12 sps:$4 sm:$0xff]   ;;  %v3370_v48 = vld [vmem:[%s4385_s6 + $0x8] ss:$12 sps:$4 sm:$0xff]  }
 0x77d   : > { %3210 = vmatprep.mubr.msk.bf16.mxu0 %vm398_vm3, %v4129_v49 }
 0x77e   : > { %3211 = vmatmul.mubr.msk.bf16.gmra.mrb[56].mxu0 %vm398_vm3, %v4127_v59 }
 0x77f   : > { %3218 = vmatprep.mubr.msk.bf16.mxu0 %vm398_vm3, %v4037_v3 }
 0x786   : > { %3219 = vmatmul.mubr.msk.bf16.vlgmr.msra.gmra.mrb[60].mxu0 %vm398_vm3, %v4077_v35 }
 0x787   : > { %3222 = vmatprep.mubr.msk.bf16.mxu0 %vm398_vm3, %v4068_v34 }
 0x78e   : > { %3223 = vmatmul.mubr.msk.bf16.gmra.mrb[64].mxu0 %vm398_vm3, %v4097_v38 }
 0x78f   : > { %2038 = vmatprep.mubr.bf16.mxu0 %v3360_v50 }
 0x849   : > { %v3208_v61 = vpop.f32.mrb[52].mxu0 }
 0x84a   : > { %v1669_v53 = vmul.f32 2.0, %v3208_v61  ;;  %v1636_v54 = vpop.f32.mrb[53].mxu0 }
 0x84b   : > { %v1667_v55 = vmul.f32 2.0, %v1636_v54  ;;  %v3209_v58 = vpop.f32.mrb[54].mxu0 }
 0x84c   : > { %v1670_v44 = vmul.f32 2.0, %v3209_v58  ;;  %v1639_v47 = vpop.f32.mrb[55].mxu0  ;;  %v1677_v2 = vsub.f32 %v1669_v53, %v4047_v30 }
 0x84d   : > { %v1668_v56 = vmul.f32 2.0, %v1639_v47  ;;  %v1675_v15 = vsub.f32 %v1667_v55, %v4021_v5 }
 0x84e   : > { %v1678_v60 = vsub.f32 %v1670_v44, %v4064_v51 }
 0x84f   : > { %v1676_v25 = vsub.f32 %v1668_v56, %v4028_v1 }
 0x850   : > { %v1862_v63 = vpack.c.bf16 %v1678_v60, %v1677_v2 }
 0x851   : > { %v3212_v0 = vpop.f32.mrb[56].mxu0  ;;  %v1861_v62 = vpack.c.bf16 %v1676_v25, %v1675_v15 }
 0x852   : > { %v1673_v8 = vmul.f32 2.0, %v3212_v0  ;;  %v1652_v11 = vpop.f32.mrb[57].mxu0 }
 0x853   : > { %v1671_v7 = vmul.f32 2.0, %v1652_v11  ;;  %v3213_v17 = vpop.f32.mrb[58].mxu0  ;;  %2956 = vmatprep.subr.bf16.mxu0 %v1861_v62 }
 0x854   : > { %v1674_v19 = vmul.f32 2.0, %v3213_v17  ;;  %v1655_v22 = vpop.f32.mrb[59].mxu0  ;;  %2957 = vmatpush3.bf16.msra.mxu0 %v4037_v3  ;;  %v1681_v6 = vsub.f32 %v1673_v8, %v4086_v36 }
 0x855   : > { %v1672_v23 = vmul.f32 2.0, %v1655_v22  ;;  %2958 = vmatprep.subr.bf16.mxu0 %v1862_v63  ;;  %v1679_v14 = vsub.f32 %v1671_v7, %v4052_v32 }
 0x856   : > { %v1682_v10 = vsub.f32 %v1674_v19, %v4091_v37 }
 0x857   : > { %v1680_v18 = vsub.f32 %v1672_v23, %v4057_v33 }
 0x858   : > { %2959 = vmatpush3.bf16.msra.mxu0 %v4077_v35  ;;  %v1864_v24 = vpack.c.bf16 %v1682_v10, %v1681_v6 }
 0x859   : > { %v3220_v26 = vpop.f32.mrb[60].mxu0  ;;  %v1863_v27 = vpack.c.bf16 %v1680_v18, %v1679_v14 }
 0x85a   : > { %v1733_v28 = vpop.f32.mrb[61].mxu0 }
 0x85b   : > { %v3221_v16 = vpop.f32.mrb[62].mxu0  ;;  %2960 = vmatprep.subr.bf16.mxu0 %v1863_v27 }
 0x85c   : > { %v1765_v12 = vpack.c.bf16 %v3221_v16, %v3220_v26  ;;  %v1736_v21 = vpop.f32.mrb[63].mxu0  ;;  %2961 = vmatpush3.bf16.msra.mxu0 %v4068_v34  ;;  %v3358_v34 = vld [vmem:[%s4385_s6] ss:$12 sps:$4 sm:$0xff]  }
 0x85d   : > { %v1764_v4 = vpack.c.bf16 %v1736_v21, %v1733_v28  ;;  %2962 = vmatprep.subr.bf16.mxu0 %v1864_v24 }
 0x85f   : > { %3230 = vmatprep.mubr.msk.bf16.mxu1 %vm398_vm3, %v1764_v4 }
 0x860   : > { %3231 = vmatmul.mubr.msk.bf16.vlgmr.msra.gmra.mrb[76].mxu1 %vm398_vm3, %v1765_v12  ;;  %2963 = vmatpush3.bf16.msra.mxu0 %v4097_v38  ;;  %v3361_v38 = vld [vmem:[%s4385_s6 + $0x1c] ss:$12 sps:$4 sm:$0xff]  }
 0x861   : > { %v3224_v31 = vpop.f32.mrb[64].mxu0  ;;  %2964 = vmatprep.subr.bf16.mxu0 %v1764_v4  ;;  %v3372_v4 = vld [vmem:[%s4385_s6 + $0x38] ss:$12 sps:$4 sm:$0xff]  }
 0x862   : > { %v1749_v40 = vpop.f32.mrb[65].mxu0 }
 0x863   : > { %v3225_v41 = vpop.f32.mrb[66].mxu0 }
 0x864   : > { %v1767_v52 = vpack.c.bf16 %v3225_v41, %v3224_v31  ;;  %v1752_v57 = vpop.f32.mrb[67].mxu0  ;;  %2965 = vmatpush3.bf16.msra.mxu0 %v4119_v43  ;;  %v3364_v43 = vld [vmem:[%s4385_s6 + $0x34] ss:$12 sps:$4 sm:$0xff]  }
 0x865   : > { %v1766_v45 = vpack.c.bf16 %v1752_v57, %v1749_v40  ;;  %2966 = vmatprep.subr.bf16.mxu0 %v1765_v12  ;;  %v3371_v12 = vld [vmem:[%s4385_s6 + $0x20] ss:$12 sps:$4 sm:$0xff]  }
 0x867   : > { %3234 = vmatprep.mubr.msk.bf16.mxu1 %vm398_vm3, %v1766_v45 }
 0x868   : > { %3235 = vmatmul.mubr.msk.bf16.gmra.mrb[80].mxu1 %vm398_vm3, %v1767_v52  ;;  %2967 = vmatpush3.bf16.msra.mxu0 %v4117_v42  ;;  %v3363_v42 = vld [vmem:[%s4385_s6 + $0x18] ss:$12 sps:$4 sm:$0xff]  }
 0x869   : > { %2968 = vmatprep.subr.bf16.mxu0 %v1766_v45  ;;  %3246 = vmatprep.mubr.msk.bf16.mxu1 %vm1993_vm8, %v3370_v48  ;;  %v3373_v45 = vld [vmem:[%s4385_s6 + $0x50] ss:$12 sps:$4 sm:$0xff]  }
 0x86c   : > { %2969 = vmatpush3.bf16.msra.mxu0 %v4129_v49 }
 0x86d   : > { %2970 = vmatprep.subr.bf16.mxu0 %v1767_v52 }
 0x870   : > { %2971 = vmatpush3.bf16.msra.mxu0 %v4127_v59  ;;  %v3369_v59 = vld [vmem:[%s4385_s6 + $0x48] ss:$12 sps:$4 sm:$0xff]  }
 0x871   : > { %3278 = vmatprep.subr.bf16.mxu0 %v4105_v39 }
 0x873   : > { %2039 = vmatmul.mubr.bf16.vlgmr.msra.gmra.mrb[68].mxu0 %v3358_v34 }
 0x874   : > { %2046 = vmatprep.mubr.bf16.mxu0 %v3361_v38  ;;  %3279 = vmatpush3.bf16.msra.mxu0 %v4105_v39 }
 0x875   : > { %3280 = vmatprep.subr.bf16.mxu0 %v4113_v13 }
 0x878   : > { %3281 = vmatpush3.bf16.msra.mxu0 %v4113_v13 }
 0x87b   : > { %2047 = vmatmul.mubr.bf16.gmra.mrb[72].mxu0 %v3363_v42 }
 0x87c   : > { %2054 = vmatprep.mubr.bf16.mxu0 %v3364_v43 }
 0x883   : > { %2055 = vmatmul.mubr.bf16.gmra.mrb[76].mxu0 %v3366_v20 }
 0x884   : > { %2062 = vmatprep.mubr.bf16.mxu0 %v3367_v46 }
 0x88b   : > { %2063 = vmatmul.mubr.bf16.gmra.mrb[80].mxu0 %v3369_v59 }
 0x88c   : > { %3282 = vmatprep.mubr.msk.bf16.mxu0 %vm398_vm3, %v4037_v3 }
 0x893   : > { %3283 = vmatmul.mubr.msk.bf16.vlgmr.msra.gmra.mrb[84].mxu0 %vm398_vm3, %v4077_v35 }
 0x933   : > { %v3232_v49 = vpop.f32.mrb[76].mxu1 }
 0x934   : > { %v1847_v50 = vmul.f32 2.0, %v3232_v49  ;;  %v1814_v61 = vpop.f32.mrb[77].mxu1 }
 0x935   : > { %v1845_v53 = vmul.f32 2.0, %v1814_v61  ;;  %v3233_v54 = vpop.f32.mrb[78].mxu1 }
 0x936   : > { %v1848_v55 = vmul.f32 2.0, %v3233_v54  ;;  %v1817_v58 = vpop.f32.mrb[79].mxu1  ;;  %v1855_v47 = vsub.f32 %v1847_v50, %v4047_v30 }
 0x937   : > { %v1846_v44 = vmul.f32 2.0, %v1817_v58  ;;  %v1853_v2 = vsub.f32 %v1845_v53, %v4021_v5 }
 0x938   : > { %v1856_v56 = vsub.f32 %v1848_v55, %v4064_v51 }
 0x939   : > { %v1854_v60 = vsub.f32 %v1846_v44, %v4028_v1 }
 0x93a   : > { %v1866_v15 = vpack.c.bf16 %v1856_v56, %v1855_v47 }
 0x93b   : > { %v3236_v25 = vpop.f32.mrb[80].mxu1  ;;  %v1865_v63 = vpack.c.bf16 %v1854_v60, %v1853_v2  ;;  %v1901_v60 = vpop.permute.xlu1 %1900 }
 0x93c   : > { %v1851_v0 = vmul.f32 2.0, %v3236_v25  ;;  %v1830_v62 = vpop.f32.mrb[81].mxu1 }
 0x93d   : > { %v1849_v8 = vmul.f32 2.0, %v1830_v62  ;;  %v3237_v11 = vpop.f32.mrb[82].mxu1  ;;  %3238 = vmatprep.subr.bf16.mxu1 %v1865_v63 }
 0x93e   : > { %v1852_v7 = vmul.f32 2.0, %v3237_v11  ;;  %v1833_v17 = vpop.f32.mrb[83].mxu1  ;;  %3239 = vmatpush3.bf16.msra.mxu1 %v1865_v63  ;;  %v1859_v22 = vsub.f32 %v1851_v0, %v4086_v36 }
 0x93f   : > { %v1850_v19 = vmul.f32 2.0, %v1833_v17  ;;  %3240 = vmatprep.subr.bf16.mxu1 %v1866_v15  ;;  %v1857_v6 = vsub.f32 %v1849_v8, %v4052_v32  ;;  %v1911_v25 = vpop.permute.xlu1 %1910 }
 0x940   : > { %v1860_v23 = vsub.f32 %v1852_v7, %v4091_v37 }
 0x941   : > { %v1858_v10 = vsub.f32 %v1850_v19, %v4057_v33 }
 0x942   : > { %3241 = vmatpush3.bf16.msra.mxu1 %v1866_v15  ;;  %v1868_v14 = vpack.c.bf16 %v1860_v23, %v1859_v22 }
 0x943   : > { %v1867_v18 = vpack.c.bf16 %v1858_v10, %v1857_v6  ;;  %v1921_v17 = vpop.permute.xlu1 %1920 }
 0x945   : > { %3242 = vmatprep.subr.bf16.mxu1 %v1867_v18 }
 0x946   : > { %v2972_v24 = vpop.f32.mrb[68].mxu0  ;;  %3243 = vmatpush3.bf16.msra.mxu1 %v1867_v18 }
 0x947   : > { %v2973_v26 = vpop.f32.mrb[69].mxu0  ;;  %3244 = vmatprep.subr.bf16.mxu1 %v1868_v14 }
 0x948   : > { %v2974_v27 = vadd.f32 %v2973_v26, %v2972_v24  ;;  %v2975_v28 = vpop.f32.mrb[70].mxu0 }
 0x949   : > { %v2976_v16 = vpop.f32.mrb[71].mxu0 }
 0x94a   : > { %v2977_v21 = vadd.f32 %v2976_v16, %v2975_v28  ;;  %3245 = vmatpush3.bf16.msra.mxu1 %v1868_v14 }
 0x94b   : > { %3254 = vmatprep.subr.bf16.mxu1 %v3999_v9 }
 0x94c   : > { %v2044_v23 = vadd.f32 %v2977_v21, %v1901_v60 }
 0x94d   : > { %3247 = vmatmul.mubr.msk.bf16.vlgmr.msra.gmra.mrb[84].mxu1 %vm1993_vm8, %v3371_v12 }
 0x94e   : > { %v2978_v31 = vpop.f32.mrb[72].mxu0  ;;  %3250 = vmatprep.mubr.msk.bf16.mxu1 %vm1993_vm8, %v3372_v4  ;;  %3255 = vmatpush3.bf16.msra.mxu1 %v3999_v9 }
 0x94f   : > { %v2979_v40 = vpop.f32.mrb[73].mxu0  ;;  %3256 = vmatprep.subr.bf16.mxu1 %v4006_v29 }
 0x950   : > { %v2980_v41 = vadd.f32 %v2979_v40, %v2978_v31  ;;  %v2981_v52 = vpop.f32.mrb[74].mxu0 }
 0x951   : > { %v2982_v57 = vpop.f32.mrb[75].mxu0 }
 0x952   : > { %v2983_v34 = vadd.f32 %v2982_v57, %v2981_v52  ;;  %3257 = vmatpush3.bf16.msra.mxu1 %v4006_v29 }
 0x953   : > { %3266 = vmatprep.subr.bf16.mxu1 %v3999_v9 }
 0x954   : > { %v2052_v7 = vadd.f32 %v2983_v34, %v1911_v25 }
 0x955   : > { %3251 = vmatmul.mubr.msk.bf16.gmra.mrb[88].mxu1 %vm1993_vm8, %v3373_v45 }
 0x956   : > { %v2984_v38 = vpop.f32.mrb[76].mxu0  ;;  %3258 = vmatprep.mubr.msk.bf16.mxu1 %vm398_vm3, %v4037_v3 }
 0x957   : > { %v2985_v42 = vpop.f32.mrb[77].mxu0 }
 0x958   : > { %v2986_v43 = vadd.f32 %v2985_v42, %v2984_v38  ;;  %v2987_v20 = vpop.f32.mrb[78].mxu0 }
 0x959   : > { %v2988_v46 = vpop.f32.mrb[79].mxu0 }
 0x95a   : > { %v2989_v59 = vadd.f32 %v2988_v46, %v2987_v20 }
 0x95c   : > { %v2060_v45 = vadd.f32 %v2989_v59, %v1921_v17 }
 0x95d   : > { %3259 = vmatmul.mubr.msk.bf16.vlgmr.msra.gmra.mrb[92].mxu1 %vm398_vm3, %v4077_v35 }
 0x95e   : > { %v2990_v48 = vpop.f32.mrb[80].mxu0  ;;  %3267 = vmatpush3.bf16.msra.mxu1 %v3999_v9  ;;  %v1896_v9 = vpop.permute.xlu0 %1895 }
 0x95f   : > { %v2991_v49 = vpop.f32.mrb[81].mxu0  ;;  %3268 = vmatprep.subr.bf16.mxu1 %v4006_v29  ;;  %v2041_v8 = vadd.f32 %v2974_v27, %v1896_v9  ;;  %v1931_v27 = vpop.permute.xlu1 %1930 }
 0x960   : > { %v2992_v50 = vadd.f32 %v2991_v49, %v2990_v48  ;;  %v2993_v61 = vpop.f32.mrb[82].mxu0 }
 0x961   : > { %v2994_v53 = vpop.f32.mrb[83].mxu0 }
 0x962   : > { %v2995_v54 = vadd.f32 %v2994_v53, %v2993_v61  ;;  %3269 = vmatpush3.bf16.msra.mxu1 %v4006_v29  ;;  %v1906_v15 = vpop.permute.xlu0 %1905 }
 0x963   : > { %3290 = vmatprep.subr.bf16.mxu1 %v4105_v39  ;;  %v2049_v63 = vadd.f32 %v2980_v41, %v1906_v15 }
 0x964   : > { %v2068_v21 = vadd.f32 %v2995_v54, %v1931_v27 }
 0x966   : > { %v3284_v55 = vpop.f32.mrb[84].mxu0  ;;  %v1916_v0 = vpop.permute.xlu0 %1915 }
 0x967   : > { %v2392_v58 = vpop.f32.mrb[85].mxu0  ;;  %v2057_v31 = vadd.f32 %v2986_v43, %v1916_v0 }
 0x968   : > { %v3285_v44 = vpop.f32.mrb[86].mxu0 }
 0x969   : > { %v4233_v47 = vpack.c.bf16 %v3285_v44, %v3284_v55  ;;  %v2395_v56 = vpop.f32.mrb[87].mxu0 }
 0x96a   : > { %v4235_v2 = vpack.c.bf16 %v2395_v56, %v2392_v58  ;;  %v1926_v28 = vpop.permute.xlu0 %1925 }
 0x96b   : > { %v2065_v12 = vadd.f32 %v2992_v50, %v1926_v28 }
 0xa20   : > { %v3248_v62 = vpop.f32.mrb[84].mxu1 }
 0xa21   : > { %v2114_v11 = vadd.f32 %v3248_v62, %v2049_v63  ;;  %v2105_v29 = vpop.f32.mrb[85].mxu1 }
 0xa22   : > { %v2106_v19 = vadd.f32 %v2105_v29, %v2041_v8  ;;  %v3249_v22 = vpop.f32.mrb[86].mxu1 }
 0xa23   : > { %v2856_v6 = vmul.f32 -1.442695, %v2114_v11  ;;  %v2117_v10 = vadd.f32 %v3249_v22, %v2052_v7  ;;  %v2108_v14 = vpop.f32.mrb[87].mxu1 }
 0xa24   : > { %v2854_v18 = vmul.f32 -1.442695, %v2106_v19  ;;  %v2109_v24 = vadd.f32 %v2108_v14, %v2044_v23 }
 0xa25   : > { %3422 = vpow2.f32 %v2856_v6  ;;  %v2857_v26 = vmul.f32 -1.442695, %v2117_v10 }
 0xa26   : > { %3424 = vpow2.f32 %v2854_v18  ;;  %v2855_v16 = vmul.f32 -1.442695, %v2109_v24 }
 0xa27   : > { %3426 = vpow2.f32 %v2857_v26 }
 0xa28   : > { %3428 = vpow2.f32 %v2855_v16  ;;  %v3252_v4 = vpop.f32.mrb[88].mxu1 }
 0xa29   : > { %v4237_v40 = vadd.f32 %v3252_v4, %v2065_v12  ;;  %v2121_v41 = vpop.f32.mrb[89].mxu1 }
 0xa2a   : > { %v4239_v52 = vadd.f32 %v2121_v41, %v2057_v31  ;;  %v3253_v57 = vpop.f32.mrb[90].mxu1 }
 0xa2b   : > { %v4241_v34 = vadd.f32 %v3253_v57, %v2068_v21  ;;  %v2124_v38 = vpop.f32.mrb[91].mxu1 }
 0xa2c   : > { %v4243_v42 = vadd.f32 %v2124_v38, %v2060_v45 }
 0xa2f   : > { %v3423_v20 = vpop.eup %3422 }
 0xa30   : > { %v3425_v46 = vpop.eup %3424  ;;  %v2162_v48 = vadd.f32 1.0, %v3423_v20  ;;  %v3260_v49 = vpop.f32.mrb[92].mxu1 }
 0xa31   : > { %v3427_v50 = vpop.eup %3426  ;;  %v2160_v61 = vadd.f32 1.0, %v3425_v46  ;;  %v2230_v43 = vpop.f32.mrb[93].mxu1 }
 0xa32   : > { %v3429_v53 = vpop.eup %3428  ;;  %3430 = vrcp.f32 %v2162_v48  ;;  %v2163_v55 = vadd.f32 1.0, %v3427_v50  ;;  %v3261_v54 = vpop.f32.mrb[94].mxu1  ;;  %v3376_v48 = vld [vmem:[%s4387_s8 + $0x4] ss:$12 sps:$4 sm:$0xff]  }
 0xa33   : > { %3432 = vrcp.f32 %v2160_v61  ;;  %v2161_v58 = vadd.f32 1.0, %v3429_v53  ;;  %v4245_v44 = vpack.c.bf16 %v3261_v54, %v3260_v49  ;;  %v2233_v59 = vpop.f32.mrb[95].mxu1  ;;  %v3377_v49 = vld [vmem:[%s4387_s8 + $0x8] ss:$12 sps:$4 sm:$0xff]  }
 0xa34   : > { %3434 = vrcp.f32 %v2163_v55  ;;  %v4247_v56 = vpack.c.bf16 %v2233_v59, %v2230_v43 }
 0xa35   : > { %3436 = vrcp.f32 %v2161_v58 }
 0xa3c   : > { %v3431_v9 = vpop.eup %3430 }
 0xa3d   : > { %v3433_v60 = vpop.eup %3432  ;;  %v4259_v8 = vmul.f32 %v3431_v9, %v4086_v36 }
 0xa3e   : > { %v3435_v15 = vpop.eup %3434  ;;  %v4253_v0 = vmul.f32 %v3433_v60, %v4052_v32 }
 0xa3f   : > { %v3437_v25 = vpop.eup %3436  ;;  %v4250_v63 = vmul.f32 %v3435_v15, %v4091_v37 }
 0xa40   : > { %v4256_v62 = vmul.f32 %v3437_v25, %v4057_v33 }
 0xa41   : > { %v4267_v29 = vpack.c.bf16 %v4250_v63, %v4259_v8 }
 0xa42   : > { %v4263_v11 = vpack.c.bf16 %v4256_v62, %v4253_v0 }
 0xa44   : > { %3262 = vmatprep.mubr.msk.bf16.mxu1 %vm398_vm3, %v4263_v11  ;;  %3286 = vmatprep.mubr.msk.bf16.mxu0 %vm398_vm3, %v4263_v11 }
 0xa45   : > { %3263 = vmatmul.mubr.msk.bf16.gmra.mrb[96].mxu1 %vm398_vm3, %v4267_v29  ;;  %3287 = vmatmul.mubr.msk.bf16.gmra.mrb[88].mxu0 %vm398_vm3, %v4267_v29 }
 0xa46   : > { %3270 = vmatprep.mubr.msk.bf16.mxu1 %vm398_vm3, %v4247_v56  ;;  %2628 = vmatprep.mubr.bf16.mxu0 %v3376_v48 }
 0xa4d   : > { %3271 = vmatmul.mubr.msk.bf16.vlgmr.msra.gmra.mrb[100].mxu1 %vm398_vm3, %v4245_v44 }
 0xa4e   : > { %3291 = vmatpush3.bf16.msra.mxu1 %v4105_v39 }
 0xa4f   : > { %3292 = vmatprep.subr.bf16.mxu1 %v4113_v13 }
 0xa52   : > { %3293 = vmatpush3.bf16.msra.mxu1 %v4113_v13 }
 0xb18   : > { %v3264_v7 = vpop.f32.mrb[96].mxu1  ;;  %v3288_v17 = vpop.f32.mrb[88].mxu0 }
 0xb19   : > { %v2246_v19 = vpop.f32.mrb[97].mxu1  ;;  %v2408_v22 = vpop.f32.mrb[89].mxu0 }
 0xb1a   : > { %v3265_v23 = vpop.f32.mrb[98].mxu1  ;;  %v3289_v6 = vpop.f32.mrb[90].mxu0 }
 0xb1b   : > { %v4284_v10 = vpack.c.bf16 %v3265_v23, %v3264_v7  ;;  %v4286_v14 = vpack.c.bf16 %v3289_v6, %v3288_v17  ;;  %v2249_v18 = vpop.f32.mrb[99].mxu1  ;;  %v2411_v24 = vpop.f32.mrb[91].mxu0 }
 0xb1c   : > { %v4288_v26 = vpack.c.bf16 %v2249_v18, %v2246_v19  ;;  %v4290_v28 = vpack.c.bf16 %v2411_v24, %v2408_v22 }
 0xb1e   : > { %3274 = vmatprep.mubr.msk.bf16.mxu1 %vm398_vm3, %v4288_v26 }
 0xb1f   : > { %3275 = vmatmul.mubr.msk.bf16.gmra.mrb[104].mxu1 %vm398_vm3, %v4284_v10 }
 0xb20   : > { %v3272_v39 = vpop.f32.mrb[100].mxu1  ;;  %3294 = vmatprep.mubr.msk.bf16.mxu1 %vm398_vm3, %v4235_v2 }
 0xb21   : > { %v2344_v13 = vmul.f32 2.0, %v3272_v39  ;;  %v2311_v16 = vpop.f32.mrb[101].mxu1 }
 0xb22   : > { %v2342_v12 = vmul.f32 2.0, %v2311_v16  ;;  %v3273_v27 = vpop.f32.mrb[102].mxu1 }
 0xb23   : > { %v2345_v4 = vmul.f32 2.0, %v3273_v27  ;;  %v2314_v31 = vpop.f32.mrb[103].mxu1  ;;  %v2352_v21 = vsub.f32 %v2344_v13, %v4047_v30 }
 0xb24   : > { %v2343_v41 = vmul.f32 2.0, %v2314_v31  ;;  %v2350_v45 = vsub.f32 %v2342_v12, %v4021_v5 }
 0xb25   : > { %v2353_v57 = vsub.f32 %v2345_v4, %v4064_v51 }
 0xb26   : > { %v2351_v38 = vsub.f32 %v2343_v41, %v4028_v1 }
 0xb27   : > { %3295 = vmatmul.mubr.msk.bf16.vlgmr.msra.gmra.mrb[108].mxu1 %vm398_vm3, %v4233_v47  ;;  %v2521_v20 = vpack.c.bf16 %v2353_v57, %v2352_v21 }
 0xb28   : > { %3298 = vmatprep.mubr.msk.bf16.mxu1 %vm398_vm3, %v4290_v28  ;;  %v2520_v46 = vpack.c.bf16 %v2351_v38, %v2350_v45 }
 0xb2a   : > { %3028 = vmatprep.subr.bf16.mxu0 %v2520_v46 }
 0xb2b   : > { %3029 = vmatpush3.bf16.msra.mxu0 %v4037_v3 }
 0xb2c   : > { %3030 = vmatprep.subr.bf16.mxu0 %v2521_v20  ;;  %v2543_v20 = vpop.permute.xlu0 %2542 }
 0xb2f   : > { %3299 = vmatmul.mubr.msk.bf16.gmra.mrb[112].mxu1 %vm398_vm3, %v4286_v14  ;;  %3031 = vmatpush3.bf16.msra.mxu0 %v4077_v35 }
 0xb30   : > { %3310 = vmatprep.mubr.msk.bf16.mxu1 %vm1993_vm8, %v3377_v49 }
 0xbf2   : > { %v3276_v50 = vpop.f32.mrb[104].mxu1 }
 0xbf3   : > { %v2348_v61 = vmul.f32 2.0, %v3276_v50  ;;  %v2327_v3 = vpop.f32.mrb[105].mxu1 }
 0xbf4   : > { %v2346_v43 = vmul.f32 2.0, %v2327_v3  ;;  %v3277_v53 = vpop.f32.mrb[106].mxu1 }
 0xbf5   : > { %v2349_v55 = vmul.f32 2.0, %v3277_v53  ;;  %v2330_v54 = vpop.f32.mrb[107].mxu1  ;;  %v2356_v35 = vsub.f32 %v2348_v61, %v4259_v8 }
 0xbf6   : > { %v2347_v58 = vmul.f32 2.0, %v2330_v54  ;;  %v2354_v9 = vsub.f32 %v2346_v43, %v4253_v0 }
 0xbf7   : > { %v2357_v59 = vsub.f32 %v2349_v55, %v4250_v63 }
 0xbf8   : > { %v2355_v60 = vsub.f32 %v2347_v58, %v4256_v62  ;;  %v2548_v58 = vpop.permute.xlu1 %2547 }
 0xbf9   : > { %v2523_v15 = vpack.c.bf16 %v2357_v59, %v2356_v35 }
 0xbfa   : > { %v3296_v25 = vpop.f32.mrb[108].mxu1  ;;  %v2522_v7 = vpack.c.bf16 %v2355_v60, %v2354_v9 }
 0xbfb   : > { %v2506_v17 = vmul.f32 2.0, %v3296_v25  ;;  %v2473_v19 = vpop.f32.mrb[109].mxu1 }
 0xbfc   : > { %v2504_v22 = vmul.f32 2.0, %v2473_v19  ;;  %v3297_v23 = vpop.f32.mrb[110].mxu1  ;;  %3032 = vmatprep.subr.bf16.mxu0 %v2522_v7 }
 0xbfd   : > { %v2507_v6 = vmul.f32 2.0, %v3297_v23  ;;  %v2476_v18 = vpop.f32.mrb[111].mxu1  ;;  %3033 = vmatpush3.bf16.msra.mxu0 %v4263_v11  ;;  %v2514_v39 = vsub.f32 %v2506_v17, %v4047_v30  ;;  %v2553_v23 = vpop.permute.xlu0 %2552 }
 0xbfe   : > { %v2505_v24 = vmul.f32 2.0, %v2476_v18  ;;  %3034 = vmatprep.subr.bf16.mxu0 %v2523_v15  ;;  %v2512_v16 = vsub.f32 %v2504_v22, %v4021_v5 }
 0xbff   : > { %v2515_v13 = vsub.f32 %v2507_v6, %v4064_v51 }
 0xc00   : > { %v2513_v12 = vsub.f32 %v2505_v24, %v4028_v1 }
 0xc01   : > { %3035 = vmatpush3.bf16.msra.mxu0 %v4267_v29  ;;  %v2525_v27 = vpack.c.bf16 %v2515_v13, %v2514_v39  ;;  %v2558_v39 = vpop.permute.xlu1 %2557 }
 0xc02   : > { %v3300_v4 = vpop.f32.mrb[112].mxu1  ;;  %3036 = vmatprep.subr.bf16.mxu0 %v4235_v2  ;;  %v2524_v31 = vpack.c.bf16 %v2513_v12, %v2512_v16 }
 0xc03   : > { %v2510_v41 = vmul.f32 2.0, %v3300_v4  ;;  %v2489_v21 = vpop.f32.mrb[113].mxu1 }
 0xc04   : > { %v2508_v11 = vmul.f32 2.0, %v2489_v21  ;;  %v3301_v57 = vpop.f32.mrb[114].mxu1  ;;  %3302 = vmatprep.subr.bf16.mxu1 %v2524_v31 }
 0xc05   : > { %v2511_v45 = vmul.f32 2.0, %v3301_v57  ;;  %v2492_v30 = vpop.f32.mrb[115].mxu1  ;;  %3037 = vmatpush3.bf16.msra.mxu0 %v4247_v56  ;;  %3303 = vmatpush3.bf16.msra.mxu1 %v2524_v31  ;;  %v2518_v1 = vsub.f32 %v2510_v41, %v4259_v8  ;;  %v2859_v8 = vmul.f32 -1.442695, %v4243_v42 }
 0xc06   : > { %v2509_v5 = vmul.f32 2.0, %v2492_v30  ;;  %3038 = vmatprep.subr.bf16.mxu0 %v4233_v47  ;;  %3304 = vmatprep.subr.bf16.mxu1 %v2525_v27  ;;  %v2516_v2 = vsub.f32 %v2508_v11, %v4253_v0  ;;  %v3374_v47 = vld [vmem:[%s4387_s8] ss:$12 sps:$4 sm:$0xff]   ;;  %v3381_v0 = vld [vmem:[%s4387_s8 + $0x18] ss:$12 sps:$4 sm:$0xff]  }
 0xc07   : > { %v2519_v51 = vsub.f32 %v2511_v45, %v4250_v63  ;;  %v3379_v63 = vld [vmem:[%s4387_s8 + $0x1c] ss:$12 sps:$4 sm:$0xff]  }
 0xc08   : > { %v2517_v29 = vsub.f32 %v2509_v5, %v4256_v62  ;;  %v2858_v62 = vmul.f32 -1.442695, %v4239_v52 }
 0xc09   : > { %3039 = vmatpush3.bf16.msra.mxu0 %v4245_v44  ;;  %3305 = vmatpush3.bf16.msra.mxu1 %v2525_v27  ;;  %v2527_v38 = vpack.c.bf16 %v2519_v51, %v2518_v1  ;;  %v3378_v44 = vld [vmem:[%s4387_s8 + $0x20] ss:$12 sps:$4 sm:$0xff]  }
 0xc0a   : > { %3040 = vmatprep.subr.bf16.mxu0 %v4290_v28  ;;  %v2526_v56 = vpack.c.bf16 %v2517_v29, %v2516_v2  ;;  %3438 = vpow2.f32 %v2858_v62 }
 0xc0b   : > { %3440 = vpow2.f32 %v2859_v8 }
 0xc0c   : > { %3306 = vmatprep.subr.bf16.mxu1 %v2526_v56 }
 0xc0d   : > { %3041 = vmatpush3.bf16.msra.mxu0 %v4288_v26  ;;  %3307 = vmatpush3.bf16.msra.mxu1 %v2526_v56 }
 0xc0e   : > { %3042 = vmatprep.subr.bf16.mxu0 %v4286_v14  ;;  %3308 = vmatprep.subr.bf16.mxu1 %v2527_v38  ;;  %v2861_v14 = vmul.f32 -1.442695, %v4241_v34 }
 0xc11   : > { %3043 = vmatpush3.bf16.msra.mxu0 %v4284_v10  ;;  %3309 = vmatpush3.bf16.msra.mxu1 %v2527_v38  ;;  %v2860_v10 = vmul.f32 -1.442695, %v4237_v40 }
 0xc13   : > { %3442 = vpow2.f32 %v2860_v10 }
 0xc14   : > { %2629 = vmatmul.mubr.bf16.vlgmr.msra.gmra.mrb[92].mxu0 %v3374_v47  ;;  %3311 = vmatmul.mubr.msk.bf16.vlgmr.msra.gmra.mrb[116].mxu1 %vm1993_vm8, %v3378_v44  ;;  %v3439_v26 = vpop.eup %3438  ;;  %3444 = vpow2.f32 %v2861_v14 }
 0xc15   : > { %2636 = vmatprep.mubr.bf16.mxu0 %v3379_v63  ;;  %v3441_v28 = vpop.eup %3440  ;;  %v2164_v46 = vadd.f32 1.0, %v3439_v26 }
 0xc16   : > { %v2165_v3 = vadd.f32 1.0, %v3441_v28 }
 0xc17   : > { %3446 = vrcp.f32 %v2164_v46 }
 0xc18   : > { %3448 = vrcp.f32 %v2165_v3 }
 0xc1c   : > { %2637 = vmatmul.mubr.bf16.gmra.mrb[96].mxu0 %v3381_v0 }
 0xc1d   : > { %v3443_v34 = vpop.eup %3442 }
 0xc1e   : > { %v3445_v9 = vpop.eup %3444  ;;  %v2166_v60 = vadd.f32 1.0, %v3443_v34 }
 0xc1f   : > { %v2167_v17 = vadd.f32 1.0, %v3445_v9 }
 0xc21   : > { %v3447_v13 = vpop.eup %3446 }
 0xc22   : > { %v3449_v27 = vpop.eup %3448  ;;  %v2702_v31 = vsub.f32 1.0, %v3447_v13  ;;  %v2698_v21 = vmul.f32 %v3447_v13, %v4052_v32 }
 0xc23   : > { %v2703_v57 = vsub.f32 1.0, %v3449_v27  ;;  %v2699_v30 = vmul.f32 %v3449_v27, %v4057_v33 }
 0xce7   : > { %v3044_v48 = vpop.f32.mrb[92].mxu0  ;;  %v3312_v49 = vpop.f32.mrb[116].mxu1 }
 0xce8   : > { %v3045_v50 = vpop.f32.mrb[93].mxu0  ;;  %v2679_v61 = vpop.f32.mrb[117].mxu1 }
 0xce9   : > { %v3046_v52 = vadd.f32 %v3045_v50, %v3044_v48  ;;  %v3047_v43 = vpop.f32.mrb[94].mxu0  ;;  %v3313_v42 = vpop.f32.mrb[118].mxu1 }
 0xcea   : > { %v3048_v53 = vpop.f32.mrb[95].mxu0  ;;  %v2682_v55 = vpop.f32.mrb[119].mxu1 }
 0xceb   : > { %v3049_v40 = vadd.f32 %v3048_v53, %v3047_v43  ;;  %v2631_v54 = vadd.f32 %v3046_v52, %v2543_v20 }
 0xced   : > { %v2680_v35 = vadd.f32 %v2679_v61, %v2631_v54  ;;  %v2634_v59 = vadd.f32 %v3049_v40, %v2548_v58 }
 0xcef   : > { %3450 = vtanh.f32 %v2680_v35  ;;  %v2683_v15 = vadd.f32 %v2682_v55, %v2634_v59  ;;  %v3050_v25 = vpop.f32.mrb[96].mxu0 }
 0xcf0   : > { %v3051_v7 = vpop.f32.mrb[97].mxu0 }
 0xcf1   : > { %3452 = vtanh.f32 %v2683_v15  ;;  %v3052_v19 = vadd.f32 %v3051_v7, %v3050_v25  ;;  %v3053_v22 = vpop.f32.mrb[98].mxu0 }
 0xcf2   : > { %v3054_v6 = vpop.f32.mrb[99].mxu0  ;;  %3454 = vrcp.f32 %v2166_v60 }
 0xcf3   : > { %v2639_v18 = vadd.f32 %v3052_v19, %v2553_v23  ;;  %v3055_v24 = vadd.f32 %v3054_v6, %v3053_v22  ;;  %3456 = vrcp.f32 %v2167_v17 }
 0xcf5   : > { %v2688_v16 = vadd.f32 %v3312_v49, %v2639_v18  ;;  %v2642_v12 = vadd.f32 %v3055_v24, %v2558_v39 }
 0xcf7   : > { %3458 = vtanh.f32 %v2688_v16  ;;  %v2691_v4 = vadd.f32 %v3313_v42, %v2642_v12 }
 0xcf9   : > { %v3451_v41 = vpop.eup %3450  ;;  %3460 = vtanh.f32 %v2691_v4 }
 0xcfa   : > { %v2706_v11 = vmul.f32 %v3451_v41, %v2702_v31 }
 0xcfb   : > { %v3453_v45 = vpop.eup %3452 }
 0xcfc   : > { %v2710_v5 = vadd.f32 %v2706_v11, %v2698_v21  ;;  %v2707_v1 = vmul.f32 %v3453_v45, %v2703_v57  ;;  %v3455_v51 = vpop.eup %3454 }
 0xcfd   : > { %v3457_v29 = vpop.eup %3456  ;;  %v2704_v38 = vsub.f32 1.0, %v3455_v51  ;;  %v2700_v56 = vmul.f32 %v3455_v51, %v4086_v36 }
 0xcfe   : > { %2886 = vst.msk [vmem:[%s4389_s10 + $0x20] sm:$0xff] %vm398_vm3, %v2710_v5  ;;  %v2711_v2 = vadd.f32 %v2707_v1, %v2699_v30  ;;  %v2705_v33 = vsub.f32 1.0, %v3457_v29  ;;  %v2701_v63 = vmul.f32 %v3457_v29, %v4091_v37 }
 0xd00   : > { %2887 = vst.msk [vmem:[%s4389_s10 + $0x28] sm:$0xff] %vm398_vm3, %v2711_v2 }
 0xd01   : > { %v3459_v32 = vpop.eup %3458 }
 0xd02   : > { %v2708_v47 = vmul.f32 %v3459_v32, %v2704_v38 }
 0xd03   : > { %v3461_v44 = vpop.eup %3460 }
 0xd04   : > { %v2712_v0 = vadd.f32 %v2708_v47, %v2700_v56  ;;  %v2709_v62 = vmul.f32 %v3461_v44, %v2705_v33 }
 0xd06   : > { %2888 = vst.msk [vmem:[%s4389_s10 + $0x30] sm:$0xff] %vm398_vm3, %v2712_v0  ;;  %v2713_v8 = vadd.f32 %v2709_v62, %v2701_v63 }
 0xd08   : > { %2889 = vst.msk [vmem:[%s4389_s10 + $0x38] sm:$0xff] %vm398_vm3, %v2713_v8 }
 0xd09 PF: > { %s20_s13 = sadd.s32 1, %s3472_s13  }
 0xd0a   : > { %p17_p5 = scmp.ge.s32.totalorder %s20_s13, 10  }
 0xd0c   :  { %19 = sbr.rel (!%p17_p5) target bundleno = 1 (0x1), region = 92 }

// kernel: dcrnn_forward.3
= control target key start
LH: loop header
LB: loop body
LE: loop exit
PB: predicated region body
PF: predicated region fallthrough
CT: control target
= control target key end

     0   :  { %s3719_s23 = smov 0   ;;  %s4543_s0 = inlined_call_operand.vmem [shape: f32[2,32,32], index: 0, kind: input, shape index: {}]   ;;  %s4544_s1 = inlined_call_operand.vmem [shape: bf16[2,32,32], index: 1, kind: input, shape index: {}]   ;;  %s4545_s2 = inlined_call_operand.vmem [shape: bf16[64,165], index: 2, kind: input, shape index: {}]   ;;  %s4546_s3 = inlined_call_operand.vmem [shape: f32[64,1], index: 3, kind: input, shape index: {}]   ;;  %s4547_s4 = inlined_call_operand.vmem [shape: bf16[32,165], index: 4, kind: input, shape index: {}]   ;;  %s4548_s5 = inlined_call_operand.vmem [shape: f32[32,1], index: 5, kind: input, shape index: {}]   ;;  %s4549_s6 = inlined_call_operand.vmem [shape: bf16[64,320], index: 6, kind: input, shape index: {}]   ;;  %s4550_s7 = inlined_call_operand.vmem [shape: f32[64,1], index: 7, kind: input, shape index: {}]   ;;  %s4551_s8 = inlined_call_operand.vmem [shape: bf16[32,320], index: 8, kind: input, shape index: {}]   ;;  %s4552_s9 = inlined_call_operand.vmem [shape: f32[32,1], index: 9, kind: input, shape index: {}]   ;;  %s4553_s10 = inlined_call_operand.vmem [shape: bf16[1,32], index: 10, kind: input, shape index: {}]   ;;  %s4554_s11 = inlined_call_operand.<no memory space> [shape: f32[1,1], index: 11, kind: input, shape index: {}]   ;;  %s4555_s12 = inlined_call_operand.vmem [shape: f32[4,1,32], index: 12, kind: output, shape index: {}]  }
   0x1   :  { %v17_v0 = vstv %s4554_s11 }
   0x2   :  { %18 = vst [vmem:[#allocation4] sm:$0x1] %v17_v0 }
   0x3 LB: > { %s2914_s24 = sadd.s32 4294967295, %s3644_s23   ;;  %p2917_p0 = scmp.ge.s32.totalorder %s3644_s23, 1  ;;  %s3644_s23 = sphi %s3719_s23, %s24_s23  }
   0x4   : > { %p354_p1 = scmp.lt.s32.totalorder %s3644_s23, 5 }
   0x6   : > { %p355_p2 = pnand %p2917_p0, %p354_p1 }
   0x7   : > { %p389_p3 = scmp.lt.s32.totalorder (!%p355_p2), %s2914_s24, 3  ;;  %p2918_p4 = scmp.ne.s32.totalorder (!%p355_p2), %s2914_s24, 0 }
   0x8   : > { %358 = sbr.rel (%p355_p2) target bundleno = 3566 (0xdee), region = 68 }
   0xf   : > { %s3727_s25 = scalar_select %p389_p3, %s2914_s24, 3 }
  0x10   : > { %396 = sbr.rel (%p2918_p4) target bundleno = 23 (0x17), region = 72  ;;  %v397_v1 = vld [vmem:[%s4543_s0] sm:$0xff] (!%p2918_p4)  ;;  %vm405_vm0 = vcmask (!%p2918_p4), 261120   ;;  %v398_v2 = vld [vmem:[%s4543_s0 + $0x8] sm:$0xff] (!%p2918_p4)  ;;  %v399_v3 = vld [vmem:[%s4543_s0 + $0x10] sm:$0xff] (!%p2918_p4)  ;;  %vm414_vm1 = vcmask (!%p2918_p4), 253952  }
  0x11   : > { %s391_s27 = scalar_lea.vmem %s4555_s12, %s3727_s25  ;;  %406 = vst.msk [vmem:[#allocation2] sm:$0xff] (!%p2918_p4), %vm405_vm0, %v397_v1  ;;  %407 = vst.msk [vmem:[#allocation2 + $0x8] sm:$0xff] (!%p2918_p4), %vm405_vm0, %v398_v2  ;;  %v400_v4 = vld [vmem:[%s4543_s0 + $0x18] sm:$0xff] (!%p2918_p4)  ;;  %v401_v5 = vld [vmem:[%s4543_s0 + $0x20] sm:$0xff] (!%p2918_p4)  ;;  %v3646_v7 = vmov (!%p2918_p4), 0.0  }
  0x12   : > { %408 = vst.msk [vmem:[#allocation2 + $0x10] sm:$0xff] (!%p2918_p4), %vm405_vm0, %v399_v3  ;;  %v402_v6 = vld [vmem:[%s4543_s0 + $0x28] sm:$0xff] (!%p2918_p4)  ;;  %409 = vst.msk [vmem:[#allocation2 + $0x18] sm:$0xff] (!%p2918_p4), %vm405_vm0, %v400_v4  ;;  %v403_v8 = vld [vmem:[%s4543_s0 + $0x30] sm:$0xff] (!%p2918_p4) }
  0x13   : > { %415 = vst.msk [vmem:[#allocation3] sm:$0x1] (!%p2918_p4), %vm414_vm1, %v3646_v7  ;;  %v404_v9 = vld [vmem:[%s4543_s0 + $0x38] sm:$0xff] (!%p2918_p4) }
  0x14   : > { %410 = vst.msk [vmem:[#allocation2 + $0x20] sm:$0xff] (!%p2918_p4), %vm405_vm0, %v401_v5  ;;  %411 = vst.msk [vmem:[#allocation2 + $0x28] sm:$0xff] (!%p2918_p4), %vm405_vm0, %v402_v6 }
  0x15   : > { %412 = vst.msk [vmem:[#allocation2 + $0x30] sm:$0xff] (!%p2918_p4), %vm405_vm0, %v403_v8  ;;  %413 = vst.msk [vmem:[#allocation2 + $0x38] sm:$0xff] (!%p2918_p4), %vm405_vm0, %v404_v9 }
  0x17 PF: > { %v3768_v10 = vld [vmem:[%s4544_s1] sm:$0xff]   ;;  %v3647_v11 = vmov 0.0   ;;  %v3774_v12 = vld [vmem:[%s4544_s1 + $0x8] sm:$0xff]   ;;  %vm3648_vm2 = vmmov 0   ;;  %vm425_vm3 = vcmask 1040384   ;;  %v3800_v20 = vld [vmem:[%s4544_s1 + $0x10] sm:$0xff]  }
  0x18   : > { %3225 = vmatprep.subr.bf16.mxu0 %v3647_v11  ;;  %3485 = vmatprep.subr.bf16.mxu1 %v3647_v11  ;;  %v3782_v14 = vld [vmem:[#allocation2] sm:$0xff]  ;;  %v3784_v15 = vld [vmem:[#allocation2 + $0x8] sm:$0xff]  ;;  %vm458_vm4 = vcmask 261120   ;;  %v3823_v27 = vld [vmem:[%s4544_s1 + $0x18] sm:$0xff]   ;;  %v3649_v28 = vmov 0   ;;  %vm797_vm5 = vcmask 1042432  }
  0x19   : > { %3226 = vmatpush3.bf16.msra.mxu0 %v3768_v10  ;;  %3229 = vmatprep.mubr.msk.bf16.mxu0 %vm3648_vm2, %v3647_v11  ;;  %v426_v16 = vrot.slane %v3782_v14, 7  ;;  %v427_v17 = vrot.slane %v3784_v15, 7  ;;  %v3790_v18 = vld [vmem:[#allocation2 + $0x10] sm:$0xff]  ;;  %v3792_v19 = vld [vmem:[#allocation2 + $0x18] sm:$0xff]  ;;  %vm937_vm6 = vcmask 302080   ;;  %vm777_vm7 = vcmask 1041408  }
  0x1a   : > { %v3780_v13 = vld [vmem:[#allocation3] sm:$0x1]  ;;  %3227 = vmatprep.subr.bf16.mxu0 %v3647_v11  ;;  %3487 = vmatpush3.bf16.msra.mxu1 %v3768_v10  ;;  %v3810_v23 = vrot.slane %v3792_v19, 7  ;;  %v429_v25 = vrot.slane %v3790_v18, 7  ;;  %vm817_vm8 = vcmask 1043456   ;;  %vm2095_vm9 = vcmask 523264  }
  0x1b   : > { %3486 = vmatprep.subr.bf16.mxu1 %v3647_v11  ;;  %3237 = vmatprep.mubr.msk.bf16.mxu1 %vm3648_vm2, %v3647_v11  ;;  %v3803_v21 = vsel %vm425_vm3, %v426_v16, %v427_v17  ;;  %v3807_v22 = vsel %vm425_vm3, %v3780_v13, %v426_v16  ;;  %vm2876_vm10 = vcmask 253952  }
  0x1c   : > { %v443_v24 = vpack.c.bf16 %v3803_v21, %v3807_v22  ;;  %v445_v26 = vpack.c.bf16 %v3810_v23, %v3810_v23  ;;  %3502 = vset.pattern.permute.xlu0 %v3649_v28  ;;  %3503 = vset.pattern.permute.xlu1 %v3649_v28  ;;  %v3832_v29 = vsel %vm425_vm3, %v427_v17, %v429_v25 }
  0x1d   : > { %3228 = vmatpush3.bf16.msra.mxu0 %v3774_v12  ;;  %v3836_v30 = vsel %vm425_vm3, %v429_v25, %v3810_v23 }
  0x1e   : > { %3488 = vmatpush3.bf16.msra.mxu1 %v3774_v12  ;;  %3257 = vmatprep.subr.bf16.mxu0 %v3647_v11  ;;  %v444_v31 = vpack.c.bf16 %v3836_v30, %v3832_v29 }
  0x1f   : > { %3241 = vmatprep.subr.bf16.mxu1 %v3647_v11 }
  0x20   : > { %3230 = vmatmul.mubr.msk.bf16.vlgmr.msra.gmra.mrb[0].mxu0 %vm458_vm4, %v443_v24 }
  0x21   : > { %3233 = vmatprep.mubr.msk.bf16.mxu0 %vm3648_vm2, %v3647_v11  ;;  %3258 = vmatpush3.bf16.msra.mxu0 %v3800_v20 }
  0x22   : > { %3238 = vmatmul.mubr.msk.bf16.vlgmr.msra.gmra.mrb[0].mxu1 %vm458_vm4, %v445_v26  ;;  %3259 = vmatprep.subr.bf16.mxu0 %v3647_v11 }
  0x23   : > { %3242 = vmatpush3.bf16.msra.mxu1 %v3768_v10  ;;  %3245 = vmatprep.mubr.msk.bf16.mxu1 %vm3648_vm2, %v3647_v11 }
  0x24   : > { %3243 = vmatprep.subr.bf16.mxu1 %v3647_v11 }
  0x25   : > { %3260 = vmatpush3.bf16.msra.mxu0 %v3823_v27 }
  0x26   : > { %955 = vmatprep.subr.bf16.mxu0 %v3649_v28 }
  0x27   : > { %3244 = vmatpush3.bf16.msra.mxu1 %v3774_v12 }
  0x28   : > { %3234 = vmatmul.mubr.msk.bf16.gmra.mrb[4].mxu0 %vm458_vm4, %v444_v31  ;;  %3273 = vmatprep.subr.bf16.mxu1 %v3647_v11 }
  0x29   : > { %3261 = vmatprep.mubr.msk.bf16.mxu0 %vm3648_vm2, %v3647_v11 }
  0x30   : > { %3262 = vmatmul.mubr.msk.bf16.vlgmr.msra.gmra.mrb[8].mxu0 %vm458_vm4, %v443_v24 }
  0x31   : > { %3265 = vmatprep.mubr.msk.bf16.mxu0 %vm3648_vm2, %v3647_v11  ;;  %956 = vmatpush1.bf16.msra.mxu0 %v443_v24 }
  0x32   : > { %957 = vmatprep.subr.bf16.mxu0 %v3649_v28 }
  0x35   : > { %958 = vmatpush1.bf16.msra.mxu0 %v444_v31 }
  0x36   : > { %959 = vmatprep.subr.bf16.mxu0 %v3649_v28 }
  0x38   : > { %3266 = vmatmul.mubr.msk.bf16.gmra.mrb[12].mxu0 %vm458_vm4, %v444_v31 }
  0x39   : > { %3269 = vmatprep.mubr.msk.bf16.mxu0 %vm3648_vm2, %v3647_v11 }
  0x40   : > { %3270 = vmatmul.mubr.msk.bf16.gmra.mrb[16].mxu0 %vm458_vm4, %v445_v26 }
  0xf3   : > { %v502_v32 = vpop.f32.mrb[0].mxu0 }
  0xf4   : > { %v758_v33 = vrot.slane %v502_v32, 7  ;;  %v3231_v34 = vpop.f32.mrb[1].mxu0 }
  0xf5   : > { %v505_v35 = vpop.f32.mrb[2].mxu0  ;;  %v518_v36 = vpop.f32.mrb[0].mxu1 }
  0xf6   : > { %v524_v37 = vpack.c.bf16 %v505_v35, %v502_v32  ;;  %v759_v38 = vrot.slane %v505_v35, 7  ;;  %v3232_v39 = vpop.f32.mrb[3].mxu0  ;;  %v3239_v40 = vpop.f32.mrb[1].mxu1  ;;  %v832_v42 = vsel %vm425_vm3, %v3810_v23, %v758_v33  ;;  %v765_v49 = vrot.slane %v518_v36, 7 }
  0xf7   : > { %v521_v41 = vpop.f32.mrb[2].mxu1  ;;  %v526_v59 = vpack.c.bf16 %v518_v36, %v518_v36  ;;  %v3510_v36 = vld [vmem:[%s4545_s2 + $0x4] ss:$8 sps:$4 sm:$0xff]   ;;  %v856_v40 = vld [vmem:[%s4546_s3 + $0x18] sm:$0xff] }
  0xf8   : > { %v760_v43 = vsel %vm425_vm3, %v758_v33, %v759_v38  ;;  %3246 = vmatmul.mubr.msk.bf16.vlgmr.msra.gmra.mrb[4].mxu1 %vm458_vm4, %v524_v37  ;;  %v3240_v44 = vpop.f32.mrb[3].mxu1  ;;  %2947 = vmatprep.mubr.msk.bf16.mxu0 %vm937_vm6, %v3510_v36  ;;  %v853_v37 = vld [vmem:[%s4546_s3] sm:$0xff]  ;;  %v854_v39 = vld [vmem:[%s4546_s3 + $0x8] sm:$0xff] }
  0xf9   : > { %v836_v45 = vpack.c.bf16 %v760_v43, %v832_v42  ;;  %3274 = vmatpush3.bf16.msra.mxu1 %v3800_v20  ;;  %3249 = vmatprep.mubr.msk.bf16.mxu1 %vm3648_vm2, %v3647_v11  ;;  %v857_v41 = vld [vmem:[%s4546_s3 + $0x20] sm:$0xff]  ;;  %v858_v42 = vld [vmem:[%s4546_s3 + $0x28] sm:$0xff]  ;;  %v859_v43 = vld [vmem:[%s4546_s3 + $0x30] sm:$0xff] }
  0xfa   : > { %3275 = vmatprep.subr.bf16.mxu1 %v3647_v11  ;;  %863 = vperm.xlu0 %3502, %v853_v37   ;;  %v860_v44 = vld [vmem:[%s4546_s3 + $0x38] sm:$0xff] }
  0xfb   : > { %v510_v46 = vpop.f32.mrb[4].mxu0  ;;  %960 = vmatpush1.bf16.msra.mxu0 %v836_v45  ;;  %v1462_v45 = vld [vmem:[%s4548_s5] sm:$0xff] }
  0xfc   : > { %v761_v47 = vrot.slane %v510_v46, 7  ;;  %v3235_v48 = vpop.f32.mrb[5].mxu0  ;;  %961 = vmatprep.subr.bf16.mxu0 %v3649_v28 }
  0xfd   : > { %v513_v50 = vpop.f32.mrb[6].mxu0  ;;  %3276 = vmatpush3.bf16.msra.mxu1 %v3823_v27  ;;  %v1465_v48 = vld [vmem:[%s4548_s5 + $0x18] sm:$0xff] }
  0xfe   : > { %v762_v51 = vsel %vm425_vm3, %v759_v38, %v761_v47  ;;  %v525_v52 = vpack.c.bf16 %v513_v50, %v510_v46  ;;  %v763_v53 = vrot.slane %v513_v50, 7  ;;  %v3236_v54 = vpop.f32.mrb[7].mxu0  ;;  %3289 = vmatprep.subr.bf16.mxu1 %v3647_v11  ;;  %v855_v38 = vld [vmem:[%s4546_s3 + $0x10] sm:$0xff]  ;;  %868 = vperm.xlu0 %3502, %v854_v39   ;;  %v1463_v46 = vld [vmem:[%s4548_s5 + $0x8] sm:$0xff] }
  0xff   : > { %873 = vperm.xlu1 %3503, %v855_v38   ;;  %v1988_v50 = vld [vmem:[%s4550_s7 + $0x8] sm:$0xff] }
 0x100   : > { %v764_v55 = vsel %vm425_vm3, %v761_v47, %v763_v53  ;;  %v3877_v56 = vsel %vm425_vm3, %v763_v53, %v765_v49  ;;  %3250 = vmatmul.mubr.msk.bf16.gmra.mrb[8].mxu1 %vm458_vm4, %v525_v52  ;;  %v1464_v47 = vld [vmem:[%s4548_s5 + $0x10] sm:$0xff]  ;;  %v1987_v49 = vld [vmem:[%s4550_s7] sm:$0xff]  ;;  %v1990_v52 = vld [vmem:[%s4550_s7 + $0x18] sm:$0xff] }
 0x101   : > { %v837_v57 = vpack.c.bf16 %v764_v55, %v762_v51  ;;  %3253 = vmatprep.mubr.msk.bf16.mxu1 %vm3648_vm2, %v3647_v11  ;;  %v1989_v51 = vld [vmem:[%s4550_s7 + $0x10] sm:$0xff]  ;;  %v1991_v53 = vld [vmem:[%s4550_s7 + $0x20] sm:$0xff]  ;;  %v1992_v54 = vld [vmem:[%s4550_s7 + $0x28] sm:$0xff] }
 0x102   : > { %883 = vperm.xlu0 %3502, %v857_v41   ;;  %v1993_v55 = vld [vmem:[%s4550_s7 + $0x30] sm:$0xff] }
 0x103   : > { %962 = vmatpush1.bf16.msra.mxu0 %v837_v57  ;;  %v3882_v58 = vpop.f32.mrb[8].mxu0  ;;  %878 = vperm.xlu1 %3503, %v856_v40   ;;  %v1994_v57 = vld [vmem:[%s4550_s7 + $0x38] sm:$0xff] }
 0x104   : > { %v798_v60 = vrot.slane %v3882_v58, 5  ;;  %v3263_v61 = vpop.f32.mrb[9].mxu0  ;;  %963 = vmatprep.subr.bf16.mxu0 %v3649_v28 }
 0x105   : > { %v656_v62 = vpop.f32.mrb[10].mxu0  ;;  %v2639_v61 = vld [vmem:[%s4552_s9 + $0x8] sm:$0xff] }
 0x106   : > { %v675_v63 = vpack.c.bf16 %v656_v62, %v3882_v58  ;;  %v799_v0 = vrot.slane %v656_v62, 5  ;;  %v3264_v1 = vpop.f32.mrb[11].mxu0  ;;  %893 = vperm.xlu0 %3502, %v859_v43   ;;  %v2640_v62 = vld [vmem:[%s4552_s9 + $0x10] sm:$0xff] }
 0x107   : > { %888 = vperm.xlu1 %3503, %v858_v42  }
 0x108   : > { %3254 = vmatmul.mubr.msk.bf16.gmra.mrb[12].mxu1 %vm458_vm4, %v526_v59  ;;  %v3891_v2 = vsel %vm797_vm5, %v798_v60, %v799_v0  ;;  %v2638_v59 = vld [vmem:[%s4552_s9] sm:$0xff] }
 0x109   : > { %3277 = vmatprep.mubr.msk.bf16.mxu1 %vm3648_vm2, %v3647_v11 }
 0x10a   : > { %1468 = vperm.xlu0 %3502, %v1462_v45  }
 0x10b   : > { %v661_v3 = vpop.f32.mrb[12].mxu0  ;;  %898 = vperm.xlu1 %3503, %v860_v44  }
 0x10c   : > { %v801_v4 = vrot.slane %v661_v3, 5  ;;  %v3267_v5 = vpop.f32.mrb[13].mxu0 }
 0x10d   : > { %v664_v6 = vpop.f32.mrb[14].mxu0 }
 0x10e   : > { %v3896_v7 = vsel %vm797_vm5, %v799_v0, %v801_v4  ;;  %v676_v8 = vpack.c.bf16 %v664_v6, %v661_v3  ;;  %v803_v9 = vrot.slane %v664_v6, 5  ;;  %v3268_v16 = vpop.f32.mrb[15].mxu0  ;;  %1478 = vperm.xlu0 %3502, %v1464_v47   ;;  %v2823_v0 = vld [vmem:[#allocation4] sm:$0x1] }
 0x10f   : > { %1473 = vperm.xlu1 %3503, %v1463_v46  }
 0x110   : > { %v3899_v17 = vsel %vm797_vm5, %v801_v4, %v803_v9  ;;  %3278 = vmatmul.mubr.msk.bf16.vlgmr.msra.gmra.mrb[16].mxu1 %vm458_vm4, %v675_v63  ;;  %v2641_v63 = vld [vmem:[%s4552_s9 + $0x18] sm:$0xff] }
 0x111   : > { %v841_v24 = vpack.c.bf16 %v3899_v17, %v3896_v7  ;;  %3281 = vmatprep.mubr.msk.bf16.mxu1 %vm3648_vm2, %v3647_v11  ;;  %3290 = vmatpush3.bf16.msra.mxu1 %v3768_v10 }
 0x112   : > { %3291 = vmatprep.subr.bf16.mxu1 %v3647_v11  ;;  %1997 = vperm.xlu0 %3502, %v1987_v49  }
 0x113   : > { %v669_v25 = vpop.f32.mrb[16].mxu0  ;;  %1483 = vperm.xlu1 %3503, %v1465_v48  }
 0x114   : > { %v805_v26 = vrot.slane %v669_v25, 5  ;;  %v3271_v31 = vpop.f32.mrb[17].mxu0  ;;  %v677_v35 = vpack.c.bf16 %v669_v25, %v669_v25 }
 0x115   : > { %v672_v32 = vpop.f32.mrb[18].mxu0  ;;  %3292 = vmatpush3.bf16.msra.mxu1 %v3774_v12 }
 0x116   : > { %v3910_v33 = vsel %vm797_vm5, %v803_v9, %v805_v26  ;;  %v3272_v34 = vpop.f32.mrb[19].mxu0  ;;  %3305 = vmatprep.subr.bf16.mxu1 %v3647_v11  ;;  %2007 = vperm.xlu0 %3502, %v1989_v51  }
 0x117   : > { %2002 = vperm.xlu1 %3503, %v1988_v50  }
 0x118   : > { %3282 = vmatmul.mubr.msk.bf16.gmra.mrb[20].mxu1 %vm458_vm4, %v676_v8 }
 0x119   : > { %3285 = vmatprep.mubr.msk.bf16.mxu1 %vm3648_vm2, %v3647_v11 }
 0x11a   : > { %2017 = vperm.xlu0 %3502, %v1991_v53  }
 0x11b   : > { %2012 = vperm.xlu1 %3503, %v1990_v52  }
 0x11e   : > { %2027 = vperm.xlu0 %3502, %v1993_v55  }
 0x11f   : > { %2022 = vperm.xlu1 %3503, %v1992_v54  }
 0x120   : > { %3286 = vmatmul.mubr.msk.bf16.gmra.mrb[24].mxu1 %vm458_vm4, %v677_v35 }
 0x121   : > { %3293 = vmatprep.mubr.msk.bf16.mxu1 %vm3648_vm2, %v3647_v11 }
 0x122   : > { %2644 = vperm.xlu0 %3502, %v2638_v59  }
 0x123   : > { %2032 = vperm.xlu1 %3503, %v1994_v57  }
 0x126   : > { %2654 = vperm.xlu0 %3502, %v2640_v62  }
 0x127   : > { %2649 = vperm.xlu1 %3503, %v2639_v61  }
 0x12a   : > { %2826 = vperm.xlu0 %3502, %v2823_v0  }
 0x12b   : > { %2659 = vperm.xlu1 %3503, %v2641_v63  }
 0x1cb   : > { %v570_v1 = vpop.f32.mrb[4].mxu1 }
 0x1cc   : > { %v592_v3 = vmul.f32 2.0, %v570_v1  ;;  %v3247_v4 = vpop.f32.mrb[5].mxu1 }
 0x1cd   : > { %v573_v5 = vpop.f32.mrb[6].mxu1 }
 0x1ce   : > { %v597_v6 = vsub.f32 %v592_v3, %v3807_v22  ;;  %v593_v8 = vmul.f32 2.0, %v573_v5  ;;  %v3248_v9 = vpop.f32.mrb[7].mxu1 }
 0x1d0   : > { %v778_v16 = vrot.slane %v597_v6, 6  ;;  %v598_v25 = vsub.f32 %v593_v8, %v3803_v21 }
 0x1d2   : > { %v833_v26 = vsel %vm777_vm7, %v3877_v56, %v778_v16  ;;  %v779_v31 = vrot.slane %v598_v25, 6 }
 0x1d3   : > { %v578_v32 = vpop.f32.mrb[8].mxu1 }
 0x1d4   : > { %v780_v34 = vsel %vm777_vm7, %v778_v16, %v779_v31  ;;  %v594_v35 = vmul.f32 2.0, %v578_v32  ;;  %v3251_v36 = vpop.f32.mrb[9].mxu1 }
 0x1d5   : > { %v581_v37 = vpop.f32.mrb[10].mxu1  ;;  %v838_v38 = vpack.c.bf16 %v780_v34, %v833_v26 }
 0x1d6   : > { %v599_v39 = vsub.f32 %v594_v35, %v3832_v29  ;;  %v595_v40 = vmul.f32 2.0, %v581_v37  ;;  %v3252_v41 = vpop.f32.mrb[11].mxu1 }
 0x1d7   : > { %964 = vmatpush1.bf16.msra.mxu0 %v838_v38 }
 0x1d8   : > { %v781_v42 = vrot.slane %v599_v39, 6  ;;  %v600_v43 = vsub.f32 %v595_v40, %v3836_v30  ;;  %965 = vmatprep.subr.bf16.mxu0 %v3649_v28  ;;  %v3650_v39 = vmov 65535  }
 0x1d9   : > { %v950_v40 = vsel %vm777_vm7, 4294967295, %v3650_v39 }
 0x1da   : > { %v782_v56 = vsel %vm777_vm7, %v779_v31, %v781_v42  ;;  %v783_v44 = vrot.slane %v600_v43, 6 }
 0x1db   : > { %v586_v45 = vpop.f32.mrb[12].mxu1 }
 0x1dc   : > { %v784_v46 = vsel %vm777_vm7, %v781_v42, %v783_v44  ;;  %v596_v47 = vmul.f32 2.0, %v586_v45  ;;  %v3255_v48 = vpop.f32.mrb[13].mxu1  ;;  %v4032_v42 = vsel %vm797_vm5, %v950_v40, 0  ;;  %v3513_v45 = vld [vmem:[%s4545_s2 + $0x10] ss:$8 sps:$4 sm:$0xff]  }
 0x1dd   : > { %v589_v49 = vpop.f32.mrb[14].mxu1  ;;  %v839_v50 = vpack.c.bf16 %v784_v46, %v782_v56  ;;  %v3514_v46 = vld [vmem:[%s4545_s2 + $0x24] ss:$8 sps:$4 sm:$0xff]   ;;  %v3517_v48 = vld [vmem:[%s4545_s2 + $0x34] ss:$8 sps:$4 sm:$0xff]  }
 0x1de   : > { %v601_v51 = vsub.f32 %v596_v47, %v3810_v23  ;;  %v3256_v52 = vpop.f32.mrb[15].mxu1  ;;  %v3516_v47 = vld [vmem:[%s4545_s2 + $0x20] ss:$8 sps:$4 sm:$0xff]   ;;  %v3519_v49 = vld [vmem:[%s4545_s2 + $0x30] ss:$8 sps:$4 sm:$0xff]  }
 0x1df   : > { %966 = vmatpush1.bf16.msra.mxu0 %v839_v50  ;;  %v864_v50 = vpop.permute.xlu0 %863 }
 0x1e0   : > { %v785_v53 = vrot.slane %v601_v51, 6  ;;  %967 = vmatprep.subr.bf16.mxu0 %v3649_v28 }
 0x1e2   : > { %v786_v54 = vsel %vm777_vm7, %v783_v44, %v785_v53  ;;  %v3511_v44 = vld [vmem:[%s4545_s2 + $0x14] ss:$8 sps:$4 sm:$0xff]  }
 0x1e3   : > { %v721_v55 = vpop.f32.mrb[16].mxu1  ;;  %v834_v57 = vsel %vm797_vm5, %v786_v54, %v798_v60  ;;  %v869_v54 = vpop.permute.xlu0 %868 }
 0x1e4   : > { %v743_v59 = vmul.f32 2.0, %v721_v55  ;;  %v3279_v61 = vpop.f32.mrb[17].mxu1  ;;  %v840_v62 = vpack.c.bf16 %v3891_v2, %v834_v57 }
 0x1e5   : > { %v724_v63 = vpop.f32.mrb[18].mxu1 }
 0x1e6   : > { %v748_v0 = vsub.f32 %v743_v59, %v3807_v22  ;;  %v744_v1 = vmul.f32 2.0, %v724_v63  ;;  %v3280_v3 = vpop.f32.mrb[19].mxu1  ;;  %968 = vmatpush1.bf16.msra.mxu0 %v840_v62  ;;  %v874_v62 = vpop.permute.xlu1 %873 }
 0x1e7   : > { %969 = vmatprep.subr.bf16.mxu0 %v3649_v28 }
 0x1e8   : > { %v818_v4 = vrot.slane %v748_v0, 4  ;;  %v749_v5 = vsub.f32 %v744_v1, %v3803_v21 }
 0x1ea   : > { %v835_v58 = vsel %vm817_vm8, %v3910_v33, %v818_v4  ;;  %v819_v60 = vrot.slane %v749_v5, 4  ;;  %970 = vmatpush1.bf16.msra.mxu0 %v841_v24 }
 0x1eb   : > { %v729_v2 = vpop.f32.mrb[20].mxu1  ;;  %971 = vmatprep.subr.bf16.mxu0 %v3649_v28 }
 0x1ec   : > { %v820_v22 = vsel %vm817_vm8, %v818_v4, %v819_v60  ;;  %v745_v6 = vmul.f32 2.0, %v729_v2  ;;  %v3283_v8 = vpop.f32.mrb[21].mxu1  ;;  %v879_v4 = vpop.permute.xlu1 %878 }
 0x1ed   : > { %v732_v9 = vpop.f32.mrb[22].mxu1  ;;  %v842_v16 = vpack.c.bf16 %v820_v22, %v835_v58 }
 0x1ee   : > { %v750_v25 = vsub.f32 %v745_v6, %v3832_v29  ;;  %v746_v21 = vmul.f32 2.0, %v732_v9  ;;  %v3284_v26 = vpop.f32.mrb[23].mxu1 }
 0x1ef   : > { %972 = vmatpush1.bf16.msra.mxu0 %v842_v16 }
 0x1f0   : > { %v821_v33 = vrot.slane %v750_v25, 4  ;;  %v751_v31 = vsub.f32 %v746_v21, %v3836_v30  ;;  %973 = vmatprep.subr.bf16.mxu0 %v3649_v28 }
 0x1f2   : > { %v822_v7 = vsel %vm817_vm8, %v819_v60, %v821_v33  ;;  %v823_v17 = vrot.slane %v751_v31, 4 }
 0x1f3   : > { %v737_v24 = vpop.f32.mrb[24].mxu1 }
 0x1f4   : > { %v824_v32 = vsel %vm817_vm8, %v821_v33, %v823_v17  ;;  %v747_v34 = vmul.f32 2.0, %v737_v24  ;;  %v3287_v35 = vpop.f32.mrb[25].mxu1 }
 0x1f5   : > { %v740_v36 = vpop.f32.mrb[26].mxu1  ;;  %v843_v37 = vpack.c.bf16 %v824_v32, %v822_v7 }
 0x1f6   : > { %v752_v29 = vsub.f32 %v747_v34, %v3810_v23  ;;  %v3288_v38 = vpop.f32.mrb[27].mxu1  ;;  %v3508_v23 = vld [vmem:[%s4545_s2] ss:$8 sps:$4 sm:$0xff]  }
 0x1f7   : > { %974 = vmatpush1.bf16.msra.mxu0 %v843_v37 }
 0x1f8   : > { %v825_v30 = vrot.slane %v752_v29, 4  ;;  %975 = vmatprep.subr.bf16.mxu0 %v3649_v28 }
 0x1fa   : > { %v826_v41 = vsel %vm817_vm8, %v823_v17, %v825_v30 }
 0x1fb   : > { %v844_v43 = vpack.c.bf16 %v826_v41, %v826_v41 }
 0x1fd   : > { %v953_v56 = vand.u32 %v4032_v42, %v844_v43 }
 0x1ff   : > { %976 = vmatpush1.bf16.msra.mxu0 %v953_v56 }
 0x200   : > { %3337 = vmatprep.subr.bf16.mxu0 %v3647_v11 }
 0x202   : > { %988 = vmatmul.mubr.bf16.vlgmr.msra.gmra.mrb[20].mxu0 %v3508_v23 }
 0x203   : > { %2948 = vmatprep.mubr.msk.bf16.mxu0 %vm937_vm6, %v3511_v44  ;;  %3338 = vmatpush3.bf16.msra.mxu0 %v3800_v20 }
 0x204   : > { %3339 = vmatprep.subr.bf16.mxu0 %v3647_v11 }
 0x207   : > { %3340 = vmatpush3.bf16.msra.mxu0 %v3823_v27 }
 0x20a   : > { %996 = vmatmul.mubr.bf16.gmra.mrb[24].mxu0 %v3513_v45 }
 0x20b   : > { %2949 = vmatprep.mubr.msk.bf16.mxu0 %vm937_vm6, %v3514_v46 }
 0x212   : > { %1004 = vmatmul.mubr.bf16.gmra.mrb[28].mxu0 %v3516_v47 }
 0x213   : > { %2950 = vmatprep.mubr.msk.bf16.mxu0 %vm937_vm6, %v3517_v48 }
 0x21a   : > { %1012 = vmatmul.mubr.bf16.gmra.mrb[32].mxu0 %v3519_v49 }
 0x21b   : > { %3341 = vmatprep.mubr.msk.bf16.mxu0 %vm3648_vm2, %v3647_v11 }
 0x2d5   : > { %v989_v51 = vpop.f32.mrb[20].mxu0 }
 0x2d6   : > { %v990_v52 = vadd.f32 %v989_v51, %v864_v50  ;;  %v991_v53 = vpop.f32.mrb[21].mxu0 }
 0x2d7   : > { %v992_v55 = vpop.f32.mrb[22].mxu0 }
 0x2d8   : > { %v2951_v57 = vmul.f32 -1.442695, %v990_v52  ;;  %v993_v59 = vadd.f32 %v992_v55, %v869_v54  ;;  %v994_v61 = vpop.f32.mrb[23].mxu0 }
 0x2da   : > { %3554 = vpow2.f32 %v2951_v57  ;;  %v2952_v63 = vmul.f32 -1.442695, %v993_v59 }
 0x2dc   : > { %3556 = vpow2.f32 %v2952_v63 }
 0x2dd   : > { %v997_v0 = vpop.f32.mrb[24].mxu0 }
 0x2de   : > { %v998_v1 = vadd.f32 %v997_v0, %v874_v62  ;;  %v999_v3 = vpop.f32.mrb[25].mxu0 }
 0x2df   : > { %v1000_v5 = vpop.f32.mrb[26].mxu0 }
 0x2e0   : > { %v2953_v58 = vmul.f32 -1.442695, %v998_v1  ;;  %v1001_v60 = vadd.f32 %v1000_v5, %v879_v4  ;;  %v1002_v2 = vpop.f32.mrb[27].mxu0 }
 0x2e2   : > { %3558 = vpow2.f32 %v2953_v58  ;;  %v2954_v22 = vmul.f32 -1.442695, %v1001_v60 }
 0x2e4   : > { %v3555_v6 = vpop.eup %3554  ;;  %3560 = vpow2.f32 %v2954_v22 }
 0x2e5   : > { %v1044_v8 = vadd.f32 1.0, %v3555_v6  ;;  %v4065_v9 = vpop.f32.mrb[28].mxu0 }
 0x2e6   : > { %v3557_v16 = vpop.eup %3556  ;;  %v1007_v25 = vpop.f32.mrb[29].mxu0 }
 0x2e7   : > { %3562 = vrcp.f32 %v1044_v8  ;;  %v1045_v21 = vadd.f32 1.0, %v3557_v16  ;;  %v4067_v26 = vpop.f32.mrb[30].mxu0 }
 0x2e8   : > { %v1010_v33 = vpop.f32.mrb[31].mxu0 }
 0x2e9   : > { %3564 = vrcp.f32 %v1045_v21 }
 0x2ec   : > { %v3559_v31 = vpop.eup %3558 }
 0x2ed   : > { %v1046_v7 = vadd.f32 1.0, %v3559_v31  ;;  %v4069_v17 = vpop.f32.mrb[32].mxu0 }
 0x2ee   : > { %v3561_v24 = vpop.eup %3560  ;;  %v1015_v32 = vpop.f32.mrb[33].mxu0 }
 0x2ef   : > { %3566 = vrcp.f32 %v1046_v7  ;;  %v1047_v34 = vadd.f32 1.0, %v3561_v24  ;;  %v4071_v35 = vpop.f32.mrb[34].mxu0 }
 0x2f0   : > { %v1018_v36 = vpop.f32.mrb[35].mxu0 }
 0x2f1   : > { %v3563_v37 = vpop.eup %3562  ;;  %3568 = vrcp.f32 %v1047_v34 }
 0x2f2   : > { %v1068_v29 = vmul.f32 %v3563_v37, %v3782_v14 }
 0x2f3   : > { %v3565_v38 = vpop.eup %3564 }
 0x2f4   : > { %v1076_v39 = vrot.slane %v1068_v29, 7  ;;  %v1069_v40 = vmul.f32 %v3565_v38, %v3784_v15 }
 0x2f6   : > { %v1077_v30 = vrot.slane %v1069_v40, 7  ;;  %v4080_v43 = vsel %vm425_vm3, %v3780_v13, %v1076_v39 }
 0x2f8   : > { %v4076_v41 = vsel %vm425_vm3, %v1076_v39, %v1077_v30 }
 0x2f9   : > { %v3567_v56 = vpop.eup %3566  ;;  %v1089_v23 = vpack.c.bf16 %v4076_v41, %v4080_v43 }
 0x2fa   : > { %v1070_v44 = vmul.f32 %v3567_v56, %v3790_v18 }
 0x2fb   : > { %v3569_v45 = vpop.eup %3568  ;;  %3294 = vmatmul.mubr.msk.bf16.vlgmr.msra.gmra.mrb[28].mxu1 %vm458_vm4, %v1089_v23 }
 0x2fc   : > { %v1071_v14 = vmul.f32 %v3569_v45, %v3792_v19  ;;  %3297 = vmatprep.mubr.msk.bf16.mxu1 %vm3648_vm2, %v3647_v11  ;;  %v1079_v15 = vrot.slane %v1070_v44, 7  ;;  %3306 = vmatpush3.bf16.msra.mxu1 %v3768_v10 }
 0x2fd   : > { %3307 = vmatprep.subr.bf16.mxu1 %v3647_v11 }
 0x2fe   : > { %v4091_v13 = vrot.slane %v1071_v14, 7  ;;  %v4094_v46 = vsel %vm425_vm3, %v1077_v30, %v1079_v15 }
 0x300   : > { %v4098_v18 = vsel %vm425_vm3, %v1079_v15, %v4091_v13  ;;  %3308 = vmatpush3.bf16.msra.mxu1 %v3774_v12  ;;  %v1091_v10 = vpack.c.bf16 %v4091_v13, %v4091_v13 }
 0x301   : > { %v1090_v19 = vpack.c.bf16 %v4098_v18, %v4094_v46  ;;  %3321 = vmatprep.subr.bf16.mxu1 %v3647_v11 }
 0x303   : > { %3298 = vmatmul.mubr.msk.bf16.gmra.mrb[32].mxu1 %vm458_vm4, %v1090_v19 }
 0x304   : > { %3301 = vmatprep.mubr.msk.bf16.mxu1 %vm3648_vm2, %v3647_v11 }
 0x30b   : > { %3302 = vmatmul.mubr.msk.bf16.gmra.mrb[36].mxu1 %vm458_vm4, %v1091_v10 }
 0x30c   : > { %3309 = vmatprep.mubr.msk.bf16.mxu1 %vm3648_vm2, %v3647_v11 }
 0x3ce   : > { %v1135_v47 = vpop.f32.mrb[28].mxu1 }
 0x3cf   : > { %v1374_v12 = vrot.slane %v1135_v47, 7  ;;  %v3295_v48 = vpop.f32.mrb[29].mxu1 }
 0x3d0   : > { %v1138_v49 = vpop.f32.mrb[30].mxu1 }
 0x3d1   : > { %v1157_v50 = vpack.c.bf16 %v1138_v49, %v1135_v47  ;;  %v1375_v51 = vrot.slane %v1138_v49, 7  ;;  %v3296_v52 = vpop.f32.mrb[31].mxu1  ;;  %v1445_v53 = vsel %vm425_vm3, %v4091_v13, %v1374_v12 }
 0x3d3   : > { %v1376_v54 = vsel %vm425_vm3, %v1374_v12, %v1375_v51  ;;  %3310 = vmatmul.mubr.msk.bf16.vlgmr.msra.gmra.mrb[40].mxu1 %vm458_vm4, %v1157_v50 }
 0x3d4   : > { %v1449_v55 = vpack.c.bf16 %v1376_v54, %v1445_v53  ;;  %3322 = vmatpush3.bf16.msra.mxu1 %v3800_v20  ;;  %3313 = vmatprep.mubr.msk.bf16.mxu1 %vm3648_vm2, %v3647_v11 }
 0x3d5   : > { %3323 = vmatprep.subr.bf16.mxu1 %v3647_v11 }
 0x3d6   : > { %v1143_v57 = vpop.f32.mrb[32].mxu1 }
 0x3d7   : > { %v1377_v59 = vrot.slane %v1143_v57, 7  ;;  %v3299_v61 = vpop.f32.mrb[33].mxu1 }
 0x3d8   : > { %v1146_v62 = vpop.f32.mrb[34].mxu1  ;;  %3324 = vmatpush3.bf16.msra.mxu1 %v3823_v27 }
 0x3d9   : > { %v1378_v63 = vsel %vm425_vm3, %v1375_v51, %v1377_v59  ;;  %v1158_v0 = vpack.c.bf16 %v1146_v62, %v1143_v57  ;;  %v1379_v1 = vrot.slane %v1146_v62, 7  ;;  %v3300_v3 = vpop.f32.mrb[35].mxu1  ;;  %1513 = vmatprep.subr.bf16.mxu1 %v3649_v28 }
 0x3db   : > { %v1380_v20 = vsel %vm425_vm3, %v1377_v59, %v1379_v1  ;;  %3314 = vmatmul.mubr.msk.bf16.gmra.mrb[44].mxu1 %vm458_vm4, %v1158_v0 }
 0x3dc   : > { %v1450_v4 = vpack.c.bf16 %v1380_v20, %v1378_v63  ;;  %3317 = vmatprep.mubr.msk.bf16.mxu1 %vm3648_vm2, %v3647_v11 }
 0x3de   : > { %v1151_v5 = vpop.f32.mrb[36].mxu1 }
 0x3df   : > { %v1381_v58 = vrot.slane %v1151_v5, 7  ;;  %v3303_v60 = vpop.f32.mrb[37].mxu1  ;;  %v1159_v27 = vpack.c.bf16 %v1151_v5, %v1151_v5 }
 0x3e0   : > { %v1154_v2 = vpop.f32.mrb[38].mxu1 }
 0x3e1   : > { %v1382_v22 = vsel %vm425_vm3, %v1379_v1, %v1381_v58  ;;  %v3304_v6 = vpop.f32.mrb[39].mxu1 }
 0x3e3   : > { %3318 = vmatmul.mubr.msk.bf16.gmra.mrb[48].mxu1 %vm458_vm4, %v1159_v27 }
 0x3e4   : > { %3325 = vmatprep.mubr.msk.bf16.mxu1 %vm3648_vm2, %v3647_v11 }
 0x3eb   : > { %3326 = vmatmul.mubr.msk.bf16.vlgmr.msra.gmra.mrb[52].mxu1 %vm458_vm4, %v1089_v23 }
 0x3ec   : > { %1514 = vmatpush1.bf16.msra.mxu1 %v1089_v23  ;;  %3329 = vmatprep.mubr.msk.bf16.mxu1 %vm3648_vm2, %v3647_v11 }
 0x3ed   : > { %1515 = vmatprep.subr.bf16.mxu1 %v3649_v28 }
 0x3f0   : > { %1516 = vmatpush1.bf16.msra.mxu1 %v1090_v19 }
 0x3f1   : > { %1517 = vmatprep.subr.bf16.mxu1 %v3649_v28 }
 0x3f3   : > { %3330 = vmatmul.mubr.msk.bf16.gmra.mrb[56].mxu1 %vm458_vm4, %v1090_v19 }
 0x3f4   : > { %1518 = vmatpush1.bf16.msra.mxu1 %v1449_v55  ;;  %3333 = vmatprep.mubr.msk.bf16.mxu1 %vm3648_vm2, %v3647_v11 }
 0x3f5   : > { %1519 = vmatprep.subr.bf16.mxu1 %v3649_v28 }
 0x3f8   : > { %1520 = vmatpush1.bf16.msra.mxu1 %v1450_v4 }
 0x3f9   : > { %1521 = vmatprep.subr.bf16.mxu1 %v3649_v28 }
 0x3fb   : > { %3334 = vmatmul.mubr.msk.bf16.gmra.mrb[60].mxu1 %vm458_vm4, %v1091_v10 }
 0x4a6   : > { %v1203_v8 = vpop.f32.mrb[40].mxu1 }
 0x4a7   : > { %v1225_v16 = vmul.f32 2.0, %v1203_v8  ;;  %v3311_v25 = vpop.f32.mrb[41].mxu1 }
 0x4a8   : > { %v1206_v21 = vpop.f32.mrb[42].mxu1 }
 0x4a9   : > { %v1230_v33 = vsub.f32 %v1225_v16, %v4080_v43  ;;  %v1226_v31 = vmul.f32 2.0, %v1206_v21  ;;  %v3312_v7 = vpop.f32.mrb[43].mxu1 }
 0x4ab   : > { %v1393_v24 = vrot.slane %v1230_v33, 6  ;;  %v1231_v32 = vsub.f32 %v1226_v31, %v4076_v41 }
 0x4ad   : > { %v1446_v34 = vsel %vm777_vm7, %v1382_v22, %v1393_v24  ;;  %v1394_v36 = vrot.slane %v1231_v32, 6 }
 0x4ae   : > { %v1211_v37 = vpop.f32.mrb[44].mxu1 }
 0x4af   : > { %v1395_v29 = vsel %vm777_vm7, %v1393_v24, %v1394_v36  ;;  %v1227_v38 = vmul.f32 2.0, %v1211_v37  ;;  %v3315_v39 = vpop.f32.mrb[45].mxu1 }
 0x4b0   : > { %v1214_v40 = vpop.f32.mrb[46].mxu1  ;;  %v1451_v30 = vpack.c.bf16 %v1395_v29, %v1446_v34  ;;  %v3522_v34 = vld [vmem:[%s4547_s4 + $0x4] ss:$8 sps:$4 sm:$0xff]  }
 0x4b1   : > { %v1232_v56 = vsub.f32 %v1227_v38, %v4094_v46  ;;  %v1228_v23 = vmul.f32 2.0, %v1214_v40  ;;  %v3316_v44 = vpop.f32.mrb[47].mxu1  ;;  %2975 = vmatprep.mubr.msk.bf16.mxu1 %vm937_vm6, %v3522_v34 }
 0x4b2   : > { %1522 = vmatpush1.bf16.msra.mxu1 %v1451_v30 }
 0x4b3   : > { %v1396_v45 = vrot.slane %v1232_v56, 6  ;;  %v1233_v14 = vsub.f32 %v1228_v23, %v4098_v18  ;;  %1523 = vmatprep.subr.bf16.mxu1 %v3649_v28 }
 0x4b5   : > { %v1397_v15 = vsel %vm777_vm7, %v1394_v36, %v1396_v45  ;;  %v1398_v19 = vrot.slane %v1233_v14, 6 }
 0x4b6   : > { %v1219_v10 = vpop.f32.mrb[48].mxu1 }
 0x4b7   : > { %v1399_v47 = vsel %vm777_vm7, %v1396_v45, %v1398_v19  ;;  %v1229_v12 = vmul.f32 2.0, %v1219_v10  ;;  %v3319_v48 = vpop.f32.mrb[49].mxu1 }
 0x4b8   : > { %v1222_v49 = vpop.f32.mrb[50].mxu1  ;;  %v1452_v50 = vpack.c.bf16 %v1399_v47, %v1397_v15 }
 0x4b9   : > { %v1234_v51 = vsub.f32 %v1229_v12, %v4091_v13  ;;  %v3320_v52 = vpop.f32.mrb[51].mxu1 }
 0x4ba   : > { %1524 = vmatpush1.bf16.msra.mxu1 %v1452_v50 }
 0x4bb   : > { %v1400_v53 = vrot.slane %v1234_v51, 6  ;;  %1525 = vmatprep.subr.bf16.mxu1 %v3649_v28 }
 0x4bd   : > { %v1401_v54 = vsel %vm777_vm7, %v1398_v19, %v1400_v53 }
 0x4be   : > { %v1269_v55 = vpop.f32.mrb[52].mxu1 }
 0x4bf   : > { %v1412_v57 = vrot.slane %v1269_v55, 5  ;;  %v3327_v59 = vpop.f32.mrb[53].mxu1 }
 0x4c0   : > { %v1272_v61 = vpop.f32.mrb[54].mxu1 }
 0x4c1   : > { %v1447_v62 = vsel %vm797_vm5, %v1401_v54, %v1412_v57  ;;  %v1291_v63 = vpack.c.bf16 %v1272_v61, %v1269_v55  ;;  %v1413_v0 = vrot.slane %v1272_v61, 5  ;;  %v3328_v1 = vpop.f32.mrb[55].mxu1 }
 0x4c3   : > { %v1414_v3 = vsel %vm797_vm5, %v1412_v57, %v1413_v0  ;;  %3342 = vmatmul.mubr.msk.bf16.vlgmr.msra.gmra.mrb[36].mxu0 %vm458_vm4, %v1291_v63 }
 0x4c4   : > { %v1453_v20 = vpack.c.bf16 %v1414_v3, %v1447_v62  ;;  %3345 = vmatprep.mubr.msk.bf16.mxu0 %vm3648_vm2, %v3647_v11  ;;  %v3520_v3 = vld [vmem:[%s4547_s4] ss:$8 sps:$4 sm:$0xff]  }
 0x4c6   : > { %v1277_v4 = vpop.f32.mrb[56].mxu1  ;;  %1526 = vmatpush1.bf16.msra.mxu1 %v1453_v20  ;;  %v3523_v20 = vld [vmem:[%s4547_s4 + $0x14] ss:$8 sps:$4 sm:$0xff]  }
 0x4c7   : > { %v1415_v5 = vrot.slane %v1277_v4, 5  ;;  %v3331_v58 = vpop.f32.mrb[57].mxu1  ;;  %1527 = vmatprep.subr.bf16.mxu1 %v3649_v28 }
 0x4c8   : > { %v1280_v60 = vpop.f32.mrb[58].mxu1  ;;  %v889_v58 = vpop.permute.xlu1 %888 }
 0x4c9   : > { %v1416_v2 = vsel %vm797_vm5, %v1413_v0, %v1415_v5  ;;  %v1292_v27 = vpack.c.bf16 %v1280_v60, %v1277_v4  ;;  %v1417_v22 = vrot.slane %v1280_v60, 5  ;;  %v3332_v6 = vpop.f32.mrb[59].mxu1  ;;  %v884_v4 = vpop.permute.xlu0 %883  ;;  %v1009_v60 = vadd.f32 %v4067_v26, %v889_v58 }
 0x4cb   : > { %v1418_v8 = vsel %vm797_vm5, %v1415_v5, %v1417_v22  ;;  %3346 = vmatmul.mubr.msk.bf16.gmra.mrb[40].mxu0 %vm458_vm4, %v1292_v27  ;;  %v1006_v5 = vadd.f32 %v4065_v9, %v884_v4  ;;  %v2956_v27 = vmul.f32 -1.442695, %v1009_v60  ;;  %v4230_v60 = vld [vmem:[#allocation2 + $0x20] sm:$0xff] }
 0x4cc   : > { %v1454_v16 = vpack.c.bf16 %v1418_v8, %v1416_v2  ;;  %3349 = vmatprep.mubr.msk.bf16.mxu0 %vm3648_vm2, %v3647_v11  ;;  %v899_v8 = vpop.permute.xlu1 %898 }
 0x4cd   : > { %v2955_v2 = vmul.f32 -1.442695, %v1006_v5 }
 0x4ce   : > { %v1285_v25 = vpop.f32.mrb[60].mxu1  ;;  %1528 = vmatpush1.bf16.msra.mxu1 %v1454_v16  ;;  %v1017_v16 = vadd.f32 %v4071_v35, %v899_v8  ;;  %v4252_v8 = vld [vmem:[#allocation2 + $0x30] sm:$0xff] }
 0x4cf   : > { %v1419_v21 = vrot.slane %v1285_v25, 5  ;;  %v3335_v33 = vpop.f32.mrb[61].mxu1  ;;  %1529 = vmatprep.subr.bf16.mxu1 %v3649_v28  ;;  %v1293_v7 = vpack.c.bf16 %v1285_v25, %v1285_v25  ;;  %3570 = vpow2.f32 %v2955_v2  ;;  %v4232_v2 = vld [vmem:[#allocation2 + $0x28] sm:$0xff] }
 0x4d0   : > { %v1288_v31 = vpop.f32.mrb[62].mxu1  ;;  %3572 = vpow2.f32 %v2956_v27 }
 0x4d1   : > { %v1420_v24 = vsel %vm797_vm5, %v1417_v22, %v1419_v21  ;;  %v3336_v32 = vpop.f32.mrb[63].mxu1  ;;  %v894_v22 = vpop.permute.xlu0 %893  ;;  %v2958_v21 = vmul.f32 -1.442695, %v1017_v16  ;;  %v4254_v16 = vld [vmem:[#allocation2 + $0x38] sm:$0xff] }
 0x4d2   : > { %v1014_v6 = vadd.f32 %v4069_v17, %v894_v22  ;;  %v4240_v22 = vpack.c.bf16 %v4232_v2, %v4230_v60 }
 0x4d3   : > { %3350 = vmatmul.mubr.msk.bf16.gmra.mrb[44].mxu0 %vm458_vm4, %v1293_v7 }
 0x4d4   : > { %v2957_v25 = vmul.f32 -1.442695, %v1014_v6 }
 0x4d6   : > { %3574 = vpow2.f32 %v2957_v25  ;;  %v4260_v25 = vpack.c.bf16 %v4254_v16, %v4252_v8 }
 0x4d7   : > { %3576 = vpow2.f32 %v2958_v21  ;;  %v4268_v21 = vld [vmem:[%s4544_s1 + $0x10] sm:$0xff]  }
 0x4d9   : > { %v3571_v33 = vpop.eup %3570 }
 0x4da   : > { %v3573_v31 = vpop.eup %3572  ;;  %v1048_v9 = vadd.f32 1.0, %v3571_v33  ;;  %v4276_v33 = vld [vmem:[%s4544_s1 + $0x18] sm:$0xff]  }
 0x4db   : > { %v1049_v7 = vadd.f32 1.0, %v3573_v31 }
 0x4dc   : > { %3578 = vrcp.f32 %v1048_v9 }
 0x4dd   : > { %3580 = vrcp.f32 %v1049_v7 }
 0x4e0   : > { %v3575_v26 = vpop.eup %3574 }
 0x4e1   : > { %v3577_v17 = vpop.eup %3576 }
 0x596   : > { %v1337_v36 = vpop.f32.mrb[36].mxu0 }
 0x597   : > { %v1359_v37 = vmul.f32 2.0, %v1337_v36  ;;  %v3343_v29 = vpop.f32.mrb[37].mxu0 }
 0x598   : > { %v1340_v38 = vpop.f32.mrb[38].mxu0 }
 0x599   : > { %v1364_v39 = vsub.f32 %v1359_v37, %v4080_v43  ;;  %v1360_v40 = vmul.f32 2.0, %v1340_v38  ;;  %v3344_v30 = vpop.f32.mrb[39].mxu0  ;;  %v1474_v37 = vpop.permute.xlu1 %1473  ;;  %v1050_v38 = vadd.f32 1.0, %v3575_v26 }
 0x59b   : > { %v1431_v56 = vrot.slane %v1364_v39, 4  ;;  %v1365_v23 = vsub.f32 %v1360_v40, %v4076_v41  ;;  %v1051_v40 = vadd.f32 1.0, %v3577_v17 }
 0x59d   : > { %v1448_v44 = vsel %vm817_vm8, %v1420_v24, %v1431_v56  ;;  %v1432_v45 = vrot.slane %v1365_v23, 4  ;;  %v1469_v24 = vpop.permute.xlu0 %1468  ;;  %v3579_v23 = vpop.eup %3578 }
 0x59e   : > { %v1345_v14 = vpop.f32.mrb[40].mxu0 }
 0x59f   : > { %v1433_v15 = vsel %vm817_vm8, %v1431_v56, %v1432_v45  ;;  %v1361_v19 = vmul.f32 2.0, %v1345_v14  ;;  %v3347_v10 = vpop.f32.mrb[41].mxu0  ;;  %v1484_v14 = vpop.permute.xlu1 %1483 }
 0x5a0   : > { %v1348_v47 = vpop.f32.mrb[42].mxu0  ;;  %v1455_v12 = vpack.c.bf16 %v1433_v15, %v1448_v44 }
 0x5a1   : > { %v1366_v48 = vsub.f32 %v1361_v19, %v4094_v46  ;;  %v1362_v49 = vmul.f32 2.0, %v1348_v47  ;;  %v3348_v50 = vpop.f32.mrb[43].mxu0  ;;  %v1479_v30 = vpop.permute.xlu0 %1478 }
 0x5a2   : > { %1530 = vmatpush1.bf16.msra.mxu1 %v1455_v12  ;;  %v3581_v19 = vpop.eup %3580  ;;  %v1570_v12 = vsub.f32 1.0, %v3579_v23 }
 0x5a3   : > { %v1434_v43 = vrot.slane %v1366_v48, 4  ;;  %v1367_v51 = vsub.f32 %v1362_v49, %v4098_v18  ;;  %1531 = vmatprep.subr.bf16.mxu1 %v3649_v28  ;;  %v3634_v49 = vld [vmem:[#allocation2] sm:$0xff] }
 0x5a4   : > { %v1566_v50 = vmul.f32 %v3634_v49, %v3579_v23 }
 0x5a5   : > { %v1435_v41 = vsel %vm817_vm8, %v1432_v45, %v1434_v43  ;;  %v1436_v52 = vrot.slane %v1367_v51, 4  ;;  %v1571_v51 = vsub.f32 1.0, %v3581_v19 }
 0x5a6   : > { %v1353_v53 = vpop.f32.mrb[44].mxu0 }
 0x5a7   : > { %v1437_v54 = vsel %vm817_vm8, %v1434_v43, %v1436_v52  ;;  %v1363_v55 = vmul.f32 2.0, %v1353_v53  ;;  %v3351_v57 = vpop.f32.mrb[45].mxu0 }
 0x5a8   : > { %v1356_v59 = vpop.f32.mrb[46].mxu0  ;;  %v1456_v61 = vpack.c.bf16 %v1437_v54, %v1435_v41 }
 0x5a9   : > { %v1368_v46 = vsub.f32 %v1363_v55, %v4091_v13  ;;  %v3352_v62 = vpop.f32.mrb[47].mxu0  ;;  %v4205_v13 = vld [vmem:[%s4544_s1 + $0x8] sm:$0xff]  }
 0x5aa   : > { %1532 = vmatpush1.bf16.msra.mxu1 %v1456_v61 }
 0x5ab   : > { %v1438_v63 = vrot.slane %v1368_v46, 4  ;;  %1533 = vmatprep.subr.bf16.mxu1 %v3649_v28  ;;  %v3525_v28 = vld [vmem:[%s4547_s4 + $0x10] ss:$8 sps:$4 sm:$0xff]  }
 0x5ad   : > { %v1439_v18 = vsel %vm817_vm8, %v1436_v52, %v1438_v63  ;;  %v3635_v52 = vld [vmem:[#allocation2 + $0x8] sm:$0xff] }
 0x5ae   : > { %v1457_v0 = vpack.c.bf16 %v1439_v18, %v1439_v18  ;;  %v1567_v53 = vmul.f32 %v3635_v52, %v3581_v19  ;;  %v3636_v18 = vld [vmem:[#allocation2 + $0x10] sm:$0xff] }
 0x5b0   : > { %v1511_v1 = vand.u32 %v1457_v0, %v4032_v42  ;;  %v4198_v42 = vld [vmem:[%s4544_s1] sm:$0xff]  }
 0x5b1   : > { %3353 = vmatprep.subr.bf16.mxu0 %v4198_v42 }
 0x5b2   : > { %1534 = vmatpush1.bf16.msra.mxu1 %v1511_v1  ;;  %3354 = vmatpush3.bf16.msra.mxu0 %v4198_v42 }
 0x5b3   : > { %3355 = vmatprep.subr.bf16.mxu0 %v4205_v13  ;;  %3389 = vmatprep.subr.bf16.mxu1 %v4268_v21 }
 0x5b5   : > { %1546 = vmatmul.mubr.bf16.vlgmr.msra.gmra.mrb[64].mxu1 %v3520_v3 }
 0x5b6   : > { %2976 = vmatprep.mubr.msk.bf16.mxu1 %vm937_vm6, %v3523_v20  ;;  %3356 = vmatpush3.bf16.msra.mxu0 %v4205_v13 }
 0x5b7   : > { %3365 = vmatprep.subr.bf16.mxu0 %v4198_v42  ;;  %3390 = vmatpush3.bf16.msra.mxu1 %v4268_v21 }
 0x5b8   : > { %3391 = vmatprep.subr.bf16.mxu1 %v4276_v33 }
 0x5bb   : > { %3392 = vmatpush3.bf16.msra.mxu1 %v4276_v33 }
 0x5bd   : > { %1554 = vmatmul.mubr.bf16.gmra.mrb[68].mxu1 %v3525_v28  ;;  %v3637_v28 = vld [vmem:[#allocation2 + $0x18] sm:$0xff] }
 0x688   : > { %v1547_v32 = vpop.f32.mrb[64].mxu1 }
 0x689   : > { %v1548_v34 = vadd.f32 %v1547_v32, %v1469_v24  ;;  %v1549_v36 = vpop.f32.mrb[65].mxu1 }
 0x68a   : > { %v1550_v29 = vpop.f32.mrb[66].mxu1 }
 0x68b   : > { %3582 = vtanh.f32 %v1548_v34  ;;  %v1551_v35 = vadd.f32 %v1550_v29, %v1474_v37  ;;  %v1552_v39 = vpop.f32.mrb[67].mxu1 }
 0x68d   : > { %3584 = vtanh.f32 %v1551_v35  ;;  %v3532_v35 = vld [vmem:[%s4549_s6 + $0x4] ss:$12 sps:$4 sm:$0xff]  }
 0x68e   : > { %3586 = vrcp.f32 %v1050_v38 }
 0x68f   : > { %3588 = vrcp.f32 %v1051_v40 }
 0x690   : > { %v1555_v56 = vpop.f32.mrb[68].mxu1 }
 0x691   : > { %v1556_v44 = vadd.f32 %v1555_v56, %v1479_v30  ;;  %v1557_v45 = vpop.f32.mrb[69].mxu1 }
 0x692   : > { %v1558_v15 = vpop.f32.mrb[70].mxu1 }
 0x693   : > { %3590 = vtanh.f32 %v1556_v44  ;;  %v1559_v10 = vadd.f32 %v1558_v15, %v1484_v14  ;;  %v1560_v47 = vpop.f32.mrb[71].mxu1 }
 0x695   : > { %v3583_v48 = vpop.eup %3582  ;;  %3592 = vtanh.f32 %v1559_v10 }
 0x696   : > { %v1574_v43 = vmul.f32 %v3583_v48, %v1570_v12 }
 0x697   : > { %v3585_v41 = vpop.eup %3584 }
 0x698   : > { %v4214_v54 = vadd.f32 %v1574_v43, %v1566_v50  ;;  %v1575_v55 = vmul.f32 %v3585_v41, %v1571_v51  ;;  %v3587_v57 = vpop.eup %3586 }
 0x699   : > { %v3589_v61 = vpop.eup %3588  ;;  %v1572_v46 = vsub.f32 1.0, %v3587_v57  ;;  %v1568_v0 = vmul.f32 %v3636_v18, %v3587_v57 }
 0x69a   : > { %1582 = vst.msk [vmem:[#allocation2] sm:$0xff] %vm458_vm4, %v4214_v54  ;;  %v4218_v59 = vadd.f32 %v1575_v55, %v1567_v53  ;;  %v1573_v3 = vsub.f32 1.0, %v3589_v61  ;;  %v1569_v4 = vmul.f32 %v3637_v28, %v3589_v61 }
 0x69c   : > { %1583 = vst.msk [vmem:[#allocation2 + $0x8] sm:$0xff] %vm458_vm4, %v4218_v59  ;;  %v4224_v62 = vpack.c.bf16 %v4218_v59, %v4214_v54 }
 0x69d   : > { %v3591_v63 = vpop.eup %3590 }
 0x69e   : > { %v1576_v1 = vmul.f32 %v3591_v63, %v1572_v46  ;;  %3357 = vmatprep.mubr.msk.bf16.mxu0 %vm458_vm4, %v4224_v62 }
 0x69f   : > { %v3593_v20 = vpop.eup %3592 }
 0x6a0   : > { %v4228_v5 = vadd.f32 %v1576_v1, %v1568_v0  ;;  %v1577_v58 = vmul.f32 %v3593_v20, %v1573_v3 }
 0x6a2   : > { %1584 = vst.msk [vmem:[#allocation2 + $0x10] sm:$0xff] %vm458_vm4, %v4228_v5  ;;  %v4236_v27 = vadd.f32 %v1577_v58, %v1569_v4 }
 0x6a4   : > { %1585 = vst.msk [vmem:[#allocation2 + $0x18] sm:$0xff] %vm458_vm4, %v4236_v27  ;;  %v4246_v6 = vpack.c.bf16 %v4236_v27, %v4228_v5 }
 0x6a6   : > { %3358 = vmatmul.mubr.msk.bf16.vlgmr.msra.gmra.mrb[48].mxu0 %vm458_vm4, %v4246_v6 }
 0x6a7   : > { %3361 = vmatprep.mubr.msk.bf16.mxu0 %vm458_vm4, %v4240_v22  ;;  %3366 = vmatpush3.bf16.msra.mxu0 %v4198_v42 }
 0x6a8   : > { %3367 = vmatprep.subr.bf16.mxu0 %v4205_v13 }
 0x6ab   : > { %3368 = vmatpush3.bf16.msra.mxu0 %v4205_v13 }
 0x6ac   : > { %3377 = vmatprep.subr.bf16.mxu0 %v4268_v21 }
 0x6ae   : > { %3362 = vmatmul.mubr.msk.bf16.gmra.mrb[52].mxu0 %vm458_vm4, %v4260_v25 }
 0x779   : > { %v3359_v31 = vpop.f32.mrb[48].mxu0 }
 0x77a   : > { %v1657_v9 = vpop.f32.mrb[49].mxu0 }
 0x77b   : > { %v3360_v7 = vpop.f32.mrb[50].mxu0 }
 0x77c   : > { %v4280_v26 = vpack.c.bf16 %v3360_v7, %v3359_v31  ;;  %v1660_v24 = vpop.f32.mrb[51].mxu0 }
 0x77d   : > { %v4282_v32 = vpack.c.bf16 %v1660_v24, %v1657_v9 }
 0x77f   : > { %3369 = vmatprep.mubr.msk.bf16.mxu0 %vm458_vm4, %v4282_v32 }
 0x780   : > { %3370 = vmatmul.mubr.msk.bf16.vlgmr.msra.gmra.mrb[56].mxu0 %vm458_vm4, %v4280_v26 }
 0x781   : > { %v3363_v34 = vpop.f32.mrb[52].mxu0  ;;  %3378 = vmatpush3.bf16.msra.mxu0 %v4268_v21 }
 0x782   : > { %v1673_v36 = vpop.f32.mrb[53].mxu0  ;;  %3379 = vmatprep.subr.bf16.mxu0 %v4276_v33 }
 0x783   : > { %v3364_v17 = vpop.f32.mrb[54].mxu0 }
 0x784   : > { %v4290_v37 = vpack.c.bf16 %v3364_v17, %v3363_v34  ;;  %v1676_v29 = vpop.f32.mrb[55].mxu0  ;;  %v3538_v17 = vld [vmem:[%s4549_s6 + $0x30] ss:$12 sps:$4 sm:$0xff]  }
 0x785   : > { %v4292_v38 = vpack.c.bf16 %v1676_v29, %v1673_v36  ;;  %3380 = vmatpush3.bf16.msra.mxu0 %v4276_v33  ;;  %v3541_v29 = vld [vmem:[%s4549_s6 + $0x48] ss:$12 sps:$4 sm:$0xff]  }
 0x787   : > { %3373 = vmatprep.mubr.msk.bf16.mxu0 %vm458_vm4, %v4292_v38 }
 0x788   : > { %3374 = vmatmul.mubr.msk.bf16.gmra.mrb[60].mxu0 %vm458_vm4, %v4290_v37 }
 0x789   : > { %3381 = vmatprep.mubr.msk.bf16.mxu0 %vm458_vm4, %v4224_v62 }
 0x790   : > { %3382 = vmatmul.mubr.msk.bf16.vlgmr.msra.gmra.mrb[64].mxu0 %vm458_vm4, %v4246_v6 }
 0x791   : > { %3385 = vmatprep.mubr.msk.bf16.mxu0 %vm458_vm4, %v4240_v22 }
 0x798   : > { %3386 = vmatmul.mubr.msk.bf16.gmra.mrb[68].mxu0 %vm458_vm4, %v4260_v25 }
 0x799   : > { %2140 = vmatprep.mubr.bf16.mxu0 %v3532_v35 }
 0x853   : > { %v3371_v39 = vpop.f32.mrb[56].mxu0 }
 0x854   : > { %v1771_v40 = vmul.f32 2.0, %v3371_v39  ;;  %v1738_v30 = vpop.f32.mrb[57].mxu0 }
 0x855   : > { %v1769_v56 = vmul.f32 2.0, %v1738_v30  ;;  %v3372_v23 = vpop.f32.mrb[58].mxu0 }
 0x856   : > { %v1772_v44 = vmul.f32 2.0, %v3372_v23  ;;  %v1741_v45 = vpop.f32.mrb[59].mxu0  ;;  %v1779_v15 = vsub.f32 %v1771_v40, %v4228_v5 }
 0x857   : > { %v1770_v14 = vmul.f32 2.0, %v1741_v45  ;;  %v1777_v10 = vsub.f32 %v1769_v56, %v4214_v54 }
 0x858   : > { %v1780_v19 = vsub.f32 %v1772_v44, %v4236_v27 }
 0x859   : > { %v1778_v47 = vsub.f32 %v1770_v14, %v4218_v59 }
 0x85a   : > { %v1964_v12 = vpack.c.bf16 %v1780_v19, %v1779_v15 }
 0x85b   : > { %v3375_v48 = vpop.f32.mrb[60].mxu0  ;;  %v1963_v49 = vpack.c.bf16 %v1778_v47, %v1777_v10 }
 0x85c   : > { %v1775_v50 = vmul.f32 2.0, %v3375_v48  ;;  %v1754_v43 = vpop.f32.mrb[61].mxu0 }
 0x85d   : > { %v1773_v51 = vmul.f32 2.0, %v1754_v43  ;;  %v3376_v41 = vpop.f32.mrb[62].mxu0  ;;  %3116 = vmatprep.subr.bf16.mxu0 %v1963_v49 }
 0x85e   : > { %v1776_v52 = vmul.f32 2.0, %v3376_v41  ;;  %v1757_v53 = vpop.f32.mrb[63].mxu0  ;;  %3117 = vmatpush3.bf16.msra.mxu0 %v4224_v62  ;;  %v1783_v57 = vsub.f32 %v1775_v50, %v4252_v8 }
 0x85f   : > { %v1774_v55 = vmul.f32 2.0, %v1757_v53  ;;  %3118 = vmatprep.subr.bf16.mxu0 %v1964_v12  ;;  %v1781_v46 = vsub.f32 %v1773_v51, %v4230_v60 }
 0x860   : > { %v1784_v61 = vsub.f32 %v1776_v52, %v4254_v16 }
 0x861   : > { %v1782_v63 = vsub.f32 %v1774_v55, %v4232_v2 }
 0x862   : > { %3119 = vmatpush3.bf16.msra.mxu0 %v4246_v6  ;;  %v1966_v18 = vpack.c.bf16 %v1784_v61, %v1783_v57 }
 0x863   : > { %v3383_v0 = vpop.f32.mrb[64].mxu0  ;;  %v1965_v1 = vpack.c.bf16 %v1782_v63, %v1781_v46 }
 0x864   : > { %v1835_v3 = vpop.f32.mrb[65].mxu0 }
 0x865   : > { %v3384_v20 = vpop.f32.mrb[66].mxu0  ;;  %3120 = vmatprep.subr.bf16.mxu0 %v1965_v1 }
 0x866   : > { %v1867_v28 = vpack.c.bf16 %v3384_v20, %v3383_v0  ;;  %v1838_v4 = vpop.f32.mrb[67].mxu0  ;;  %3121 = vmatpush3.bf16.msra.mxu0 %v4240_v22  ;;  %v3530_v22 = vld [vmem:[%s4549_s6] ss:$12 sps:$4 sm:$0xff]  }
 0x867   : > { %v1866_v58 = vpack.c.bf16 %v1838_v4, %v1835_v3  ;;  %3122 = vmatprep.subr.bf16.mxu0 %v1966_v18  ;;  %v3543_v4 = vld [vmem:[%s4549_s6 + $0x20] ss:$12 sps:$4 sm:$0xff]  }
 0x869   : > { %3393 = vmatprep.mubr.msk.bf16.mxu1 %vm458_vm4, %v1866_v58 }
 0x86a   : > { %3394 = vmatmul.mubr.msk.bf16.vlgmr.msra.gmra.mrb[72].mxu1 %vm458_vm4, %v1867_v28  ;;  %3123 = vmatpush3.bf16.msra.mxu0 %v4260_v25  ;;  %v3533_v25 = vld [vmem:[%s4549_s6 + $0x1c] ss:$12 sps:$4 sm:$0xff]  }
 0x86b   : > { %v3387_v31 = vpop.f32.mrb[68].mxu0  ;;  %3124 = vmatprep.subr.bf16.mxu0 %v1866_v58 }
 0x86c   : > { %v1851_v9 = vpop.f32.mrb[69].mxu0 }
 0x86d   : > { %v3388_v7 = vpop.f32.mrb[70].mxu0 }
 0x86e   : > { %v1869_v24 = vpack.c.bf16 %v3388_v7, %v3387_v31  ;;  %v1854_v34 = vpop.f32.mrb[71].mxu0  ;;  %3125 = vmatpush3.bf16.msra.mxu0 %v4282_v32  ;;  %v3536_v32 = vld [vmem:[%s4549_s6 + $0x34] ss:$12 sps:$4 sm:$0xff]   ;;  %v3544_v31 = vld [vmem:[%s4549_s6 + $0x38] ss:$12 sps:$4 sm:$0xff]  }
 0x86f   : > { %v1868_v36 = vpack.c.bf16 %v1854_v34, %v1851_v9  ;;  %3126 = vmatprep.subr.bf16.mxu0 %v1867_v28 }
 0x871   : > { %3397 = vmatprep.mubr.msk.bf16.mxu1 %vm458_vm4, %v1868_v36 }
 0x872   : > { %3398 = vmatmul.mubr.msk.bf16.gmra.mrb[76].mxu1 %vm458_vm4, %v1869_v24  ;;  %3127 = vmatpush3.bf16.msra.mxu0 %v4280_v26  ;;  %v3535_v26 = vld [vmem:[%s4549_s6 + $0x18] ss:$12 sps:$4 sm:$0xff]  }
 0x873   : > { %3128 = vmatprep.subr.bf16.mxu0 %v1868_v36 }
 0x876   : > { %3129 = vmatpush3.bf16.msra.mxu0 %v4292_v38  ;;  %v3542_v38 = vld [vmem:[%s4549_s6 + $0x8] ss:$12 sps:$4 sm:$0xff]  }
 0x877   : > { %3130 = vmatprep.subr.bf16.mxu0 %v1869_v24  ;;  %3409 = vmatprep.mubr.msk.bf16.mxu1 %vm2095_vm9, %v3542_v38 }
 0x87a   : > { %3131 = vmatpush3.bf16.msra.mxu0 %v4290_v37  ;;  %v3539_v37 = vld [vmem:[%s4549_s6 + $0x4c] ss:$12 sps:$4 sm:$0xff]  }
 0x87b   : > { %3441 = vmatprep.subr.bf16.mxu0 %v4268_v21 }
 0x87d   : > { %2141 = vmatmul.mubr.bf16.vlgmr.msra.gmra.mrb[72].mxu0 %v3530_v22  ;;  %v3545_v22 = vld [vmem:[%s4549_s6 + $0x50] ss:$12 sps:$4 sm:$0xff]  }
 0x87e   : > { %2148 = vmatprep.mubr.bf16.mxu0 %v3533_v25  ;;  %3442 = vmatpush3.bf16.msra.mxu0 %v4268_v21 }
 0x87f   : > { %3443 = vmatprep.subr.bf16.mxu0 %v4276_v33 }
 0x882   : > { %3444 = vmatpush3.bf16.msra.mxu0 %v4276_v33 }
 0x885   : > { %2149 = vmatmul.mubr.bf16.gmra.mrb[76].mxu0 %v3535_v26 }
 0x886   : > { %2156 = vmatprep.mubr.bf16.mxu0 %v3536_v32 }
 0x88d   : > { %2157 = vmatmul.mubr.bf16.gmra.mrb[80].mxu0 %v3538_v17 }
 0x88e   : > { %2164 = vmatprep.mubr.bf16.mxu0 %v3539_v37 }
 0x895   : > { %2165 = vmatmul.mubr.bf16.gmra.mrb[84].mxu0 %v3541_v29 }
 0x896   : > { %3445 = vmatprep.mubr.msk.bf16.mxu0 %vm458_vm4, %v4224_v62 }
 0x89d   : > { %3446 = vmatmul.mubr.msk.bf16.vlgmr.msra.gmra.mrb[88].mxu0 %vm458_vm4, %v4246_v6 }
 0x93d   : > { %v3395_v35 = vpop.f32.mrb[72].mxu1 }
 0x93e   : > { %v1949_v39 = vmul.f32 2.0, %v3395_v35  ;;  %v1916_v40 = vpop.f32.mrb[73].mxu1 }
 0x93f   : > { %v1947_v30 = vmul.f32 2.0, %v1916_v40  ;;  %v3396_v56 = vpop.f32.mrb[74].mxu1 }
 0x940   : > { %v1950_v23 = vmul.f32 2.0, %v3396_v56  ;;  %v1919_v44 = vpop.f32.mrb[75].mxu1  ;;  %v1957_v14 = vsub.f32 %v1949_v39, %v4228_v5 }
 0x941   : > { %v1948_v45 = vmul.f32 2.0, %v1919_v44  ;;  %v1955_v19 = vsub.f32 %v1947_v30, %v4214_v54 }
 0x942   : > { %v1958_v15 = vsub.f32 %v1950_v23, %v4236_v27 }
 0x943   : > { %v1956_v10 = vsub.f32 %v1948_v45, %v4218_v59 }
 0x944   : > { %v1968_v47 = vpack.c.bf16 %v1958_v15, %v1957_v14 }
 0x945   : > { %v3399_v12 = vpop.f32.mrb[76].mxu1  ;;  %v1967_v48 = vpack.c.bf16 %v1956_v10, %v1955_v19 }
 0x946   : > { %v1953_v49 = vmul.f32 2.0, %v3399_v12  ;;  %v1932_v50 = vpop.f32.mrb[77].mxu1 }
 0x947   : > { %v1951_v43 = vmul.f32 2.0, %v1932_v50  ;;  %v3400_v51 = vpop.f32.mrb[78].mxu1  ;;  %3401 = vmatprep.subr.bf16.mxu1 %v1967_v48 }
 0x948   : > { %v1954_v41 = vmul.f32 2.0, %v3400_v51  ;;  %v1935_v52 = vpop.f32.mrb[79].mxu1  ;;  %3402 = vmatpush3.bf16.msra.mxu1 %v1967_v48  ;;  %v1961_v55 = vsub.f32 %v1953_v49, %v4252_v8 }
 0x949   : > { %v1952_v53 = vmul.f32 2.0, %v1935_v52  ;;  %3403 = vmatprep.subr.bf16.mxu1 %v1968_v47  ;;  %v1959_v61 = vsub.f32 %v1951_v43, %v4230_v60 }
 0x94a   : > { %v1962_v57 = vsub.f32 %v1954_v41, %v4254_v16 }
 0x94b   : > { %v1960_v46 = vsub.f32 %v1952_v53, %v4232_v2 }
 0x94c   : > { %3404 = vmatpush3.bf16.msra.mxu1 %v1968_v47  ;;  %v1970_v63 = vpack.c.bf16 %v1962_v57, %v1961_v55  ;;  %v2003_v47 = vpop.permute.xlu1 %2002 }
 0x94d   : > { %v1969_v18 = vpack.c.bf16 %v1960_v46, %v1959_v61 }
 0x94f   : > { %3405 = vmatprep.subr.bf16.mxu1 %v1969_v18 }
 0x950   : > { %v3132_v0 = vpop.f32.mrb[72].mxu0  ;;  %3406 = vmatpush3.bf16.msra.mxu1 %v1969_v18  ;;  %v2013_v48 = vpop.permute.xlu1 %2012 }
 0x951   : > { %v3133_v1 = vpop.f32.mrb[73].mxu0  ;;  %3407 = vmatprep.subr.bf16.mxu1 %v1970_v63 }
 0x952   : > { %v3134_v3 = vadd.f32 %v3133_v1, %v3132_v0  ;;  %v3135_v20 = vpop.f32.mrb[74].mxu0 }
 0x953   : > { %v3136_v28 = vpop.f32.mrb[75].mxu0 }
 0x954   : > { %v3137_v58 = vadd.f32 %v3136_v28, %v3135_v20  ;;  %3408 = vmatpush3.bf16.msra.mxu1 %v1970_v63  ;;  %v2023_v53 = vpop.permute.xlu1 %2022 }
 0x955   : > { %3417 = vmatprep.subr.bf16.mxu1 %v4198_v42 }
 0x956   : > { %v2146_v61 = vadd.f32 %v3137_v58, %v2003_v47 }
 0x957   : > { %3410 = vmatmul.mubr.msk.bf16.vlgmr.msra.gmra.mrb[80].mxu1 %vm2095_vm9, %v3543_v4 }
 0x958   : > { %v3138_v9 = vpop.f32.mrb[76].mxu0  ;;  %3413 = vmatprep.mubr.msk.bf16.mxu1 %vm2095_vm9, %v3544_v31  ;;  %3418 = vmatpush3.bf16.msra.mxu1 %v4198_v42 }
 0x959   : > { %v3139_v7 = vpop.f32.mrb[77].mxu0  ;;  %3419 = vmatprep.subr.bf16.mxu1 %v4205_v13 }
 0x95a   : > { %v3140_v24 = vadd.f32 %v3139_v7, %v3138_v9  ;;  %v3141_v34 = vpop.f32.mrb[78].mxu0 }
 0x95b   : > { %v3142_v36 = vpop.f32.mrb[79].mxu0 }
 0x95c   : > { %v3143_v25 = vadd.f32 %v3142_v36, %v3141_v34  ;;  %3420 = vmatpush3.bf16.msra.mxu1 %v4205_v13 }
 0x95d   : > { %3429 = vmatprep.subr.bf16.mxu1 %v4198_v42 }
 0x95e   : > { %v2154_v52 = vadd.f32 %v3143_v25, %v2013_v48 }
 0x95f   : > { %3414 = vmatmul.mubr.msk.bf16.gmra.mrb[84].mxu1 %vm2095_vm9, %v3545_v22 }
 0x960   : > { %v3144_v26 = vpop.f32.mrb[80].mxu0  ;;  %3421 = vmatprep.mubr.msk.bf16.mxu1 %vm458_vm4, %v4224_v62 }
 0x961   : > { %v3145_v32 = vpop.f32.mrb[81].mxu0 }
 0x962   : > { %v3146_v17 = vadd.f32 %v3145_v32, %v3144_v26  ;;  %v3147_v37 = vpop.f32.mrb[82].mxu0 }
 0x963   : > { %v3148_v29 = vpop.f32.mrb[83].mxu0 }
 0x964   : > { %v3149_v38 = vadd.f32 %v3148_v29, %v3147_v37 }
 0x966   : > { %v2162_v25 = vadd.f32 %v3149_v38, %v2023_v53 }
 0x967   : > { %3422 = vmatmul.mubr.msk.bf16.vlgmr.msra.gmra.mrb[88].mxu1 %vm458_vm4, %v4246_v6 }
 0x968   : > { %v3150_v35 = vpop.f32.mrb[84].mxu0  ;;  %3430 = vmatpush3.bf16.msra.mxu1 %v4198_v42  ;;  %v1998_v42 = vpop.permute.xlu0 %1997 }
 0x969   : > { %v3151_v39 = vpop.f32.mrb[85].mxu0  ;;  %3431 = vmatprep.subr.bf16.mxu1 %v4205_v13  ;;  %v2143_v51 = vadd.f32 %v3134_v3, %v1998_v42  ;;  %v2033_v3 = vpop.permute.xlu1 %2032 }
 0x96a   : > { %v3152_v40 = vadd.f32 %v3151_v39, %v3150_v35  ;;  %v3153_v30 = vpop.f32.mrb[86].mxu0 }
 0x96b   : > { %v3154_v56 = vpop.f32.mrb[87].mxu0 }
 0x96c   : > { %v3155_v23 = vadd.f32 %v3154_v56, %v3153_v30  ;;  %3432 = vmatpush3.bf16.msra.mxu1 %v4205_v13  ;;  %v2008_v12 = vpop.permute.xlu0 %2007 }
 0x96d   : > { %3453 = vmatprep.subr.bf16.mxu1 %v4268_v21  ;;  %v2151_v49 = vadd.f32 %v3140_v24, %v2008_v12 }
 0x96e   : > { %v2170_v58 = vadd.f32 %v3155_v23, %v2033_v3 }
 0x970   : > { %v3447_v44 = vpop.f32.mrb[88].mxu0  ;;  %v2018_v50 = vpop.permute.xlu0 %2017 }
 0x971   : > { %v2494_v45 = vpop.f32.mrb[89].mxu0  ;;  %v2159_v7 = vadd.f32 %v3146_v17, %v2018_v50 }
 0x972   : > { %v3448_v14 = vpop.f32.mrb[90].mxu0 }
 0x973   : > { %v4396_v15 = vpack.c.bf16 %v3448_v14, %v3447_v44  ;;  %v2497_v19 = vpop.f32.mrb[91].mxu0 }
 0x974   : > { %v4398_v10 = vpack.c.bf16 %v2497_v19, %v2494_v45  ;;  %v2028_v28 = vpop.permute.xlu0 %2027 }
 0x975   : > { %v2167_v31 = vadd.f32 %v3152_v40, %v2028_v28 }
 0xa2a   : > { %v3411_v43 = vpop.f32.mrb[80].mxu1 }
 0xa2b   : > { %v2216_v41 = vadd.f32 %v3411_v43, %v2151_v49  ;;  %v2207_v13 = vpop.f32.mrb[81].mxu1 }
 0xa2c   : > { %v2208_v55 = vadd.f32 %v2207_v13, %v2143_v51  ;;  %v3412_v57 = vpop.f32.mrb[82].mxu1 }
 0xa2d   : > { %v3019_v46 = vmul.f32 -1.442695, %v2216_v41  ;;  %v2219_v63 = vadd.f32 %v3412_v57, %v2154_v52  ;;  %v2210_v18 = vpop.f32.mrb[83].mxu1 }
 0xa2e   : > { %v3017_v0 = vmul.f32 -1.442695, %v2208_v55  ;;  %v2211_v1 = vadd.f32 %v2210_v18, %v2146_v61 }
 0xa2f   : > { %3594 = vpow2.f32 %v3019_v46  ;;  %v3020_v20 = vmul.f32 -1.442695, %v2219_v63 }
 0xa30   : > { %3596 = vpow2.f32 %v3017_v0  ;;  %v3018_v4 = vmul.f32 -1.442695, %v2211_v1 }
 0xa31   : > { %3598 = vpow2.f32 %v3020_v20 }
 0xa32   : > { %3600 = vpow2.f32 %v3018_v4  ;;  %v3415_v9 = vpop.f32.mrb[84].mxu1 }
 0xa33   : > { %v4400_v24 = vadd.f32 %v3415_v9, %v2167_v31  ;;  %v2223_v34 = vpop.f32.mrb[85].mxu1 }
 0xa34   : > { %v4402_v36 = vadd.f32 %v2223_v34, %v2159_v7  ;;  %v3416_v22 = vpop.f32.mrb[86].mxu1 }
 0xa35   : > { %v4404_v26 = vadd.f32 %v3416_v22, %v2170_v58  ;;  %v2226_v32 = vpop.f32.mrb[87].mxu1 }
 0xa36   : > { %v4406_v37 = vadd.f32 %v2226_v32, %v2162_v25 }
 0xa39   : > { %v3595_v29 = vpop.eup %3594 }
 0xa3a   : > { %v3597_v35 = vpop.eup %3596  ;;  %v2264_v39 = vadd.f32 1.0, %v3595_v29  ;;  %v3423_v40 = vpop.f32.mrb[88].mxu1 }
 0xa3b   : > { %v3599_v30 = vpop.eup %3598  ;;  %v2262_v56 = vadd.f32 1.0, %v3597_v35  ;;  %v2332_v17 = vpop.f32.mrb[89].mxu1 }
 0xa3c   : > { %v3601_v44 = vpop.eup %3600  ;;  %3602 = vrcp.f32 %v2264_v39  ;;  %v2265_v45 = vadd.f32 1.0, %v3599_v30  ;;  %v3424_v23 = vpop.f32.mrb[90].mxu1  ;;  %v3549_v30 = vld [vmem:[%s4551_s8 + $0x8] ss:$12 sps:$4 sm:$0xff]  }
 0xa3d   : > { %3604 = vrcp.f32 %v2262_v56  ;;  %v2263_v14 = vadd.f32 1.0, %v3601_v44  ;;  %v4408_v19 = vpack.c.bf16 %v3424_v23, %v3423_v40  ;;  %v2335_v38 = vpop.f32.mrb[91].mxu1  ;;  %v3548_v40 = vld [vmem:[%s4551_s8 + $0x4] ss:$12 sps:$4 sm:$0xff]  }
 0xa3e   : > { %3606 = vrcp.f32 %v2265_v45  ;;  %v4410_v42 = vpack.c.bf16 %v2335_v38, %v2332_v17 }
 0xa3f   : > { %3608 = vrcp.f32 %v2263_v14 }
 0xa46   : > { %v3603_v47 = vpop.eup %3602 }
 0xa47   : > { %v3605_v12 = vpop.eup %3604  ;;  %v4422_v41 = vmul.f32 %v3603_v47, %v4252_v8 }
 0xa48   : > { %v3607_v48 = vpop.eup %3606  ;;  %v4416_v43 = vmul.f32 %v3605_v12, %v4230_v60 }
 0xa49   : > { %v3609_v49 = vpop.eup %3608  ;;  %v4413_v50 = vmul.f32 %v3607_v48, %v4254_v16 }
 0xa4a   : > { %v4419_v51 = vmul.f32 %v3609_v49, %v4232_v2 }
 0xa4b   : > { %v4430_v52 = vpack.c.bf16 %v4413_v50, %v4422_v41 }
 0xa4c   : > { %v4426_v13 = vpack.c.bf16 %v4419_v51, %v4416_v43 }
 0xa4e   : > { %3425 = vmatprep.mubr.msk.bf16.mxu1 %vm458_vm4, %v4426_v13  ;;  %3449 = vmatprep.mubr.msk.bf16.mxu0 %vm458_vm4, %v4426_v13 }
 0xa4f   : > { %3426 = vmatmul.mubr.msk.bf16.gmra.mrb[92].mxu1 %vm458_vm4, %v4430_v52  ;;  %3450 = vmatmul.mubr.msk.bf16.gmra.mrb[92].mxu0 %vm458_vm4, %v4430_v52 }
 0xa50   : > { %3433 = vmatprep.mubr.msk.bf16.mxu1 %vm458_vm4, %v4410_v42  ;;  %2730 = vmatprep.mubr.bf16.mxu0 %v3548_v40 }
 0xa57   : > { %3434 = vmatmul.mubr.msk.bf16.vlgmr.msra.gmra.mrb[96].mxu1 %vm458_vm4, %v4408_v19 }
 0xa58   : > { %3454 = vmatpush3.bf16.msra.mxu1 %v4268_v21 }
 0xa59   : > { %3455 = vmatprep.subr.bf16.mxu1 %v4276_v33 }
 0xa5c   : > { %3456 = vmatpush3.bf16.msra.mxu1 %v4276_v33 }
 0xb22   : > { %v3427_v53 = vpop.f32.mrb[92].mxu1  ;;  %v3451_v55 = vpop.f32.mrb[92].mxu0 }
 0xb23   : > { %v2348_v57 = vpop.f32.mrb[93].mxu1  ;;  %v2510_v61 = vpop.f32.mrb[93].mxu0 }
 0xb24   : > { %v3428_v46 = vpop.f32.mrb[94].mxu1  ;;  %v3452_v63 = vpop.f32.mrb[94].mxu0 }
 0xb25   : > { %v4447_v18 = vpack.c.bf16 %v3428_v46, %v3427_v53  ;;  %v4449_v0 = vpack.c.bf16 %v3452_v63, %v3451_v55  ;;  %v2351_v1 = vpop.f32.mrb[95].mxu1  ;;  %v2513_v20 = vpop.f32.mrb[95].mxu0 }
 0xb26   : > { %v4451_v28 = vpack.c.bf16 %v2351_v1, %v2348_v57  ;;  %v4453_v4 = vpack.c.bf16 %v2513_v20, %v2510_v61 }
 0xb28   : > { %3437 = vmatprep.mubr.msk.bf16.mxu1 %vm458_vm4, %v4451_v28 }
 0xb29   : > { %3438 = vmatmul.mubr.msk.bf16.gmra.mrb[100].mxu1 %vm458_vm4, %v4447_v18 }
 0xb2a   : > { %v3435_v21 = vpop.f32.mrb[96].mxu1  ;;  %3457 = vmatprep.mubr.msk.bf16.mxu1 %vm458_vm4, %v4398_v10 }
 0xb2b   : > { %v2446_v33 = vmul.f32 2.0, %v3435_v21  ;;  %v2413_v31 = vpop.f32.mrb[97].mxu1 }
 0xb2c   : > { %v2444_v3 = vmul.f32 2.0, %v2413_v31  ;;  %v3436_v9 = vpop.f32.mrb[98].mxu1 }
 0xb2d   : > { %v2447_v7 = vmul.f32 2.0, %v3436_v9  ;;  %v2416_v34 = vpop.f32.mrb[99].mxu1  ;;  %v2454_v22 = vsub.f32 %v2446_v33, %v4228_v5 }
 0xb2e   : > { %v2445_v58 = vmul.f32 2.0, %v2416_v34  ;;  %v2452_v32 = vsub.f32 %v2444_v3, %v4214_v54 }
 0xb2f   : > { %v2455_v25 = vsub.f32 %v2447_v7, %v4236_v27 }
 0xb30   : > { %v2453_v29 = vsub.f32 %v2445_v58, %v4218_v59 }
 0xb31   : > { %3458 = vmatmul.mubr.msk.bf16.vlgmr.msra.gmra.mrb[104].mxu1 %vm458_vm4, %v4396_v15  ;;  %v2623_v35 = vpack.c.bf16 %v2455_v25, %v2454_v22 }
 0xb32   : > { %3461 = vmatprep.mubr.msk.bf16.mxu1 %vm458_vm4, %v4453_v4  ;;  %v2622_v39 = vpack.c.bf16 %v2453_v29, %v2452_v32 }
 0xb34   : > { %3188 = vmatprep.subr.bf16.mxu0 %v2622_v39  ;;  %v2645_v39 = vpop.permute.xlu0 %2644 }
 0xb35   : > { %3189 = vmatpush3.bf16.msra.mxu0 %v4224_v62 }
 0xb36   : > { %3190 = vmatprep.subr.bf16.mxu0 %v2623_v35 }
 0xb39   : > { %3462 = vmatmul.mubr.msk.bf16.gmra.mrb[108].mxu1 %vm458_vm4, %v4449_v0  ;;  %3191 = vmatpush3.bf16.msra.mxu0 %v4246_v6 }
 0xb3a   : > { %3473 = vmatprep.mubr.msk.bf16.mxu1 %vm2095_vm9, %v3549_v30 }
 0xbfc   : > { %v3439_v56 = vpop.f32.mrb[100].mxu1 }
 0xbfd   : > { %v2450_v17 = vmul.f32 2.0, %v3439_v56  ;;  %v2429_v62 = vpop.f32.mrb[101].mxu1 }
 0xbfe   : > { %v2448_v44 = vmul.f32 2.0, %v2429_v62  ;;  %v3440_v45 = vpop.f32.mrb[102].mxu1 }
 0xbff   : > { %v2451_v23 = vmul.f32 2.0, %v3440_v45  ;;  %v2432_v14 = vpop.f32.mrb[103].mxu1  ;;  %v2458_v6 = vsub.f32 %v2450_v17, %v4422_v41 }
 0xc00   : > { %v2449_v38 = vmul.f32 2.0, %v2432_v14  ;;  %v2456_v12 = vsub.f32 %v2448_v44, %v4416_v43 }
 0xc01   : > { %v2459_v47 = vsub.f32 %v2451_v23, %v4413_v50 }
 0xc02   : > { %v2457_v48 = vsub.f32 %v2449_v38, %v4419_v51 }
 0xc03   : > { %v2625_v49 = vpack.c.bf16 %v2459_v47, %v2458_v6  ;;  %v2650_v6 = vpop.permute.xlu1 %2649 }
 0xc04   : > { %v3459_v53 = vpop.f32.mrb[104].mxu1  ;;  %v2624_v55 = vpack.c.bf16 %v2457_v48, %v2456_v12 }
 0xc05   : > { %v2608_v57 = vmul.f32 2.0, %v3459_v53  ;;  %v2575_v61 = vpop.f32.mrb[105].mxu1 }
 0xc06   : > { %v2606_v46 = vmul.f32 2.0, %v2575_v61  ;;  %v3460_v63 = vpop.f32.mrb[106].mxu1  ;;  %3192 = vmatprep.subr.bf16.mxu0 %v2624_v55 }
 0xc07   : > { %v2609_v1 = vmul.f32 2.0, %v3460_v63  ;;  %v2578_v20 = vpop.f32.mrb[107].mxu1  ;;  %3193 = vmatpush3.bf16.msra.mxu0 %v4426_v13  ;;  %v2616_v33 = vsub.f32 %v2608_v57, %v4228_v5 }
 0xc08   : > { %v2607_v21 = vmul.f32 2.0, %v2578_v20  ;;  %3194 = vmatprep.subr.bf16.mxu0 %v2625_v49  ;;  %v2614_v3 = vsub.f32 %v2606_v46, %v4214_v54 }
 0xc09   : > { %v2617_v31 = vsub.f32 %v2609_v1, %v4236_v27  ;;  %v2655_v1 = vpop.permute.xlu0 %2654 }
 0xc0a   : > { %v2615_v9 = vsub.f32 %v2607_v21, %v4218_v59 }
 0xc0b   : > { %3195 = vmatpush3.bf16.msra.mxu0 %v4430_v52  ;;  %v2627_v7 = vpack.c.bf16 %v2617_v31, %v2616_v33  ;;  %v2660_v31 = vpop.permute.xlu1 %2659 }
 0xc0c   : > { %v3463_v34 = vpop.f32.mrb[108].mxu1  ;;  %3196 = vmatprep.subr.bf16.mxu0 %v4398_v10  ;;  %v2626_v58 = vpack.c.bf16 %v2615_v9, %v2614_v3 }
 0xc0d   : > { %v2612_v22 = vmul.f32 2.0, %v3463_v34  ;;  %v2591_v25 = vpop.f32.mrb[109].mxu1 }
 0xc0e   : > { %v2610_v13 = vmul.f32 2.0, %v2591_v25  ;;  %v3464_v32 = vpop.f32.mrb[110].mxu1  ;;  %3465 = vmatprep.subr.bf16.mxu1 %v2626_v58 }
 0xc0f   : > { %v2613_v29 = vmul.f32 2.0, %v3464_v32  ;;  %v2594_v5 = vpop.f32.mrb[111].mxu1  ;;  %3197 = vmatpush3.bf16.msra.mxu0 %v4410_v42  ;;  %3466 = vmatpush3.bf16.msra.mxu1 %v2626_v58  ;;  %v2620_v59 = vsub.f32 %v2612_v22, %v4422_v41  ;;  %v3022_v41 = vmul.f32 -1.442695, %v4406_v37 }
 0xc10   : > { %v2611_v54 = vmul.f32 2.0, %v2594_v5  ;;  %3198 = vmatprep.subr.bf16.mxu0 %v4396_v15  ;;  %3467 = vmatprep.subr.bf16.mxu1 %v2627_v7  ;;  %v2618_v10 = vsub.f32 %v2610_v13, %v4416_v43  ;;  %v3546_v15 = vld [vmem:[%s4551_s8] ss:$12 sps:$4 sm:$0xff]   ;;  %v3553_v43 = vld [vmem:[%s4551_s8 + $0x18] ss:$12 sps:$4 sm:$0xff]  }
 0xc11   : > { %v2621_v27 = vsub.f32 %v2613_v29, %v4413_v50  ;;  %v3551_v50 = vld [vmem:[%s4551_s8 + $0x1c] ss:$12 sps:$4 sm:$0xff]  }
 0xc12   : > { %v2619_v52 = vsub.f32 %v2611_v54, %v4419_v51  ;;  %v3021_v51 = vmul.f32 -1.442695, %v4402_v36 }
 0xc13   : > { %3199 = vmatpush3.bf16.msra.mxu0 %v4408_v19  ;;  %3468 = vmatpush3.bf16.msra.mxu1 %v2627_v7  ;;  %v2629_v35 = vpack.c.bf16 %v2621_v27, %v2620_v59  ;;  %v3550_v19 = vld [vmem:[%s4551_s8 + $0x20] ss:$12 sps:$4 sm:$0xff]  }
 0xc14   : > { %3200 = vmatprep.subr.bf16.mxu0 %v4453_v4  ;;  %v2628_v42 = vpack.c.bf16 %v2619_v52, %v2618_v10  ;;  %3610 = vpow2.f32 %v3021_v51 }
 0xc15   : > { %3612 = vpow2.f32 %v3022_v41 }
 0xc16   : > { %3469 = vmatprep.subr.bf16.mxu1 %v2628_v42 }
 0xc17   : > { %3201 = vmatpush3.bf16.msra.mxu0 %v4451_v28  ;;  %3470 = vmatpush3.bf16.msra.mxu1 %v2628_v42 }
 0xc18   : > { %3202 = vmatprep.subr.bf16.mxu0 %v4449_v0  ;;  %3471 = vmatprep.subr.bf16.mxu1 %v2629_v35  ;;  %v3024_v0 = vmul.f32 -1.442695, %v4404_v26 }
 0xc1b   : > { %3203 = vmatpush3.bf16.msra.mxu0 %v4447_v18  ;;  %3472 = vmatpush3.bf16.msra.mxu1 %v2629_v35  ;;  %v3023_v18 = vmul.f32 -1.442695, %v4400_v24 }
 0xc1c   : > { %3477 = vmatprep.subr.bf16.mxu1 %v3647_v11 }
 0xc1d   : > { %3614 = vpow2.f32 %v3023_v18 }
 0xc1e   : > { %2731 = vmatmul.mubr.bf16.vlgmr.msra.gmra.mrb[96].mxu0 %v3546_v15  ;;  %3474 = vmatmul.mubr.msk.bf16.vlgmr.msra.gmra.mrb[112].mxu1 %vm2095_vm9, %v3550_v19  ;;  %v3611_v28 = vpop.eup %3610  ;;  %3616 = vpow2.f32 %v3024_v0 }
 0xc1f   : > { %2738 = vmatprep.mubr.bf16.mxu0 %v3551_v50  ;;  %3481 = vmatprep.mubr.msk.bf16.mxu1 %vm3648_vm2, %v3647_v11  ;;  %v3613_v4 = vpop.eup %3612  ;;  %v2266_v40 = vadd.f32 1.0, %v3611_v28 }
 0xc20   : > { %v2267_v44 = vadd.f32 1.0, %v3613_v4  ;;  %v2829_v4 = vlaneseq }
 0xc21   : > { %3618 = vrcp.f32 %v2266_v40 }
 0xc22   : > { %3620 = vrcp.f32 %v2267_v44 }
 0xc26   : > { %2739 = vmatmul.mubr.bf16.gmra.mrb[100].mxu0 %v3553_v43 }
 0xc27   : > { %v3615_v26 = vpop.eup %3614 }
 0xc28   : > { %v3617_v48 = vpop.eup %3616  ;;  %v2268_v49 = vadd.f32 1.0, %v3615_v26 }
 0xc29   : > { %v2269_v61 = vadd.f32 1.0, %v3617_v48 }
 0xc2b   : > { %v3619_v3 = vpop.eup %3618 }
 0xc2c   : > { %v3621_v34 = vpop.eup %3620  ;;  %v2804_v22 = vsub.f32 1.0, %v3619_v3  ;;  %v2800_v13 = vmul.f32 %v3619_v3, %v4230_v60 }
 0xc2d   : > { %v2805_v32 = vsub.f32 1.0, %v3621_v34  ;;  %v2801_v54 = vmul.f32 %v3621_v34, %v4232_v2 }
 0xcf1   : > { %v3204_v30 = vpop.f32.mrb[96].mxu0  ;;  %v3475_v56 = vpop.f32.mrb[112].mxu1 }
 0xcf2   : > { %v3205_v17 = vpop.f32.mrb[97].mxu0  ;;  %v2781_v62 = vpop.f32.mrb[113].mxu1 }
 0xcf3   : > { %v3206_v36 = vadd.f32 %v3205_v17, %v3204_v30  ;;  %v3207_v45 = vpop.f32.mrb[98].mxu0  ;;  %v3476_v37 = vpop.f32.mrb[114].mxu1 }
 0xcf4   : > { %v3208_v23 = vpop.f32.mrb[99].mxu0  ;;  %v2784_v14 = vpop.f32.mrb[115].mxu1 }
 0xcf5   : > { %v3209_v24 = vadd.f32 %v3208_v23, %v3207_v45  ;;  %v2733_v38 = vadd.f32 %v3206_v36, %v2645_v39 }
 0xcf7   : > { %v2782_v47 = vadd.f32 %v2781_v62, %v2733_v38  ;;  %v2736_v12 = vadd.f32 %v3209_v24, %v2650_v6 }
 0xcf9   : > { %3622 = vtanh.f32 %v2782_v47  ;;  %v2785_v53 = vadd.f32 %v2784_v14, %v2736_v12  ;;  %v3210_v55 = vpop.f32.mrb[100].mxu0 }
 0xcfa   : > { %v3211_v57 = vpop.f32.mrb[101].mxu0 }
 0xcfb   : > { %3624 = vtanh.f32 %v2785_v53  ;;  %v3212_v46 = vadd.f32 %v3211_v57, %v3210_v55  ;;  %v3213_v63 = vpop.f32.mrb[102].mxu0 }
 0xcfc   : > { %v3214_v20 = vpop.f32.mrb[103].mxu0  ;;  %3626 = vrcp.f32 %v2268_v49 }
 0xcfd   : > { %v2741_v21 = vadd.f32 %v3212_v46, %v2655_v1  ;;  %v3215_v33 = vadd.f32 %v3214_v20, %v3213_v63  ;;  %3628 = vrcp.f32 %v2269_v61 }
 0xcff   : > { %v2790_v9 = vadd.f32 %v3475_v56, %v2741_v21  ;;  %v2744_v7 = vadd.f32 %v3215_v33, %v2660_v31 }
 0xd01   : > { %3630 = vtanh.f32 %v2790_v9  ;;  %v2793_v58 = vadd.f32 %v3476_v37, %v2744_v7 }
 0xd03   : > { %v3623_v25 = vpop.eup %3622  ;;  %3632 = vtanh.f32 %v2793_v58 }
 0xd04   : > { %v2808_v29 = vmul.f32 %v3623_v25, %v2804_v22 }
 0xd05   : > { %v3625_v5 = vpop.eup %3624 }
 0xd06   : > { %v2809_v59 = vmul.f32 %v3625_v5, %v2805_v32  ;;  %v2812_v27 = vadd.f32 %v2808_v29, %v2800_v13  ;;  %v3627_v10 = vpop.eup %3626 }
 0xd07   : > { %v3629_v35 = vpop.eup %3628  ;;  %v2806_v15 = vsub.f32 1.0, %v3627_v10  ;;  %v2802_v60 = vmul.f32 %v3627_v10, %v4252_v8  ;;  %v2820_v8 = vld [vmem:[%s4553_s10] sm:$0x1] }
 0xd08   : > { %v2813_v52 = vadd.f32 %v2809_v59, %v2801_v54  ;;  %2816 = vst.msk [vmem:[#allocation2 + $0x20] sm:$0xff] %vm458_vm4, %v2812_v27  ;;  %v2807_v50 = vsub.f32 1.0, %v3629_v35  ;;  %v2803_v2 = vmul.f32 %v3629_v35, %v4254_v16  ;;  %v2827_v16 = vpop.permute.xlu0 %2826 }
 0xd0a   : > { %2817 = vst.msk [vmem:[#allocation2 + $0x28] sm:$0xff] %vm458_vm4, %v2813_v52  ;;  %v2821_v42 = vpack.c.bf16 %v2813_v52, %v2812_v27 }
 0xd0b   : > { %v3631_v19 = vpop.eup %3630 }
 0xd0c   : > { %3478 = vmatpush3.bf16.msra.mxu1 %v2821_v42  ;;  %v2810_v43 = vmul.f32 %v3631_v19, %v2806_v15 }
 0xd0d   : > { %v3633_v51 = vpop.eup %3632  ;;  %3479 = vmatprep.subr.bf16.mxu1 %v3647_v11  ;;  %v2830_v11 = vshrl.u32 %v2829_v4, 7 }
 0xd0e   : > { %v2811_v41 = vmul.f32 %v3633_v51, %v2807_v50  ;;  %v2814_v18 = vadd.f32 %v2810_v43, %v2802_v60 }
 0xd0f   : > { %v2831_v39 = vsub.s32 0, %v2830_v11 }
 0xd10   : > { %v2815_v0 = vadd.f32 %v2811_v41, %v2803_v2  ;;  %2818 = vst.msk [vmem:[#allocation2 + $0x30] sm:$0xff] %vm458_vm4, %v2814_v18 }
 0xd11   : > { %v2832_v40 = vrot.slane %v2827_v16, %v2831_v39 }
 0xd12   : > { %2819 = vst.msk [vmem:[#allocation2 + $0x38] sm:$0xff] %vm458_vm4, %v2815_v0  ;;  %v2822_v28 = vpack.c.bf16 %v2815_v0, %v2814_v18 }
 0xd14   : > { %3480 = vmatpush3.bf16.msra.mxu1 %v2822_v28 }
 0xd17   : > { %3482 = vmatmul.mubr.msk.bf16.vlgmr.msra.gmra.mrb[116].mxu1 %vm458_vm4, %v2820_v8 }
 0xdea   : > { %v2870_v30 = vpop.f32.mrb[116].mxu1 }
 0xdeb   : > { %v2871_v56 = vadd.f32 %v2870_v30, %v2832_v40  ;;  %v3483_v17 = vpop.f32.mrb[117].mxu1 }
 0xdec   : > { %v2873_v62 = vpop.f32.mrb[118].mxu1 }
 0xded   : > { %2877 = vst.msk [vmem:[#allocation3] sm:$0x1] %vm2876_vm10, %v2871_v56  ;;  %2878 = vst.msk [vmem:[%s391_s27] sm:$0x1] %vm2876_vm10, %v2871_v56  ;;  %v3484_v44 = vpop.f32.mrb[119].mxu1 }
 0xdee PF: > { %s24_s23 = sadd.s32 1, %s3644_s23  }
 0xdef   : > { %p21_p5 = scmp.ge.s32.totalorder %s24_s23, 6  }
 0xdf1   :  { %23 = sbr.rel (!%p21_p5) target bundleno = 3 (0x3), region = 101 }

</bundles_post_ra>
